<compile_context>
chip_gen: v7x
topology: tpu7x:2x2x1
jax: 0.10.0
libtpu: 0.0.40
codegen_flags: <defaults>
</compile_context>

<pallas_src>
import functools

import jax
import jax.numpy as jnp
from jax import lax
from jax.experimental import pallas as pl
from jax.experimental.pallas import tpu as pltpu

POOL_KS = (5, 9, 13)   # original SPP kernel sizes (stride 1, pad k//2)
PAD_H = 2              # row halo: one cascaded 5x5 pool reaches 2 rows out


def spp_kernel(x_ref, w1_ref, b1_ref, w2_ref, b2_ref, o_ref, buf_ref, acc_ref,
               *, w_real):
    # x_ref:  (1, H, W, C1)  bf16 input tile (NHWC), one batch element
    # w1_ref: (C1, C_)       cv1 1x1 weight, BN scale pre-folded, bf16
    # b1_ref: (1, C_)        cv1 folded BN bias, f32
    # w2_ref: (4, C_, C2)    cv2 1x1 weight, BN scale pre-folded, bf16,
    #                        split per concat member along the leading dim
    # b2_ref: (1, C2)        cv2 folded BN bias, f32
    # o_ref:  (1, H, W, C2)
    # buf_ref:(H+2*PAD_H, W, C_) f32 pooling scratch (zero row-halo)
    # acc_ref:(H*W, C2)      f32 cv2 accumulator scratch
    # w_real: static int, real (unpadded) image width
    _, H, W, C1 = x_ref.shape          # W is the (possibly padded) width
    C_ = w1_ref.shape[1]
    C2 = w2_ref.shape[2]

    # ---- zero only the 2*PAD_H halo rows of the pooling scratch -----------
    # The interior is fully overwritten below.  Re-zeroing the 4 thin rows
    # each grid step keeps the per-core scratch valid when the batch grid
    # axis is sharded across TensorCores, and is <10% of the interior writes.
    buf_ref[0:PAD_H, :, :] = jnp.zeros((PAD_H, W, C_), jnp.float32)
    buf_ref[PAD_H + H:, :, :] = jnp.zeros((PAD_H, W, C_), jnp.float32)

    # ---- cv1: 1x1 conv (bf16 MXU operands, f32 accumulate) + bias + ReLU ---
    x = x_ref[0].reshape(H * W, C1)                       # bf16, free: W%8==0
    y = jnp.dot(x, w1_ref[...], preferred_element_type=jnp.float32)
    y = jnp.maximum(y + b1_ref[...], 0.0)                 # (H*W, C_) f32, >=0

    if w_real != W:
        # Padded columns: the folded bias could make them positive, which
        # would corrupt edge pooling windows -> force them back to 0
        # (0 == -inf for the pools since y >= 0).  Traced only when padding
        # was actually added by the wrapper.
        col = lax.broadcasted_iota(jnp.int32, (H, W, C_), 1).reshape(H * W, C_)
        y = jnp.where(col < w_real, y, 0.0)

    # cv2 partial matmul for concat member 0 (identity branch).  The first
    # write is an assignment, so the accumulator needs no zero-init.
    acc_ref[...] = jnp.dot(y.astype(jnp.bfloat16), w2_ref[0],
                           preferred_element_type=jnp.float32)   # (H*W, C2)

    # Feed the pooling cascade.
    buf_ref[PAD_H:PAD_H + H, :, :] = y.reshape(H, W, C_)

    # Column index per element, reused by every cascade stage's edge masks.
    col3 = lax.broadcasted_iota(jnp.int32, (H, W, C_), 1)

    def shift_cols(t, dw):
        # Returns t[:, w + dw, :] at position w; out-of-range columns -> 0,
        # which is exact because every window contains its own (>= 0) centre.
        # pltpu.roll follows jnp.roll semantics: out[w] = in[(w - shift) % W].
        r = pltpu.roll(t, (-dw) % W, axis=1)               # XLU sublane rotate
        if dw > 0:
            return jnp.where(col3 < W - dw, r, 0.0)
        return jnp.where(col3 >= -dw, r, 0.0)

    # ---- cascaded 5x5 max pools (== pools 5, 9, 13), cv2 fused -------------
    for i in range(1, len(POOL_KS) + 1):
        # Row pass: leading-axis slices of the scratch (free base offsets),
        # width is exactly W (no wasted halo columns any more).
        t = buf_ref[0:H, :, :]
        for dy in range(1, 5):
            t = jnp.maximum(t, buf_ref[dy:dy + H, :, :])
        # Column pass: XLU rotations + edge masks instead of sublane slices.
        p = t
        for dw in (-2, -1, 1, 2):
            p = jnp.maximum(p, shift_cols(t, dw))

        # Fused cv2: concat([y,p5,p9,p13]) @ W2 == sum_i pool_i @ W2[i]
        acc_ref[...] += jnp.dot(p.reshape(H * W, C_).astype(jnp.bfloat16),
                                w2_ref[i], preferred_element_type=jnp.float32)

        if i < len(POOL_KS):
            # Feed the cascade: pool5 of the previous stage's output.
            buf_ref[PAD_H:PAD_H + H, :, :] = p

    # ---- cv2 folded BN bias + ReLU + store ---------------------------------
    z = jnp.maximum(acc_ref[...] + b2_ref[...], 0.0)
    o_ref[0] = z.reshape(H, W, C2).astype(o_ref.dtype)


def _vmem_limit_bytes(H, W, C1, C_, C2):
    # Rough budget: double-buffered in/out tiles, weights, pooling + acc
    # scratch, live intermediates, plus slack.  Cap at ~0.8x the physical VMEM
    # of whatever chip we are actually on (v5e/v6e: 128 MiB, v7x: 64 MiB).
    blk = (H * W * C1 * 2 + H * W * C2 * 4) * 2          # bf16 in, f32 out, 2x buffered
    wgt = (C1 * C_ + 4 * C_ * C2) * 2 * 2 + (C_ + C2) * 4 * 2
    scratch = (H + 2 * PAD_H) * W * C_ * 4 + H * W * C2 * 4
    live = 6 * H * W * max(C_, C2) * 4
    est = blk + wgt + scratch + live + (8 << 20)
    try:
        phys = int(getattr(pltpu.get_tpu_info(), "vmem_capacity_bytes",
                           64 << 20))
    except Exception:
        phys = 64 << 20                                   # conservative (v7x)
    cap = int(phys * 0.8)
    return int(min(max(est, 32 << 20), cap))


@jax.jit
def spp_forward(x, w1f, b1, w2f, b2):
    """x: (N,H,W,C1) f32; w1f: (C1,C_) bf16; b1: (1,C_) f32;
    w2f: (4,C_,C2) bf16; b2: (1,C2) f32."""
    N, H, W, C1 = x.shape
    C_ = w1f.shape[1]
    C2 = w2f.shape[2]
    out_dtype = x.dtype

    # Pad W up to the f32 sublane tile so the (H,W)->(H*W) merges are free.
    W_pad = ((W + 7) // 8) * 8
    if W_pad != W:
        x = jnp.pad(x, ((0, 0), (0, 0), (0, W_pad - W), (0, 0)))
    x = x.astype(jnp.bfloat16)        # bf16 MXU operand; halves input DMA too

    kern = functools.partial(spp_kernel, w_real=W)
    out = pl.pallas_call(
        kern,
        out_shape=jax.ShapeDtypeStruct((N, H, W_pad, C2), out_dtype),
        grid_spec=pltpu.PrefetchScalarGridSpec(
            num_scalar_prefetch=0,
            grid=(N,),
            in_specs=[
                pl.BlockSpec((1, H, W_pad, C1), lambda n: (n, 0, 0, 0)),
                pl.BlockSpec((C1, C_), lambda n: (0, 0)),
                pl.BlockSpec((1, C_), lambda n: (0, 0)),
                pl.BlockSpec((4, C_, C2), lambda n: (0, 0, 0)),
                pl.BlockSpec((1, C2), lambda n: (0, 0)),
            ],
            out_specs=pl.BlockSpec((1, H, W_pad, C2), lambda n: (n, 0, 0, 0)),
            scratch_shapes=[
                pltpu.VMEM((H + 2 * PAD_H, W_pad, C_), jnp.float32),
                pltpu.VMEM((H * W_pad, C2), jnp.float32),
            ],
        ),
        compiler_params=pltpu.CompilerParams(
            dimension_semantics=("parallel",),
            vmem_limit_bytes=_vmem_limit_bytes(H, W_pad, C1, C_, C2),
        ),
    )(x, w1f, b1, w2f, b2)
    if W_pad != W:
        out = out[:, :, :W, :]
    return out


def fold_bn(gamma, beta, mean, var, eps=1e-5):
    scale = gamma / jnp.sqrt(var + eps)
    bias = beta - mean * scale
    return scale, bias


def fold_spp_params(w1, bn1, w2, bn2):
    """Fold eval-mode BN scale into the 1x1 conv weights; cast weights to
    bf16 for the MXU (biases stay f32)."""
    s1, b1 = fold_bn(*bn1)
    s2, b2 = fold_bn(*bn2)
    c_ = w1.shape[1]
    c2 = w2.shape[1]
    w1f = (w1 * s1[None, :]).astype(jnp.bfloat16)
    w2f = (w2 * s2[None, :]).reshape(4, c_, c2).astype(jnp.bfloat16)
    return (w1f, b1.reshape(1, c_).astype(jnp.float32),
            w2f, b2.reshape(1, c2).astype(jnp.float32))


def ref_spp(x, w1, bn1, w2, bn2):
    """Plain-JAX f32 reference (mirrors the PyTorch eval-mode forward)."""
    s1, b1 = fold_bn(*bn1)
    s2, b2 = fold_bn(*bn2)
    y = jnp.einsum('nhwc,cd->nhwd', x, w1) * s1 + b1
    y = jnp.maximum(y, 0.0)
    pools = [y]
    for k in POOL_KS:
        p = k // 2
        pools.append(lax.reduce_window(
            y, -jnp.inf, lax.max,
            window_dimensions=(1, k, k, 1),
            window_strides=(1, 1, 1, 1),
            padding=((0, 0), (p, p), (p, p), (0, 0))))
    cat = jnp.concatenate(pools, axis=-1)
    z = jnp.einsum('nhwc,cd->nhwd', cat, w2) * s2 + b2
    return jnp.maximum(z, 0.0)


def ref_spp_matched(x, w1f, b1, w2f, b2):
    """Plain-JAX reference replicating the kernel's bf16 quantization points
    (tight numerical check of kernel structure: pooling, masks, fusion)."""
    xq = x.astype(jnp.bfloat16).astype(jnp.float32)
    w1 = w1f.astype(jnp.float32)
    y = jnp.maximum(jnp.einsum('nhwc,cd->nhwd', xq, w1) + b1[0], 0.0)
    pools = [y]
    p = y
    for _ in POOL_KS:                      # SPPF cascade of 5x5 pools
        p = lax.reduce_window(p, -jnp.inf, lax.max, (1, 5, 5, 1), (1, 1, 1, 1),
                              ((0, 0), (2, 2), (2, 2), (0, 0)))
        pools.append(p)
    z = b2[0]
    for i, q in enumerate(pools):
        z = z + jnp.einsum('nhwc,cd->nhwd',
                           q.astype(jnp.bfloat16).astype(jnp.float32),
                           w2f[i].astype(jnp.float32))
    return jnp.maximum(z, 0.0)


if __name__ == "__main__":
    # Small shapes consistent with SPP(c1=4, c2=8), k=(5, 9, 13).
    N, C1, H, W = 2, 4, 16, 16
    C_ = C1 // 2           # 2
    C2 = 8

    key = jax.random.PRNGKey(0)
    ks = jax.random.split(key, 11)

    x = jax.random.normal(ks[0], (N, H, W, C1), dtype=jnp.float32)

    # cv1: Conv2d(c1, c_, 1, bias=False) + BN(c_) + ReLU
    w1 = 0.3 * jax.random.normal(ks[1], (C1, C_), dtype=jnp.float32)
    bn1 = (jax.random.uniform(ks[2], (C_,), minval=0.5, maxval=1.5),
           0.1 * jax.random.normal(ks[3], (C_,)),
           0.1 * jax.random.normal(ks[4], (C_,)),
           jax.random.uniform(ks[5], (C_,), minval=0.5, maxval=1.5))

    # cv2: Conv2d(4*c_, c2, 1, bias=False) + BN(c2) + ReLU
    w2 = 0.3 * jax.random.normal(ks[6], (4 * C_, C2), dtype=jnp.float32)
    bn2 = (jax.random.uniform(ks[7], (C2,), minval=0.5, maxval=1.5),
           0.1 * jax.random.normal(ks[8], (C2,)),
           0.1 * jax.random.normal(ks[9], (C2,)),
           jax.random.uniform(ks[10], (C2,), minval=0.5, maxval=1.5))

    w1f, b1, w2f, b2 = fold_spp_params(w1, bn1, w2, bn2)

    out = spp_forward(x, w1f, b1, w2f, b2)
    out = jax.block_until_ready(out)
    assert out.shape == (N, H, W, C2)

    # Tight check vs a reference that replicates the kernel's bf16
    # quantization points (validates pooling cascade, masks, fusion).
    matched = ref_spp_matched(x, w1f, b1, w2f, b2)
    err_m = float(jnp.max(jnp.abs(out - matched)))
    assert jnp.allclose(out, matched, atol=1e-2, rtol=1e-2), err_m

    # Loose sanity check vs the true f32 module semantics (bf16 MXU operands
    # introduce ~0.5% relative quantization error).
    expected = ref_spp(x, w1, bn1, w2, bn2)
    err_f = float(jnp.max(jnp.abs(out - expected)))
    assert jnp.allclose(out, expected, atol=0.25, rtol=0.1), err_f

    print("KERNEL_OK")
</pallas_src>

<mosaic_0001>
module attributes {stable_mosaic.version = 11 : i64} {
  func.func @spp_kernel(%arg0: i32, %arg1: memref<1x16x16x4xbf16, #tpu.memory_space<vmem>>, %arg2: memref<4x2xbf16, #tpu.memory_space<vmem>>, %arg3: memref<1x2xf32, #tpu.memory_space<vmem>>, %arg4: memref<4x2x8xbf16, #tpu.memory_space<vmem>>, %arg5: memref<1x8xf32, #tpu.memory_space<vmem>>, %arg6: memref<1x16x16x8xf32, #tpu.memory_space<vmem>>, %arg7: memref<20x16x2xf32, #tpu.memory_space<vmem>>, %arg8: memref<256x8xf32, #tpu.memory_space<vmem>>) attributes {dimension_semantics = [#tpu.dimension_semantics<parallel>], iteration_bounds = array<i64: 2>, scalar_prefetch = 0 : i64, scratch_operands = 2 : i64, tpu.core_type = #tpu.core_type<tc>, window_params = [{transform_indices = @transform_0, window_bounds = array<i64: 1, 16, 16, 4>}, {pipeline_mode = #tpu.pipeline_mode<synchronous>, transform_indices = @transform_1, window_bounds = array<i64: 4, 2>}, {pipeline_mode = #tpu.pipeline_mode<synchronous>, transform_indices = @transform_2, window_bounds = array<i64: 1, 2>}, {pipeline_mode = #tpu.pipeline_mode<synchronous>, transform_indices = @transform_3, window_bounds = array<i64: 4, 2, 8>}, {pipeline_mode = #tpu.pipeline_mode<synchronous>, transform_indices = @transform_4, window_bounds = array<i64: 1, 8>}, {transform_indices = @transform_5, window_bounds = array<i64: 1, 16, 16, 8>}]} {
    %cst = arith.constant 0.000000e+00 : f32
    %0 = vector.broadcast %cst : f32 to vector<2x16x2xf32>
    %c0 = arith.constant 0 : index
    %c0_0 = arith.constant 0 : index
    %c0_1 = arith.constant 0 : index
    %1 = vector.load %arg7[%c0, %c0_0, %c0_1] : memref<20x16x2xf32, #tpu.memory_space<vmem>>, vector<2x16x2xf32>
    tpu.vector_store %arg7[%c0, %c0_0, %c0_1], %0 {strides = array<i32>} : memref<20x16x2xf32, #tpu.memory_space<vmem>>, vector<2x16x2xf32>,
    %cst_2 = arith.constant 0.000000e+00 : f32
    %2 = vector.broadcast %cst_2 : f32 to vector<2x16x2xf32>
    %c18 = arith.constant 18 : index
    %c0_3 = arith.constant 0 : index
    %c0_4 = arith.constant 0 : index
    %3 = vector.load %arg7[%c18, %c0_3, %c0_4] : memref<20x16x2xf32, #tpu.memory_space<vmem>>, vector<2x16x2xf32>
    tpu.vector_store %arg7[%c18, %c0_3, %c0_4], %2 {strides = array<i32>} : memref<20x16x2xf32, #tpu.memory_space<vmem>>, vector<2x16x2xf32>,
    %c0_5 = arith.constant 0 : index
    %c0_6 = arith.constant 0 : index
    %c0_7 = arith.constant 0 : index
    %c0_8 = arith.constant 0 : index
    %4 = vector.load %arg1[%c0_5, %c0_6, %c0_7, %c0_8] : memref<1x16x16x4xbf16, #tpu.memory_space<vmem>>, vector<1x16x16x4xbf16>
    %5 = vector.shape_cast %4 : vector<1x16x16x4xbf16> to vector<16x16x4xbf16>
    %6 = vector.shape_cast %5 : vector<16x16x4xbf16> to vector<256x4xbf16>
    %c0_9 = arith.constant 0 : index
    %c0_10 = arith.constant 0 : index
    %7 = vector.load %arg2[%c0_9, %c0_10] : memref<4x2xbf16, #tpu.memory_space<vmem>>, vector<4x2xbf16>
    %cst_11 = arith.constant dense<0.000000e+00> : vector<256x2xf32>
    %8 = tpu.matmul %6, %7, %cst_11 {dimension_numbers = #tpu.dot_dimension_numbers<[1], [0], [0], [1], [0, 0, 1, 1], [], []>} : vector<256x4xbf16>, vector<4x2xbf16>, vector<256x2xf32> -> vector<256x2xf32>
    %c0_12 = arith.constant 0 : index
    %c0_13 = arith.constant 0 : index
    %9 = vector.load %arg3[%c0_12, %c0_13] : memref<1x2xf32, #tpu.memory_space<vmem>>, vector<1x2xf32>
    %10 = vector.broadcast %9 : vector<1x2xf32> to vector<256x2xf32>
    %11 = arith.addf %8, %10 : vector<256x2xf32>
    %cst_14 = arith.constant 0.000000e+00 : f32
    %12 = vector.broadcast %cst_14 : f32 to vector<256x2xf32>
    %13 = arith.maximumf %11, %12 : vector<256x2xf32>
    %14 = arith.truncf %13 : vector<256x2xf32> to vector<256x2xbf16>
    %c0_15 = arith.constant 0 : index
    %c0_16 = arith.constant 0 : index
    %c0_17 = arith.constant 0 : index
    %15 = vector.load %arg4[%c0_15, %c0_16, %c0_17] : memref<4x2x8xbf16, #tpu.memory_space<vmem>>, vector<1x2x8xbf16>
    %16 = vector.shape_cast %15 : vector<1x2x8xbf16> to vector<2x8xbf16>
    %cst_18 = arith.constant dense<0.000000e+00> : vector<256x8xf32>
    %17 = tpu.matmul %14, %16, %cst_18 {dimension_numbers = #tpu.dot_dimension_numbers<[1], [0], [0], [1], [0, 0, 1, 1], [], []>} : vector<256x2xbf16>, vector<2x8xbf16>, vector<256x8xf32> -> vector<256x8xf32>
    %c0_19 = arith.constant 0 : index
    %c0_20 = arith.constant 0 : index
    %18 = vector.load %arg8[%c0_19, %c0_20] : memref<256x8xf32, #tpu.memory_space<vmem>>, vector<256x8xf32>
    tpu.vector_store %arg8[%c0_19, %c0_20], %17 {strides = array<i32>} : memref<256x8xf32, #tpu.memory_space<vmem>>, vector<256x8xf32>,
    %19 = vector.shape_cast %13 : vector<256x2xf32> to vector<16x16x2xf32>
    %c2 = arith.constant 2 : index
    %c0_21 = arith.constant 0 : index
    %c0_22 = arith.constant 0 : index
    %20 = vector.load %arg7[%c2, %c0_21, %c0_22] : memref<20x16x2xf32, #tpu.memory_space<vmem>>, vector<16x16x2xf32>
    tpu.vector_store %arg7[%c2, %c0_21, %c0_22], %19 {strides = array<i32>} : memref<20x16x2xf32, #tpu.memory_space<vmem>>, vector<16x16x2xf32>,
    %21 = tpu.iota {dimensions = array<i32: 1>} : vector<16x16x2xi32>
    %c0_23 = arith.constant 0 : index
    %c0_24 = arith.constant 0 : index
    %c0_25 = arith.constant 0 : index
    %22 = vector.load %arg7[%c0_23, %c0_24, %c0_25] : memref<20x16x2xf32, #tpu.memory_space<vmem>>, vector<16x16x2xf32>
    %c1 = arith.constant 1 : index
    %c0_26 = arith.constant 0 : index
    %c0_27 = arith.constant 0 : index
    %23 = vector.load %arg7[%c1, %c0_26, %c0_27] : memref<20x16x2xf32, #tpu.memory_space<vmem>>, vector<16x16x2xf32>
    %24 = arith.maximumf %22, %23 : vector<16x16x2xf32>
    %c2_28 = arith.constant 2 : index
    %c0_29 = arith.constant 0 : index
    %c0_30 = arith.constant 0 : index
    %25 = vector.load %arg7[%c2_28, %c0_29, %c0_30] : memref<20x16x2xf32, #tpu.memory_space<vmem>>, vector<16x16x2xf32>
    %26 = arith.maximumf %24, %25 : vector<16x16x2xf32>
    %c3 = arith.constant 3 : index
    %c0_31 = arith.constant 0 : index
    %c0_32 = arith.constant 0 : index
    %27 = vector.load %arg7[%c3, %c0_31, %c0_32] : memref<20x16x2xf32, #tpu.memory_space<vmem>>, vector<16x16x2xf32>
    %28 = arith.maximumf %26, %27 : vector<16x16x2xf32>
    %c4 = arith.constant 4 : index
    %c0_33 = arith.constant 0 : index
    %c0_34 = arith.constant 0 : index
    %29 = vector.load %arg7[%c4, %c0_33, %c0_34] : memref<20x16x2xf32, #tpu.memory_space<vmem>>, vector<16x16x2xf32>
    %30 = arith.maximumf %28, %29 : vector<16x16x2xf32>
    %c2_i32 = arith.constant 2 : i32
    %31 = tpu.dynamic_rotate %30 by %c2_i32 dim 1 : vector<16x16x2xf32>, i32 -> vector<16x16x2xf32>
    %c2_i32_35 = arith.constant 2 : i32
    %32 = vector.broadcast %c2_i32_35 : i32 to vector<16x16x2xi32>
    %33 = arith.cmpi sge, %21, %32 : vector<16x16x2xi32>
    %cst_36 = arith.constant 0.000000e+00 : f32
    %34 = vector.broadcast %cst_36 : f32 to vector<16x16x2xf32>
    %35 = arith.select %33, %31, %34 : vector<16x16x2xi1>, vector<16x16x2xf32>
    %36 = arith.maximumf %30, %35 : vector<16x16x2xf32>
    %c1_i32 = arith.constant 1 : i32
    %37 = tpu.dynamic_rotate %30 by %c1_i32 dim 1 : vector<16x16x2xf32>, i32 -> vector<16x16x2xf32>
    %c1_i32_37 = arith.constant 1 : i32
    %38 = vector.broadcast %c1_i32_37 : i32 to vector<16x16x2xi32>
    %39 = arith.cmpi sge, %21, %38 : vector<16x16x2xi32>
    %cst_38 = arith.constant 0.000000e+00 : f32
    %40 = vector.broadcast %cst_38 : f32 to vector<16x16x2xf32>
    %41 = arith.select %39, %37, %40 : vector<16x16x2xi1>, vector<16x16x2xf32>
    %42 = arith.maximumf %36, %41 : vector<16x16x2xf32>
    %c15_i32 = arith.constant 15 : i32
    %43 = tpu.dynamic_rotate %30 by %c15_i32 dim 1 : vector<16x16x2xf32>, i32 -> vector<16x16x2xf32>
    %c15_i32_39 = arith.constant 15 : i32
    %44 = vector.broadcast %c15_i32_39 : i32 to vector<16x16x2xi32>
    %45 = arith.cmpi slt, %21, %44 : vector<16x16x2xi32>
    %cst_40 = arith.constant 0.000000e+00 : f32
    %46 = vector.broadcast %cst_40 : f32 to vector<16x16x2xf32>
    %47 = arith.select %45, %43, %46 : vector<16x16x2xi1>, vector<16x16x2xf32>
    %48 = arith.maximumf %42, %47 : vector<16x16x2xf32>
    %c14_i32 = arith.constant 14 : i32
    %49 = tpu.dynamic_rotate %30 by %c14_i32 dim 1 : vector<16x16x2xf32>, i32 -> vector<16x16x2xf32>
    %c14_i32_41 = arith.constant 14 : i32
    %50 = vector.broadcast %c14_i32_41 : i32 to vector<16x16x2xi32>
    %51 = arith.cmpi slt, %21, %50 : vector<16x16x2xi32>
    %cst_42 = arith.constant 0.000000e+00 : f32
    %52 = vector.broadcast %cst_42 : f32 to vector<16x16x2xf32>
    %53 = arith.select %51, %49, %52 : vector<16x16x2xi1>, vector<16x16x2xf32>
    %54 = arith.maximumf %48, %53 : vector<16x16x2xf32>
    %c0_43 = arith.constant 0 : index
    %c0_44 = arith.constant 0 : index
    %55 = vector.load %arg8[%c0_43, %c0_44] : memref<256x8xf32, #tpu.memory_space<vmem>>, vector<256x8xf32>
    %56 = vector.shape_cast %54 : vector<16x16x2xf32> to vector<256x2xf32>
    %57 = arith.truncf %56 : vector<256x2xf32> to vector<256x2xbf16>
    %c1_45 = arith.constant 1 : index
    %c0_46 = arith.constant 0 : index
    %c0_47 = arith.constant 0 : index
    %58 = vector.load %arg4[%c1_45, %c0_46, %c0_47] : memref<4x2x8xbf16, #tpu.memory_space<vmem>>, vector<1x2x8xbf16>
    %59 = vector.shape_cast %58 : vector<1x2x8xbf16> to vector<2x8xbf16>
    %cst_48 = arith.constant dense<0.000000e+00> : vector<256x8xf32>
    %60 = tpu.matmul %57, %59, %cst_48 {dimension_numbers = #tpu.dot_dimension_numbers<[1], [0], [0], [1], [0, 0, 1, 1], [], []>} : vector<256x2xbf16>, vector<2x8xbf16>, vector<256x8xf32> -> vector<256x8xf32>
    %61 = arith.addf %55, %60 : vector<256x8xf32>
    %c0_49 = arith.constant 0 : index
    %c0_50 = arith.constant 0 : index
    %62 = vector.load %arg8[%c0_49, %c0_50] : memref<256x8xf32, #tpu.memory_space<vmem>>, vector<256x8xf32>
    tpu.vector_store %arg8[%c0_49, %c0_50], %61 {strides = array<i32>} : memref<256x8xf32, #tpu.memory_space<vmem>>, vector<256x8xf32>,
    %c2_51 = arith.constant 2 : index
    %c0_52 = arith.constant 0 : index
    %c0_53 = arith.constant 0 : index
    %63 = vector.load %arg7[%c2_51, %c0_52, %c0_53] : memref<20x16x2xf32, #tpu.memory_space<vmem>>, vector<16x16x2xf32>
    tpu.vector_store %arg7[%c2_51, %c0_52, %c0_53], %54 {strides = array<i32>} : memref<20x16x2xf32, #tpu.memory_space<vmem>>, vector<16x16x2xf32>,
    %c0_54 = arith.constant 0 : index
    %c0_55 = arith.constant 0 : index
    %c0_56 = arith.constant 0 : index
    %64 = vector.load %arg7[%c0_54, %c0_55, %c0_56] : memref<20x16x2xf32, #tpu.memory_space<vmem>>, vector<16x16x2xf32>
    %c1_57 = arith.constant 1 : index
    %c0_58 = arith.constant 0 : index
    %c0_59 = arith.constant 0 : index
    %65 = vector.load %arg7[%c1_57, %c0_58, %c0_59] : memref<20x16x2xf32, #tpu.memory_space<vmem>>, vector<16x16x2xf32>
    %66 = arith.maximumf %64, %65 : vector<16x16x2xf32>
    %c2_60 = arith.constant 2 : index
    %c0_61 = arith.constant 0 : index
    %c0_62 = arith.constant 0 : index
    %67 = vector.load %arg7[%c2_60, %c0_61, %c0_62] : memref<20x16x2xf32, #tpu.memory_space<vmem>>, vector<16x16x2xf32>
    %68 = arith.maximumf %66, %67 : vector<16x16x2xf32>
    %c3_63 = arith.constant 3 : index
    %c0_64 = arith.constant 0 : index
    %c0_65 = arith.constant 0 : index
    %69 = vector.load %arg7[%c3_63, %c0_64, %c0_65] : memref<20x16x2xf32, #tpu.memory_space<vmem>>, vector<16x16x2xf32>
    %70 = arith.maximumf %68, %69 : vector<16x16x2xf32>
    %c4_66 = arith.constant 4 : index
    %c0_67 = arith.constant 0 : index
    %c0_68 = arith.constant 0 : index
    %71 = vector.load %arg7[%c4_66, %c0_67, %c0_68] : memref<20x16x2xf32, #tpu.memory_space<vmem>>, vector<16x16x2xf32>
    %72 = arith.maximumf %70, %71 : vector<16x16x2xf32>
    %c2_i32_69 = arith.constant 2 : i32
    %73 = tpu.dynamic_rotate %72 by %c2_i32_69 dim 1 : vector<16x16x2xf32>, i32 -> vector<16x16x2xf32>
    %c2_i32_70 = arith.constant 2 : i32
    %74 = vector.broadcast %c2_i32_70 : i32 to vector<16x16x2xi32>
    %75 = arith.cmpi sge, %21, %74 : vector<16x16x2xi32>
    %cst_71 = arith.constant 0.000000e+00 : f32
    %76 = vector.broadcast %cst_71 : f32 to vector<16x16x2xf32>
    %77 = arith.select %75, %73, %76 : vector<16x16x2xi1>, vector<16x16x2xf32>
    %78 = arith.maximumf %72, %77 : vector<16x16x2xf32>
    %c1_i32_72 = arith.constant 1 : i32
    %79 = tpu.dynamic_rotate %72 by %c1_i32_72 dim 1 : vector<16x16x2xf32>, i32 -> vector<16x16x2xf32>
    %c1_i32_73 = arith.constant 1 : i32
    %80 = vector.broadcast %c1_i32_73 : i32 to vector<16x16x2xi32>
    %81 = arith.cmpi sge, %21, %80 : vector<16x16x2xi32>
    %cst_74 = arith.constant 0.000000e+00 : f32
    %82 = vector.broadcast %cst_74 : f32 to vector<16x16x2xf32>
    %83 = arith.select %81, %79, %82 : vector<16x16x2xi1>, vector<16x16x2xf32>
    %84 = arith.maximumf %78, %83 : vector<16x16x2xf32>
    %c15_i32_75 = arith.constant 15 : i32
    %85 = tpu.dynamic_rotate %72 by %c15_i32_75 dim 1 : vector<16x16x2xf32>, i32 -> vector<16x16x2xf32>
    %c15_i32_76 = arith.constant 15 : i32
    %86 = vector.broadcast %c15_i32_76 : i32 to vector<16x16x2xi32>
    %87 = arith.cmpi slt, %21, %86 : vector<16x16x2xi32>
    %cst_77 = arith.constant 0.000000e+00 : f32
    %88 = vector.broadcast %cst_77 : f32 to vector<16x16x2xf32>
    %89 = arith.select %87, %85, %88 : vector<16x16x2xi1>, vector<16x16x2xf32>
    %90 = arith.maximumf %84, %89 : vector<16x16x2xf32>
    %c14_i32_78 = arith.constant 14 : i32
    %91 = tpu.dynamic_rotate %72 by %c14_i32_78 dim 1 : vector<16x16x2xf32>, i32 -> vector<16x16x2xf32>
    %c14_i32_79 = arith.constant 14 : i32
    %92 = vector.broadcast %c14_i32_79 : i32 to vector<16x16x2xi32>
    %93 = arith.cmpi slt, %21, %92 : vector<16x16x2xi32>
    %cst_80 = arith.constant 0.000000e+00 : f32
    %94 = vector.broadcast %cst_80 : f32 to vector<16x16x2xf32>
    %95 = arith.select %93, %91, %94 : vector<16x16x2xi1>, vector<16x16x2xf32>
    %96 = arith.maximumf %90, %95 : vector<16x16x2xf32>
    %c0_81 = arith.constant 0 : index
    %c0_82 = arith.constant 0 : index
    %97 = vector.load %arg8[%c0_81, %c0_82] : memref<256x8xf32, #tpu.memory_space<vmem>>, vector<256x8xf32>
    %98 = vector.shape_cast %96 : vector<16x16x2xf32> to vector<256x2xf32>
    %99 = arith.truncf %98 : vector<256x2xf32> to vector<256x2xbf16>
    %c2_83 = arith.constant 2 : index
    %c0_84 = arith.constant 0 : index
    %c0_85 = arith.constant 0 : index
    %100 = vector.load %arg4[%c2_83, %c0_84, %c0_85] : memref<4x2x8xbf16, #tpu.memory_space<vmem>>, vector<1x2x8xbf16>
    %101 = vector.shape_cast %100 : vector<1x2x8xbf16> to vector<2x8xbf16>
    %cst_86 = arith.constant dense<0.000000e+00> : vector<256x8xf32>
    %102 = tpu.matmul %99, %101, %cst_86 {dimension_numbers = #tpu.dot_dimension_numbers<[1], [0], [0], [1], [0, 0, 1, 1], [], []>} : vector<256x2xbf16>, vector<2x8xbf16>, vector<256x8xf32> -> vector<256x8xf32>
    %103 = arith.addf %97, %102 : vector<256x8xf32>
    %c0_87 = arith.constant 0 : index
    %c0_88 = arith.constant 0 : index
    %104 = vector.load %arg8[%c0_87, %c0_88] : memref<256x8xf32, #tpu.memory_space<vmem>>, vector<256x8xf32>
    tpu.vector_store %arg8[%c0_87, %c0_88], %103 {strides = array<i32>} : memref<256x8xf32, #tpu.memory_space<vmem>>, vector<256x8xf32>,
    %c2_89 = arith.constant 2 : index
    %c0_90 = arith.constant 0 : index
    %c0_91 = arith.constant 0 : index
    %105 = vector.load %arg7[%c2_89, %c0_90, %c0_91] : memref<20x16x2xf32, #tpu.memory_space<vmem>>, vector<16x16x2xf32>
    tpu.vector_store %arg7[%c2_89, %c0_90, %c0_91], %96 {strides = array<i32>} : memref<20x16x2xf32, #tpu.memory_space<vmem>>, vector<16x16x2xf32>,
    %c0_92 = arith.constant 0 : index
    %c0_93 = arith.constant 0 : index
    %c0_94 = arith.constant 0 : index
    %106 = vector.load %arg7[%c0_92, %c0_93, %c0_94] : memref<20x16x2xf32, #tpu.memory_space<vmem>>, vector<16x16x2xf32>
    %c1_95 = arith.constant 1 : index
    %c0_96 = arith.constant 0 : index
    %c0_97 = arith.constant 0 : index
    %107 = vector.load %arg7[%c1_95, %c0_96, %c0_97] : memref<20x16x2xf32, #tpu.memory_space<vmem>>, vector<16x16x2xf32>
    %108 = arith.maximumf %106, %107 : vector<16x16x2xf32>
    %c2_98 = arith.constant 2 : index
    %c0_99 = arith.constant 0 : index
    %c0_100 = arith.constant 0 : index
    %109 = vector.load %arg7[%c2_98, %c0_99, %c0_100] : memref<20x16x2xf32, #tpu.memory_space<vmem>>, vector<16x16x2xf32>
    %110 = arith.maximumf %108, %109 : vector<16x16x2xf32>
    %c3_101 = arith.constant 3 : index
    %c0_102 = arith.constant 0 : index
    %c0_103 = arith.constant 0 : index
    %111 = vector.load %arg7[%c3_101, %c0_102, %c0_103] : memref<20x16x2xf32, #tpu.memory_space<vmem>>, vector<16x16x2xf32>
    %112 = arith.maximumf %110, %111 : vector<16x16x2xf32>
    %c4_104 = arith.constant 4 : index
    %c0_105 = arith.constant 0 : index
    %c0_106 = arith.constant 0 : index
    %113 = vector.load %arg7[%c4_104, %c0_105, %c0_106] : memref<20x16x2xf32, #tpu.memory_space<vmem>>, vector<16x16x2xf32>
    %114 = arith.maximumf %112, %113 : vector<16x16x2xf32>
    %c2_i32_107 = arith.constant 2 : i32
    %115 = tpu.dynamic_rotate %114 by %c2_i32_107 dim 1 : vector<16x16x2xf32>, i32 -> vector<16x16x2xf32>
    %c2_i32_108 = arith.constant 2 : i32
    %116 = vector.broadcast %c2_i32_108 : i32 to vector<16x16x2xi32>
    %117 = arith.cmpi sge, %21, %116 : vector<16x16x2xi32>
    %cst_109 = arith.constant 0.000000e+00 : f32
    %118 = vector.broadcast %cst_109 : f32 to vector<16x16x2xf32>
    %119 = arith.select %117, %115, %118 : vector<16x16x2xi1>, vector<16x16x2xf32>
    %120 = arith.maximumf %114, %119 : vector<16x16x2xf32>
    %c1_i32_110 = arith.constant 1 : i32
    %121 = tpu.dynamic_rotate %114 by %c1_i32_110 dim 1 : vector<16x16x2xf32>, i32 -> vector<16x16x2xf32>
    %c1_i32_111 = arith.constant 1 : i32
    %122 = vector.broadcast %c1_i32_111 : i32 to vector<16x16x2xi32>
    %123 = arith.cmpi sge, %21, %122 : vector<16x16x2xi32>
    %cst_112 = arith.constant 0.000000e+00 : f32
    %124 = vector.broadcast %cst_112 : f32 to vector<16x16x2xf32>
    %125 = arith.select %123, %121, %124 : vector<16x16x2xi1>, vector<16x16x2xf32>
    %126 = arith.maximumf %120, %125 : vector<16x16x2xf32>
    %c15_i32_113 = arith.constant 15 : i32
    %127 = tpu.dynamic_rotate %114 by %c15_i32_113 dim 1 : vector<16x16x2xf32>, i32 -> vector<16x16x2xf32>
    %c15_i32_114 = arith.constant 15 : i32
    %128 = vector.broadcast %c15_i32_114 : i32 to vector<16x16x2xi32>
    %129 = arith.cmpi slt, %21, %128 : vector<16x16x2xi32>
    %cst_115 = arith.constant 0.000000e+00 : f32
    %130 = vector.broadcast %cst_115 : f32 to vector<16x16x2xf32>
    %131 = arith.select %129, %127, %130 : vector<16x16x2xi1>, vector<16x16x2xf32>
    %132 = arith.maximumf %126, %131 : vector<16x16x2xf32>
    %c14_i32_116 = arith.constant 14 : i32
    %133 = tpu.dynamic_rotate %114 by %c14_i32_116 dim 1 : vector<16x16x2xf32>, i32 -> vector<16x16x2xf32>
    %c14_i32_117 = arith.constant 14 : i32
    %134 = vector.broadcast %c14_i32_117 : i32 to vector<16x16x2xi32>
    %135 = arith.cmpi slt, %21, %134 : vector<16x16x2xi32>
    %cst_118 = arith.constant 0.000000e+00 : f32
    %136 = vector.broadcast %cst_118 : f32 to vector<16x16x2xf32>
    %137 = arith.select %135, %133, %136 : vector<16x16x2xi1>, vector<16x16x2xf32>
    %138 = arith.maximumf %132, %137 : vector<16x16x2xf32>
    %c0_119 = arith.constant 0 : index
    %c0_120 = arith.constant 0 : index
    %139 = vector.load %arg8[%c0_119, %c0_120] : memref<256x8xf32, #tpu.memory_space<vmem>>, vector<256x8xf32>
    %140 = vector.shape_cast %138 : vector<16x16x2xf32> to vector<256x2xf32>
    %141 = arith.truncf %140 : vector<256x2xf32> to vector<256x2xbf16>
    %c3_121 = arith.constant 3 : index
    %c0_122 = arith.constant 0 : index
    %c0_123 = arith.constant 0 : index
    %142 = vector.load %arg4[%c3_121, %c0_122, %c0_123] : memref<4x2x8xbf16, #tpu.memory_space<vmem>>, vector<1x2x8xbf16>
    %143 = vector.shape_cast %142 : vector<1x2x8xbf16> to vector<2x8xbf16>
    %cst_124 = arith.constant dense<0.000000e+00> : vector<256x8xf32>
    %144 = tpu.matmul %141, %143, %cst_124 {dimension_numbers = #tpu.dot_dimension_numbers<[1], [0], [0], [1], [0, 0, 1, 1], [], []>} : vector<256x2xbf16>, vector<2x8xbf16>, vector<256x8xf32> -> vector<256x8xf32>
    %145 = arith.addf %139, %144 : vector<256x8xf32>
    %c0_125 = arith.constant 0 : index
    %c0_126 = arith.constant 0 : index
    %146 = vector.load %arg8[%c0_125, %c0_126] : memref<256x8xf32, #tpu.memory_space<vmem>>, vector<256x8xf32>
    tpu.vector_store %arg8[%c0_125, %c0_126], %145 {strides = array<i32>} : memref<256x8xf32, #tpu.memory_space<vmem>>, vector<256x8xf32>,
    %c0_127 = arith.constant 0 : index
    %c0_128 = arith.constant 0 : index
    %147 = vector.load %arg8[%c0_127, %c0_128] : memref<256x8xf32, #tpu.memory_space<vmem>>, vector<256x8xf32>
    %c0_129 = arith.constant 0 : index
    %c0_130 = arith.constant 0 : index
    %148 = vector.load %arg5[%c0_129, %c0_130] : memref<1x8xf32, #tpu.memory_space<vmem>>, vector<1x8xf32>
    %149 = vector.broadcast %148 : vector<1x8xf32> to vector<256x8xf32>
    %150 = arith.addf %147, %149 : vector<256x8xf32>
    %cst_131 = arith.constant 0.000000e+00 : f32
    %151 = vector.broadcast %cst_131 : f32 to vector<256x8xf32>
    %152 = arith.maximumf %150, %151 : vector<256x8xf32>
    %153 = vector.shape_cast %152 : vector<256x8xf32> to vector<16x16x8xf32>
    %c0_132 = arith.constant 0 : index
    %c0_133 = arith.constant 0 : index
    %c0_134 = arith.constant 0 : index
    %c0_135 = arith.constant 0 : index
    %154 = vector.load %arg6[%c0_132, %c0_133, %c0_134, %c0_135] : memref<1x16x16x8xf32, #tpu.memory_space<vmem>>, vector<1x16x16x8xf32>
    %155 = vector.shape_cast %154 : vector<1x16x16x8xf32> to vector<16x16x8xf32>
    %156 = vector.shape_cast %153 : vector<16x16x8xf32> to vector<1x16x16x8xf32>
    tpu.vector_store %arg6[%c0_132, %c0_133, %c0_134, %c0_135], %156 {strides = array<i32>} : memref<1x16x16x8xf32, #tpu.memory_space<vmem>>, vector<1x16x16x8xf32>,
    return
  }
  func.func @transform_0(%arg0: i32) -> (i32, i32, i32, i32) {
    %c0_i32 = arith.constant 0 : i32
    %c0_i32_0 = arith.constant 0 : i32
    %c0_i32_1 = arith.constant 0 : i32
    %c0_i32_2 = arith.constant 0 : i32
    return %arg0, %c0_i32, %c0_i32_0, %c0_i32_1 : i32, i32, i32, i32
  }
  func.func @transform_1(%arg0: i32) -> (i32, i32) {
    %c0_i32 = arith.constant 0 : i32
    %c0_i32_0 = arith.constant 0 : i32
    %c0_i32_1 = arith.constant 0 : i32
    return %c0_i32, %c0_i32_0 : i32, i32
  }
  func.func @transform_2(%arg0: i32) -> (i32, i32) {
    %c0_i32 = arith.constant 0 : i32
    %c0_i32_0 = arith.constant 0 : i32
    %c0_i32_1 = arith.constant 0 : i32
    return %c0_i32, %c0_i32_0 : i32, i32
  }
  func.func @transform_3(%arg0: i32) -> (i32, i32, i32) {
    %c0_i32 = arith.constant 0 : i32
    %c0_i32_0 = arith.constant 0 : i32
    %c0_i32_1 = arith.constant 0 : i32
    %c0_i32_2 = arith.constant 0 : i32
    return %c0_i32, %c0_i32_0, %c0_i32_1 : i32, i32, i32
  }
  func.func @transform_4(%arg0: i32) -> (i32, i32) {
    %c0_i32 = arith.constant 0 : i32
    %c0_i32_0 = arith.constant 0 : i32
    %c0_i32_1 = arith.constant 0 : i32
    return %c0_i32, %c0_i32_0 : i32, i32
  }
  func.func @transform_5(%arg0: i32) -> (i32, i32, i32, i32) {
    %c0_i32 = arith.constant 0 : i32
    %c0_i32_0 = arith.constant 0 : i32
    %c0_i32_1 = arith.constant 0 : i32
    %c0_i32_2 = arith.constant 0 : i32
    return %arg0, %c0_i32, %c0_i32_0, %c0_i32_1 : i32, i32, i32, i32
  }
}

</mosaic_0001>

<bundles_post_ra>
// kernel: spp_forward.1
= control target key start
LH: loop header
LB: loop body
LE: loop exit
PB: predicated region body
PF: predicated region fallthrough
CT: control target
= control target key end

     0   :  { %s4989_s18 = smov 0   ;;  %s7776_s0 = inlined_call_operand.vmem [shape: bf16[2,16,16,4], index: 0, kind: input, shape index: {}]   ;;  %s7777_s1 = inlined_call_operand.vmem [shape: bf16[4,2], index: 1, kind: input, shape index: {}]   ;;  %s7778_s2 = inlined_call_operand.vmem [shape: f32[1,2], index: 2, kind: input, shape index: {}]   ;;  %s7779_s3 = inlined_call_operand.vmem [shape: bf16[4,2,8], index: 3, kind: input, shape index: {}]   ;;  %s7780_s4 = inlined_call_operand.vmem [shape: f32[1,8], index: 4, kind: input, shape index: {}]   ;;  %s7781_s5 = inlined_call_operand.vmem [shape: f32[2,16,16,8], index: 5, kind: output, shape index: {}]  }
   0x1 LB: > { %s4548_s19 = sadd.s32 4294967295, %s4956_s18   ;;  %p4552_p0 = scmp.ge.s32.totalorder %s4956_s18, 1  ;;  %s4956_s18 = sphi %s4989_s18, %s15_s18  }
   0x2   : > { %p187_p1 = scmp.lt.s32.totalorder %s4956_s18, 3 }
   0x4   : > { %p188_p2 = pnand %p4552_p0, %p187_p1 }
   0x6   : > { %191 = sbr.rel (%p188_p2) target bundleno = 938 (0x3aa), region = 40 }
   0xd   : > { %v268_v0 = vld [vmem:[%s7777_s1] sm:$0x3]  ;;  %vm405_vm0 = vcmask 1041408   ;;  %p215_p3 = scmp.lt.s32.totalorder %s4548_s19, 1  ;;  %vm667_vm1 = vcmask 1040384   ;;  %vm356_vm2 = vcmask 31744   ;;  %v898_v34 = vlaneseq }
   0xe   : > { %4919 = vmatprep.subr.msk.bf16.mxu0 %vm405_vm0, %v268_v0  ;;  %4920 = vmatprep.subr.msk.bf16.mxu1 %vm405_vm0, %v268_v0  ;;  %v407_v1 = vsel %vm405_vm0, %v268_v0, 0  ;;  %v618_v2 = vld [vmem:[%s7779_s3] sm:$0x1]  ;;  %vm226_vm3 = vcmask 15360   ;;  %v4958_v19 = vmov 0.0   ;;  %vm832_vm12 = vcmask 64512  }
   0xf   : > { %4748 = vmatpush3.bf16.msra.mxu0 %v407_v1  ;;  %4918 = vmatpush3.bf16.msra.mxu1 %v407_v1  ;;  %s7869_s19 = smov (!%p215_p3, %s4548_s19), 1  ;;  %229 = vst.msk [vmem:[#allocation2 + $0x10] sm:$0xff] %vm226_vm3, %v4958_v19  ;;  %227 = vst.msk [vmem:[#allocation2] sm:$0xff] %vm226_vm3, %v4958_v19  ;;  %v669_v20 = vsel %vm667_vm1, %v618_v2, 0  ;;  %v4606_v21 = vld [vmem:[%s7779_s3 + $0x1] sm:$0x1] }
  0x10   : > { %4921 = vmatprep.subr.msk.bf16.mxu1 %vm667_vm1, %v618_v2  ;;  %s4660_s24 = sshll.u32 %s7869_s19, 7  ;;  %228 = vst.msk [vmem:[#allocation2 + $0x8] sm:$0xff] %vm226_vm3, %v4958_v19  ;;  %230 = vst.msk [vmem:[#allocation2 + $0x18] sm:$0xff] %vm226_vm3, %v4958_v19  ;;  %4922 = vmatprep.subr.msk.bf16.mxu0 %vm667_vm1, %v4606_v21  ;;  %v1815_v22 = vsel %vm667_vm1, %v4606_v21, 0  ;;  %v4623_v23 = vld [vmem:[%s7779_s3 + $0x2] sm:$0x1] }
  0x11   : > { %s5010_s27 = scalar_lea.vmem %s7776_s0, %s4660_s24  ;;  %232 = vst.msk [vmem:[#allocation2 + $0x120] sm:$0xff] %vm226_vm3, %v4958_v19  ;;  %233 = vst.msk [vmem:[#allocation2 + $0x128] sm:$0xff] %vm226_vm3, %v4958_v19  ;;  %v4640_v24 = vld [vmem:[%s7779_s3 + $0x3] sm:$0x1]  ;;  %v5069_v25 = vld [vmem:[%s7778_s2] ss:$0 sm:$0xff] }
  0x12   : > { %v4934_v3 = vld [vmem:[%s5010_s27] sm:$0xff]   ;;  %v4936_v5 = vld [vmem:[%s5010_s27 + $0x8] sm:$0xff]   ;;  %v4938_v7 = vld [vmem:[%s5010_s27 + $0x10] sm:$0xff]   ;;  %234 = vst.msk [vmem:[#allocation2 + $0x130] sm:$0xff] %vm226_vm3, %v4958_v19  ;;  %v5088_v53 = vshrl.u32 %v898_v34, 7  ;;  %v2973_v2 = vsel %vm667_vm1, %v4623_v23, 0 }
  0x13   : > { %v4935_v4 = vld [vmem:[%s5010_s27 + $0x40] sm:$0xff]   ;;  %4749 = vmatprep.mubr.msk.bf16.mxu0 %vm356_vm2, %v4934_v3  ;;  %v4937_v6 = vld [vmem:[%s5010_s27 + $0x48] sm:$0xff]   ;;  %v4939_v8 = vld [vmem:[%s5010_s27 + $0x50] sm:$0xff]   ;;  %235 = vst.msk [vmem:[#allocation2 + $0x138] sm:$0xff] %vm226_vm3, %v4958_v19  ;;  %s4661_s13 = sshll.u32 %s7869_s19, 8 }
  0x14   : > { %4765 = vmatprep.mubr.msk.bf16.mxu1 %vm356_vm2, %v4935_v4  ;;  %4750 = vmatmul.mubr.msk.bf16.vlgmr.msra.gmra.mrb[0].mxu0 %vm356_vm2, %v4936_v5  ;;  %v4940_v9 = vld [vmem:[%s5010_s27 + $0x18] sm:$0xff]   ;;  %v4942_v11 = vld [vmem:[%s5010_s27 + $0x20] sm:$0xff]   ;;  %v4944_v13 = vld [vmem:[%s5010_s27 + $0x28] sm:$0xff]   ;;  %vm1224_vm4 = vcmp.lt.s32.totalorder %v5088_v53, 2  ;;  %vm1257_vm5 = vcmp.ge.s32.totalorder %v5088_v53, 2  ;;  %vm1355_vm6 = vcmp.lt.s32.totalorder %v5088_v53, 1  ;;  %s7633_s16 = scalar_lea.vmem %s7781_s5, %s4661_s13 }
  0x15   : > { %4766 = vmatmul.mubr.msk.bf16.vlgmr.msra.gmra.mrb[0].mxu1 %vm356_vm2, %v4937_v6  ;;  %4753 = vmatprep.mubr.msk.bf16.mxu0 %vm356_vm2, %v4938_v7  ;;  %v4941_v10 = vld [vmem:[%s5010_s27 + $0x58] sm:$0xff]   ;;  %v4943_v12 = vld [vmem:[%s5010_s27 + $0x60] sm:$0xff]   ;;  %v4945_v14 = vld [vmem:[%s5010_s27 + $0x68] sm:$0xff]   ;;  %vm1388_vm7 = vcmp.ge.s32.totalorder %v5088_v53, 1  ;;  %vm1486_vm8 = vcmp.lt.s32.totalorder %v5088_v53, 7  ;;  %vm1617_vm10 = vcmp.lt.s32.totalorder %v5088_v53, 6 }
  0x16   : > { %4769 = vmatprep.mubr.msk.bf16.mxu1 %vm356_vm2, %v4939_v8  ;;  %v4946_v15 = vld [vmem:[%s5010_s27 + $0x30] sm:$0xff]   ;;  %v4948_v17 = vld [vmem:[%s5010_s27 + $0x38] sm:$0xff]   ;;  %4782 = vmatpush3.bf16.msra.mxu1 %v669_v20  ;;  %v5082_v49 = vld [vmem:[#allocation2] sm:$0xff]  ;;  %v5113_v8 = vadd.s32 8, %v5088_v53 }
  0x17   : > { %v4947_v16 = vld [vmem:[%s5010_s27 + $0x70] sm:$0xff]   ;;  %v4949_v18 = vld [vmem:[%s5010_s27 + $0x78] sm:$0xff]   ;;  %4816 = vmatpush3.bf16.msra.mxu0 %v1815_v22  ;;  %4923 = vmatprep.subr.msk.bf16.mxu1 %vm667_vm1, %v4623_v23  ;;  %v5090_v54 = vld [vmem:[#allocation2 + $0x8] sm:$0xff] }
  0x18   : > { %4924 = vmatprep.subr.msk.bf16.mxu0 %vm667_vm1, %v4640_v24  ;;  %v5079_v45 = vld [vmem:[#allocation2 + $0x10] sm:$0xff]  ;;  %v5085_v51 = vld [vmem:[#allocation2 + $0x18] sm:$0xff]  ;;  %vm1520_vm9 = vcmp.lt.s32.totalorder %v5113_v8, 15  ;;  %vm1651_vm11 = vcmp.lt.s32.totalorder %v5113_v8, 14 }
  0x19   : > { %v966_v60 = vmax.f32 %v5082_v49, %v5079_v45  ;;  %v5100_v61 = vld [vmem:[#allocation2 + $0x18] sm:$0xff]  ;;  %v967_v3 = vmax.f32 %v5090_v54, %v5085_v51 }
  0x1c   : > { %4754 = vmatmul.mubr.msk.bf16.gmra.mrb[4].mxu0 %vm356_vm2, %v4940_v9  ;;  %v5116_v9 = vsel %vm667_vm1, %v4640_v24, 0 }
  0x1d   : > { %4770 = vmatmul.mubr.msk.bf16.gmra.mrb[4].mxu1 %vm356_vm2, %v4941_v10  ;;  %4757 = vmatprep.mubr.msk.bf16.mxu0 %vm356_vm2, %v4942_v11  ;;  %v5118_v10 = vld [vmem:[#allocation2 + $0x10] sm:$0xff] }
  0x1e   : > { %4773 = vmatprep.mubr.msk.bf16.mxu1 %vm356_vm2, %v4943_v12 }
  0x24   : > { %4758 = vmatmul.mubr.msk.bf16.gmra.mrb[8].mxu0 %vm356_vm2, %v4944_v13 }
  0x25   : > { %4774 = vmatmul.mubr.msk.bf16.gmra.mrb[8].mxu1 %vm356_vm2, %v4945_v14  ;;  %4761 = vmatprep.mubr.msk.bf16.mxu0 %vm356_vm2, %v4946_v15 }
  0x26   : > { %4777 = vmatprep.mubr.msk.bf16.mxu1 %vm356_vm2, %v4947_v16  ;;  %v2139_v16 = vmax.f32 %v5090_v54, %v5100_v61 }
  0x2c   : > { %4762 = vmatmul.mubr.msk.bf16.gmra.mrb[12].mxu0 %vm356_vm2, %v4948_v17 }
  0x2d   : > { %4778 = vmatmul.mubr.msk.bf16.gmra.mrb[12].mxu1 %vm356_vm2, %v4949_v18 }
  0xe7   : > { %v4751_v26 = vpop.f32.mrb[0].mxu0 }
  0xe8   : > { %v452_v27 = vadd.f32 %v4751_v26, %v5069_v25  ;;  %v443_v28 = vpop.f32.mrb[1].mxu0  ;;  %v4767_v29 = vpop.f32.mrb[0].mxu1 }
  0xe9   : > { %v444_v30 = vadd.f32 %v5069_v25, %v443_v28  ;;  %v4752_v31 = vpop.f32.mrb[2].mxu0  ;;  %v516_v32 = vadd.f32 %v4767_v29, %v5069_v25  ;;  %v507_v33 = vpop.f32.mrb[1].mxu1  ;;  %v2138_v29 = vmax.f32 %v5082_v49, %v5118_v10 }
  0xea   : > { %v572_v35 = vmax.f32 %v452_v27, 0.0  ;;  %v455_v36 = vadd.f32 %v4752_v31, %v5069_v25  ;;  %v446_v37 = vpop.f32.mrb[3].mxu0  ;;  %v508_v38 = vadd.f32 %v5069_v25, %v507_v33  ;;  %v4768_v39 = vpop.f32.mrb[2].mxu1 }
  0xeb   : > { %v570_v40 = vmax.f32 %v444_v30, 0.0  ;;  %v447_v41 = vadd.f32 %v5069_v25, %v446_v37  ;;  %v588_v42 = vmax.f32 %v516_v32, 0.0  ;;  %v519_v43 = vadd.f32 %v4768_v39, %v5069_v25  ;;  %v510_v44 = vpop.f32.mrb[3].mxu1 }
  0xec   : > { %868 = vst.msk [vmem:[#allocation2 + $0x30] sm:$0xff] %vm226_vm3, %v572_v35  ;;  %v573_v46 = vmax.f32 %v455_v36, 0.0  ;;  %v586_v47 = vmax.f32 %v508_v38, 0.0  ;;  %v511_v48 = vadd.f32 %v5069_v25, %v510_v44 }
  0xed   : > { %866 = vst.msk [vmem:[#allocation2 + $0x20] sm:$0xff] %vm226_vm3, %v570_v40  ;;  %v571_v50 = vmax.f32 %v447_v41, 0.0  ;;  %884 = vst.msk [vmem:[#allocation2 + $0xb0] sm:$0xff] %vm226_vm3, %v588_v42  ;;  %v589_v52 = vmax.f32 %v519_v43, 0.0 }
  0xee   : > { %v603_v55 = vpack.c.bf16 %v573_v46, %v572_v35  ;;  %869 = vst.msk [vmem:[#allocation2 + $0x38] sm:$0xff] %vm226_vm3, %v573_v46  ;;  %882 = vst.msk [vmem:[#allocation2 + $0xa0] sm:$0xff] %vm226_vm3, %v586_v47  ;;  %v587_v56 = vmax.f32 %v511_v48, 0.0 }
  0xef   : > { %v602_v57 = vpack.c.bf16 %v571_v50, %v570_v40  ;;  %867 = vst.msk [vmem:[#allocation2 + $0x28] sm:$0xff] %vm226_vm3, %v571_v50  ;;  %v4755_v58 = vpop.f32.mrb[4].mxu0  ;;  %v5095_v59 = vpack.c.bf16 %v589_v52, %v588_v42  ;;  %885 = vst.msk [vmem:[#allocation2 + $0xb8] sm:$0xff] %vm226_vm3, %v589_v52 }
  0xf0   : > { %v468_v62 = vadd.f32 %v4755_v58, %v5069_v25  ;;  %v459_v63 = vpop.f32.mrb[5].mxu0  ;;  %v5103_v0 = vpack.c.bf16 %v587_v56, %v586_v47  ;;  %883 = vst.msk [vmem:[#allocation2 + $0xa8] sm:$0xff] %vm226_vm3, %v587_v56  ;;  %v4771_v1 = vpop.f32.mrb[4].mxu1 }
  0xf1   : > { %v460_v4 = vadd.f32 %v5069_v25, %v459_v63  ;;  %v4756_v5 = vpop.f32.mrb[6].mxu0  ;;  %4783 = vmatprep.mubr.msk.bf16.mxu1 %vm226_vm3, %v602_v57  ;;  %v532_v6 = vadd.f32 %v4771_v1, %v5069_v25  ;;  %v523_v7 = vpop.f32.mrb[5].mxu1 }
  0xf2   : > { %v576_v11 = vmax.f32 %v468_v62, 0.0  ;;  %v471_v12 = vadd.f32 %v4756_v5, %v5069_v25  ;;  %v462_v13 = vpop.f32.mrb[7].mxu0  ;;  %4784 = vmatmul.mubr.msk.bf16.vlgmr.msra.gmra.mrb[16].mxu1 %vm226_vm3, %v603_v55  ;;  %v524_v14 = vadd.f32 %v5069_v25, %v523_v7  ;;  %v4772_v15 = vpop.f32.mrb[6].mxu1 }
  0xf3   : > { %v5125_v17 = vld [vmem:[#allocation2 + $0x30] sm:$0xff]  ;;  %v574_v18 = vmax.f32 %v460_v4, 0.0  ;;  %v463_v19 = vadd.f32 %v5069_v25, %v462_v13  ;;  %v592_v20 = vmax.f32 %v532_v6, 0.0  ;;  %v535_v21 = vadd.f32 %v4772_v15, %v5069_v25  ;;  %v526_v22 = vpop.f32.mrb[7].mxu1  ;;  %4850 = vmatpush3.bf16.msra.mxu1 %v2973_v2 }
  0xf4   : > { %v5129_v23 = vld [vmem:[#allocation2 + $0x20] sm:$0xff]  ;;  %872 = vst.msk [vmem:[#allocation2 + $0x50] sm:$0xff] %vm226_vm3, %v576_v11  ;;  %v577_v24 = vmax.f32 %v471_v12, 0.0  ;;  %v590_v26 = vmax.f32 %v524_v14, 0.0  ;;  %v527_v27 = vadd.f32 %v5069_v25, %v526_v22  ;;  %v5133_v28 = vld [vmem:[#allocation2 + $0xb0] sm:$0xff] }
  0xf5   : > { %v968_v30 = vmax.f32 %v5079_v45, %v5129_v23  ;;  %870 = vst.msk [vmem:[#allocation2 + $0x40] sm:$0xff] %vm226_vm3, %v574_v18  ;;  %v575_v31 = vmax.f32 %v463_v19, 0.0  ;;  %888 = vst.msk [vmem:[#allocation2 + $0xd0] sm:$0xff] %vm226_vm3, %v592_v20  ;;  %v593_v32 = vmax.f32 %v535_v21, 0.0  ;;  %v1030_v33 = vmax.f32 %v966_v60, %v5129_v23  ;;  %v5142_v34 = vld [vmem:[#allocation2 + $0xa0] sm:$0xff]  ;;  %v5144_v35 = vld [vmem:[#allocation2 + $0x38] sm:$0xff] }
  0xf6   : > { %v5146_v36 = vld [vmem:[#allocation2 + $0x28] sm:$0xff]  ;;  %v605_v37 = vpack.c.bf16 %v577_v24, %v576_v11  ;;  %873 = vst.msk [vmem:[#allocation2 + $0x58] sm:$0xff] %vm226_vm3, %v577_v24  ;;  %886 = vst.msk [vmem:[#allocation2 + $0xc0] sm:$0xff] %vm226_vm3, %v590_v26  ;;  %v591_v38 = vmax.f32 %v527_v27, 0.0  ;;  %v970_v39 = vmax.f32 %v5129_v23, %v5125_v17  ;;  %v986_v40 = vmax.f32 %v5142_v34, %v5133_v28  ;;  %v5180_v1 = vld [vmem:[#allocation2 + $0xb8] sm:$0xff] }
  0xf7   : > { %v969_v41 = vmax.f32 %v5085_v51, %v5146_v36  ;;  %v5157_v42 = vmax.f32 %v968_v30, %v5125_v17  ;;  %v604_v43 = vpack.c.bf16 %v575_v31, %v574_v18  ;;  %871 = vst.msk [vmem:[#allocation2 + $0x48] sm:$0xff] %vm226_vm3, %v575_v31  ;;  %v4759_v44 = vpop.f32.mrb[8].mxu0  ;;  %v5160_v45 = vpack.c.bf16 %v593_v32, %v592_v20  ;;  %v5178_v63 = vld [vmem:[#allocation2 + $0xa8] sm:$0xff] }
  0xf8   : > { %889 = vst.msk [vmem:[#allocation2 + $0xd8] sm:$0xff] %vm226_vm3, %v593_v32  ;;  %v484_v46 = vadd.f32 %v4759_v44, %v5069_v25  ;;  %v475_v47 = vpop.f32.mrb[9].mxu0  ;;  %v5164_v48 = vpack.c.bf16 %v591_v38, %v590_v26  ;;  %887 = vst.msk [vmem:[#allocation2 + $0xc8] sm:$0xff] %vm226_vm3, %v591_v38  ;;  %v4775_v50 = vpop.f32.mrb[8].mxu1  ;;  %v1031_v51 = vmax.f32 %v967_v3, %v5146_v36 }
  0xf9   : > { %v1095_v52 = vmax.f32 %v1030_v33, %v5125_v17  ;;  %v5170_v55 = vmax.f32 %v969_v41, %v5144_v35  ;;  %v476_v56 = vadd.f32 %v5069_v25, %v475_v47  ;;  %v4760_v57 = vpop.f32.mrb[10].mxu0  ;;  %4787 = vmatprep.mubr.msk.bf16.mxu1 %vm226_vm3, %v604_v43  ;;  %v548_v58 = vadd.f32 %v4775_v50, %v5069_v25  ;;  %v539_v60 = vpop.f32.mrb[9].mxu1 }
  0xfa   : > { %v971_v62 = vmax.f32 %v5146_v36, %v5144_v35  ;;  %v580_v2 = vmax.f32 %v484_v46, 0.0  ;;  %v487_v3 = vadd.f32 %v4760_v57, %v5069_v25  ;;  %v478_v4 = vpop.f32.mrb[11].mxu0  ;;  %4788 = vmatmul.mubr.msk.bf16.gmra.mrb[20].mxu1 %vm226_vm3, %v605_v37  ;;  %v540_v5 = vadd.f32 %v5069_v25, %v539_v60  ;;  %v4776_v6 = vpop.f32.mrb[10].mxu1 }
  0xfb   : > { %v1096_v7 = vmax.f32 %v1031_v51, %v5144_v35  ;;  %v578_v11 = vmax.f32 %v476_v56, 0.0  ;;  %v479_v12 = vadd.f32 %v5069_v25, %v478_v4  ;;  %v596_v13 = vmax.f32 %v548_v58, 0.0  ;;  %v542_v15 = vpop.f32.mrb[11].mxu1 }
  0xfc   : > { %v551_v14 = vadd.f32 %v4776_v6, %v5069_v25  ;;  %v5190_v18 = vld [vmem:[#allocation2 + $0x40] sm:$0xff]  ;;  %876 = vst.msk [vmem:[#allocation2 + $0x70] sm:$0xff] %vm226_vm3, %v580_v2  ;;  %v581_v19 = vmax.f32 %v487_v3, 0.0  ;;  %v594_v20 = vmax.f32 %v540_v5, 0.0  ;;  %v543_v21 = vadd.f32 %v5069_v25, %v542_v15 }
  0xfd   : > { %v987_v22 = vmax.f32 %v5178_v63, %v5180_v1  ;;  %v1097_v23 = vmax.f32 %v5157_v42, %v5190_v18  ;;  %874 = vst.msk [vmem:[#allocation2 + $0x60] sm:$0xff] %vm226_vm3, %v578_v11  ;;  %v579_v24 = vmax.f32 %v479_v12, 0.0  ;;  %892 = vst.msk [vmem:[#allocation2 + $0xf0] sm:$0xff] %vm226_vm3, %v596_v13  ;;  %v5201_v27 = vmax.f32 %v1095_v52, %v5190_v18 }
  0xfe   : > { %v597_v26 = vmax.f32 %v551_v14, 0.0  ;;  %v5204_v30 = vld [vmem:[#allocation2 + $0x48] sm:$0xff]  ;;  %v607_v31 = vpack.c.bf16 %v581_v19, %v580_v2  ;;  %877 = vst.msk [vmem:[#allocation2 + $0x78] sm:$0xff] %vm226_vm3, %v581_v19  ;;  %890 = vst.msk [vmem:[#allocation2 + $0xe0] sm:$0xff] %vm226_vm3, %v594_v20  ;;  %v595_v32 = vmax.f32 %v543_v21, 0.0  ;;  %v5209_v33 = vmax.f32 %v970_v39, %v5190_v18 }
  0xff   : > { %v972_v37 = vmax.f32 %v5125_v17, %v5190_v18  ;;  %v1098_v38 = vmax.f32 %v5170_v55, %v5204_v30  ;;  %v606_v41 = vpack.c.bf16 %v579_v24, %v578_v11  ;;  %875 = vst.msk [vmem:[#allocation2 + $0x68] sm:$0xff] %vm226_vm3, %v579_v24  ;;  %v4763_v44 = vpop.f32.mrb[12].mxu0  ;;  %v5220_v46 = vmax.f32 %v1096_v7, %v5204_v30 }
 0x100   : > { %v5216_v43 = vpack.c.bf16 %v597_v26, %v596_v13  ;;  %893 = vst.msk [vmem:[#allocation2 + $0xf8] sm:$0xff] %vm226_vm3, %v597_v26  ;;  %v5223_v39 = vpack.c.bf16 %v595_v32, %v594_v20  ;;  %891 = vst.msk [vmem:[#allocation2 + $0xe8] sm:$0xff] %vm226_vm3, %v595_v32  ;;  %v500_v47 = vadd.f32 %v4763_v44, %v5069_v25  ;;  %v4779_v50 = vpop.f32.mrb[12].mxu1  ;;  %v491_v51 = vpop.f32.mrb[13].mxu0  ;;  %v1192_v52 = vrot.slane %v5201_v27, 6 }
 0x101   : > { %v1323_v56 = vrot.slane %v5201_v27, 7  ;;  %v564_v57 = vadd.f32 %v4779_v50, %v5069_v25  ;;  %v492_v58 = vadd.f32 %v5069_v25, %v491_v51  ;;  %v555_v60 = vpop.f32.mrb[13].mxu1  ;;  %v4764_v2 = vpop.f32.mrb[14].mxu0  ;;  %4791 = vmatprep.mubr.msk.bf16.mxu1 %vm226_vm3, %v606_v41  ;;  %v1208_v3 = vrot.slane %v5220_v46, 6 }
 0x102   : > { %v1339_v4 = vrot.slane %v5220_v46, 7  ;;  %v584_v5 = vmax.f32 %v500_v47, 0.0  ;;  %v556_v6 = vadd.f32 %v5069_v25, %v555_v60  ;;  %v503_v7 = vadd.f32 %v4764_v2, %v5069_v25  ;;  %v4780_v11 = vpop.f32.mrb[14].mxu1  ;;  %v494_v12 = vpop.f32.mrb[15].mxu0  ;;  %4792 = vmatmul.mubr.msk.bf16.gmra.mrb[24].mxu1 %vm226_vm3, %v607_v31 }
 0x103   : > { %v1454_v13 = vrot.slane %v5201_v27, 1  ;;  %v600_v14 = vmax.f32 %v564_v57, 0.0  ;;  %v582_v15 = vmax.f32 %v492_v58, 0.0  ;;  %v567_v19 = vadd.f32 %v4780_v11, %v5069_v25  ;;  %v558_v21 = vpop.f32.mrb[15].mxu1 }
 0x104   : > { %v495_v20 = vadd.f32 %v5069_v25, %v494_v12  ;;  %880 = vst.msk [vmem:[#allocation2 + $0x90] sm:$0xff] %vm226_vm3, %v584_v5  ;;  %v598_v24 = vmax.f32 %v556_v6, 0.0  ;;  %v585_v26 = vmax.f32 %v503_v7, 0.0  ;;  %v559_v32 = vadd.f32 %v5069_v25, %v558_v21 }
 0x105   : > { %v1225_v41 = vsel %vm1224_vm4, %v1192_v52, %v1208_v3  ;;  %896 = vst.msk [vmem:[#allocation2 + $0x110] sm:$0xff] %vm226_vm3, %v600_v14  ;;  %878 = vst.msk [vmem:[#allocation2 + $0x80] sm:$0xff] %vm226_vm3, %v582_v15  ;;  %v601_v31 = vmax.f32 %v567_v19, 0.0  ;;  %v1241_v47 = vsel %vm1224_vm4, %v1208_v3, %v1192_v52  ;;  %v1356_v58 = vsel %vm1355_vm6, %v1323_v56, %v1339_v4 }
 0x106   : > { %v583_v44 = vmax.f32 %v495_v20, 0.0  ;;  %v1292_v50 = vmax.f32 %v5220_v46, %v1225_v41  ;;  %894 = vst.msk [vmem:[#allocation2 + $0x100] sm:$0xff] %vm226_vm3, %v598_v24  ;;  %v609_v51 = vpack.c.bf16 %v585_v26, %v584_v5  ;;  %881 = vst.msk [vmem:[#allocation2 + $0x98] sm:$0xff] %vm226_vm3, %v585_v26  ;;  %v599_v25 = vmax.f32 %v559_v32, 0.0  ;;  %v5265_v5 = vld [vmem:[#allocation2 + $0x50] sm:$0xff] }
 0x107   : > { %v1259_v57 = vsel %vm1257_vm5, %v1241_v47, 0.0  ;;  %v5258_v60 = vpack.c.bf16 %v601_v31, %v600_v14  ;;  %897 = vst.msk [vmem:[#allocation2 + $0x118] sm:$0xff] %vm226_vm3, %v601_v31  ;;  %v1372_v3 = vsel %vm1355_vm6, %v1339_v4, %v1323_v56  ;;  %v1470_v12 = vrot.slane %v5220_v46, 1  ;;  %v5273_v14 = vld [vmem:[#allocation2 + $0x58] sm:$0xff] }
 0x108   : > { %v608_v2 = vpack.c.bf16 %v583_v44, %v582_v15  ;;  %879 = vst.msk [vmem:[#allocation2 + $0x88] sm:$0xff] %vm226_vm3, %v583_v44  ;;  %v1291_v52 = vmax.f32 %v5201_v27, %v1259_v57  ;;  %v5267_v6 = vpack.c.bf16 %v599_v25, %v598_v24  ;;  %895 = vst.msk [vmem:[#allocation2 + $0x108] sm:$0xff] %vm226_vm3, %v599_v25  ;;  %v1390_v7 = vsel %vm1388_vm7, %v1372_v3, 0.0 }
 0x109   : > { %v1423_v11 = vmax.f32 %v1292_v50, %v1356_v58  ;;  %v1585_v19 = vrot.slane %v5201_v27, 2  ;;  %v1601_v56 = vrot.slane %v5220_v46, 2  ;;  %v1162_v4 = vmax.f32 %v1097_v23, %v5265_v5 }
 0x10a   : > { %4795 = vmatprep.mubr.msk.bf16.mxu1 %vm226_vm3, %v608_v2  ;;  %v1422_v15 = vmax.f32 %v1291_v52, %v1390_v7  ;;  %v1487_v20 = vsel %vm1486_vm8, %v1454_v13, %v1470_v12  ;;  %v1503_v21 = vsel %vm1486_vm8, %v1470_v12, %v1454_v13  ;;  %v1163_v27 = vmax.f32 %v1098_v38, %v5273_v14 }
 0x10b   : > { %4796 = vmatmul.mubr.msk.bf16.gmra.mrb[28].mxu1 %vm226_vm3, %v609_v51  ;;  %v1035_v46 = vmax.f32 %v971_v62, %v5204_v30  ;;  %v1522_v42 = vsel %vm1520_vm9, %v1503_v21, 0.0  ;;  %v1618_v13 = vsel %vm1617_vm10, %v1585_v19, %v1601_v56  ;;  %v1634_v24 = vsel %vm1617_vm10, %v1601_v56, %v1585_v19  ;;  %v5323_v56 = vld [vmem:[#allocation2 + $0x60] sm:$0xff] }
 0x10c   : > { %4799 = vmatprep.mubr.msk.bf16.mxu1 %vm226_vm3, %v5103_v0  ;;  %v1553_v23 = vmax.f32 %v1422_v15, %v1487_v20  ;;  %v1554_v55 = vmax.f32 %v1423_v11, %v1522_v42  ;;  %v1653_v38 = vsel %vm1651_vm11, %v1634_v24, 0.0  ;;  %v1193_v26 = vrot.slane %v1162_v4, 6  ;;  %v5325_v20 = vld [vmem:[#allocation2 + $0x68] sm:$0xff] }
 0x10d   : > { %v1209_v36 = vrot.slane %v1163_v27, 6  ;;  %v1324_v32 = vrot.slane %v1162_v4, 7  ;;  %v1340_v41 = vrot.slane %v1163_v27, 7  ;;  %v1455_v0 = vrot.slane %v1162_v4, 1 }
 0x10e   : > { %v1684_v62 = vmax.f32 %v1553_v23, %v1618_v13  ;;  %v1685_v31 = vmax.f32 %v1554_v55, %v1653_v38  ;;  %v1471_v50 = vrot.slane %v1163_v27, 1  ;;  %v1586_v15 = vrot.slane %v1162_v4, 2 }
 0x10f   : > { %v1226_v44 = vsel %vm1224_vm4, %v1193_v26, %v1209_v36  ;;  %v1242_v47 = vsel %vm1224_vm4, %v1209_v36, %v1193_v26  ;;  %v1357_v57 = vsel %vm1355_vm6, %v1324_v32, %v1340_v41  ;;  %v1373_v58 = vsel %vm1355_vm6, %v1340_v41, %v1324_v32 }
 0x110   : > { %2042 = vst.msk [vmem:[#allocation2 + $0x20] sm:$0xff] %vm226_vm3, %v1684_v62  ;;  %v1261_v51 = vsel %vm1257_vm5, %v1242_v47, 0.0  ;;  %v1294_v25 = vmax.f32 %v1163_v27, %v1226_v44  ;;  %v1748_v2 = vpack.c.bf16 %v1685_v31, %v1684_v62  ;;  %2043 = vst.msk [vmem:[#allocation2 + $0x28] sm:$0xff] %vm226_vm3, %v1685_v31  ;;  %v1392_v3 = vsel %vm1388_vm7, %v1373_v58, 0.0 }
 0x111   : > { %v1293_v52 = vmax.f32 %v1162_v4, %v1261_v51  ;;  %v1488_v7 = vsel %vm1486_vm8, %v1455_v0, %v1471_v50  ;;  %v1504_v12 = vsel %vm1486_vm8, %v1471_v50, %v1455_v0  ;;  %v1602_v19 = vrot.slane %v1163_v27, 2 }
 0x112   : > { %v1425_v11 = vmax.f32 %v1294_v25, %v1357_v57  ;;  %4817 = vmatprep.mubr.msk.bf16.mxu0 %vm226_vm3, %v1748_v2  ;;  %v1524_v42 = vsel %vm1520_vm9, %v1504_v12, 0.0  ;;  %v1099_v23 = vmax.f32 %v5209_v33, %v5265_v5  ;;  %v1100_v13 = vmax.f32 %v1035_v46, %v5273_v14 }
 0x113   : > { %v1424_v21 = vmax.f32 %v1293_v52, %v1392_v3  ;;  %4800 = vmatmul.mubr.msk.bf16.gmra.mrb[32].mxu1 %vm226_vm3, %v5095_v59  ;;  %v1619_v27 = vsel %vm1617_vm10, %v1586_v15, %v1602_v19  ;;  %v1635_v24 = vsel %vm1617_vm10, %v1602_v19, %v1586_v15  ;;  %v973_v55 = vmax.f32 %v5144_v35, %v5204_v30 }
 0x114   : > { %v1556_v4 = vmax.f32 %v1425_v11, %v1524_v42  ;;  %4803 = vmatprep.mubr.msk.bf16.mxu1 %vm226_vm3, %v5164_v48  ;;  %v1655_v59 = vsel %vm1651_vm11, %v1635_v24, 0.0  ;;  %v1164_v33 = vmax.f32 %v1099_v23, %v5323_v56  ;;  %v1165_v46 = vmax.f32 %v1100_v13, %v5325_v20 }
 0x115   : > { %v1555_v38 = vmax.f32 %v1424_v21, %v1488_v7  ;;  %v1036_v36 = vmax.f32 %v972_v37, %v5265_v5  ;;  %v1037_v62 = vmax.f32 %v973_v55, %v5273_v14  ;;  %v974_v48 = vmax.f32 %v5190_v18, %v5265_v5 }
 0x116   : > { %v1687_v26 = vmax.f32 %v1556_v4, %v1655_v59  ;;  %v1194_v32 = vrot.slane %v1164_v33, 6  ;;  %v1210_v41 = vrot.slane %v1165_v46, 6  ;;  %v1325_v0 = vrot.slane %v1164_v33, 7  ;;  %v5388_v4 = vld [vmem:[#allocation2 + $0x70] sm:$0xff] }
 0x117   : > { %v1686_v35 = vmax.f32 %v1555_v38, %v1619_v27  ;;  %v1341_v31 = vrot.slane %v1165_v46, 7  ;;  %v1456_v44 = vrot.slane %v1164_v33, 1  ;;  %v1472_v47 = vrot.slane %v1165_v46, 1  ;;  %v5390_v27 = vld [vmem:[#allocation2 + $0x78] sm:$0xff] }
 0x118   : > { %v1587_v50 = vrot.slane %v1164_v33, 2  ;;  %2045 = vst.msk [vmem:[#allocation2 + $0x38] sm:$0xff] %vm226_vm3, %v1687_v26  ;;  %v1227_v17 = vsel %vm1224_vm4, %v1194_v32, %v1210_v41  ;;  %v1243_v37 = vsel %vm1224_vm4, %v1210_v41, %v1194_v32  ;;  %v1603_v25 = vrot.slane %v1165_v46, 2 }
 0x119   : > { %v1749_v51 = vpack.c.bf16 %v1687_v26, %v1686_v35  ;;  %2044 = vst.msk [vmem:[#allocation2 + $0x30] sm:$0xff] %vm226_vm3, %v1686_v35  ;;  %v1263_v18 = vsel %vm1257_vm5, %v1243_v37, 0.0  ;;  %v1296_v57 = vmax.f32 %v1165_v46, %v1227_v17  ;;  %v1358_v58 = vsel %vm1355_vm6, %v1325_v0, %v1341_v31 }
 0x11a   : > { %v1374_v2 = vsel %vm1355_vm6, %v1341_v31, %v1325_v0  ;;  %v1295_v52 = vmax.f32 %v1164_v33, %v1263_v18  ;;  %v1489_v7 = vsel %vm1486_vm8, %v1456_v44, %v1472_v47  ;;  %v1505_v11 = vsel %vm1486_vm8, %v1472_v47, %v1456_v44 }
 0x11b   : > { %4818 = vmatmul.mubr.msk.bf16.vlgmr.msra.gmra.mrb[16].mxu0 %vm226_vm3, %v1749_v51  ;;  %v1394_v3 = vsel %vm1388_vm7, %v1374_v2, 0.0  ;;  %4804 = vmatmul.mubr.msk.bf16.gmra.mrb[36].mxu1 %vm226_vm3, %v5160_v45  ;;  %v1427_v12 = vmax.f32 %v1296_v57, %v1358_v58  ;;  %v1526_v15 = vsel %vm1520_vm9, %v1505_v11, 0.0  ;;  %v1620_v19 = vsel %vm1617_vm10, %v1587_v50, %v1603_v25  ;;  %v5418_v57 = vld [vmem:[#allocation2 + $0x80] sm:$0xff] }
 0x11c   : > { %4884 = vmatpush3.bf16.msra.mxu0 %v5116_v9  ;;  %v1636_v21 = vsel %vm1617_vm10, %v1603_v25, %v1587_v50  ;;  %4807 = vmatprep.mubr.msk.bf16.mxu1 %vm226_vm3, %v5223_v39  ;;  %v1426_v42 = vmax.f32 %v1295_v52, %v1394_v3  ;;  %v1101_v45 = vmax.f32 %v1036_v36, %v5323_v56  ;;  %v5429_v3 = vld [vmem:[#allocation2 + $0x88] sm:$0xff] }
 0x11d   : > { %v1657_v23 = vsel %vm1651_vm11, %v1636_v21, 0.0  ;;  %v1102_v9 = vmax.f32 %v1037_v62, %v5325_v20  ;;  %v1558_v13 = vmax.f32 %v1427_v12, %v1526_v15  ;;  %v975_v24 = vmax.f32 %v5204_v30, %v5273_v14 }
 0x11e   : > { %v1038_v55 = vmax.f32 %v974_v48, %v5323_v56  ;;  %v976_v39 = vmax.f32 %v5265_v5, %v5323_v56  ;;  %v1557_v38 = vmax.f32 %v1426_v42, %v1489_v7  ;;  %v1166_v59 = vmax.f32 %v1101_v45, %v5388_v4 }
 0x11f   : > { %v1167_v33 = vmax.f32 %v1102_v9, %v5390_v27  ;;  %v977_v46 = vmax.f32 %v5273_v14, %v5325_v20  ;;  %v1689_v26 = vmax.f32 %v1558_v13, %v1657_v23  ;;  %v1039_v36 = vmax.f32 %v975_v24, %v5325_v20 }
 0x120   : > { %v1103_v62 = vmax.f32 %v1038_v55, %v5388_v4  ;;  %v1040_v30 = vmax.f32 %v976_v39, %v5388_v4  ;;  %v1688_v35 = vmax.f32 %v1557_v38, %v1620_v19  ;;  %v1195_v48 = vrot.slane %v1166_v59, 6 }
 0x121   : > { %v1211_v32 = vrot.slane %v1167_v33, 6  ;;  %v1326_v41 = vrot.slane %v1166_v59, 7  ;;  %v1342_v5 = vrot.slane %v1167_v33, 7  ;;  %v1457_v0 = vrot.slane %v1166_v59, 1  ;;  %2047 = vst.msk [vmem:[#allocation2 + $0x48] sm:$0xff] %vm226_vm3, %v1689_v26 }
 0x122   : > { %v1473_v31 = vrot.slane %v1167_v33, 1  ;;  %v1588_v44 = vrot.slane %v1166_v59, 2  ;;  %v1750_v47 = vpack.c.bf16 %v1689_v26, %v1688_v35  ;;  %v1604_v51 = vrot.slane %v1167_v33, 2  ;;  %2046 = vst.msk [vmem:[#allocation2 + $0x40] sm:$0xff] %vm226_vm3, %v1688_v35 }
 0x123   : > { %v1228_v14 = vsel %vm1224_vm4, %v1195_v48, %v1211_v32  ;;  %v1244_v50 = vsel %vm1224_vm4, %v1211_v32, %v1195_v48  ;;  %4808 = vmatmul.mubr.msk.bf16.gmra.mrb[40].mxu1 %vm226_vm3, %v5216_v43  ;;  %v1359_v25 = vsel %vm1355_vm6, %v1326_v41, %v1342_v5  ;;  %v1375_v18 = vsel %vm1355_vm6, %v1342_v5, %v1326_v41 }
 0x124   : > { %v1265_v17 = vsel %vm1257_vm5, %v1244_v50, 0.0  ;;  %v1298_v37 = vmax.f32 %v1167_v33, %v1228_v14  ;;  %4811 = vmatprep.mubr.msk.bf16.mxu1 %vm226_vm3, %v5267_v6  ;;  %4821 = vmatprep.mubr.msk.bf16.mxu0 %vm226_vm3, %v1750_v47  ;;  %v1396_v43 = vsel %vm1388_vm7, %v1375_v18, 0.0  ;;  %v1490_v2 = vsel %vm1486_vm8, %v1457_v0, %v1473_v31 }
 0x125   : > { %v1297_v58 = vmax.f32 %v1166_v59, %v1265_v17  ;;  %v1506_v52 = vsel %vm1486_vm8, %v1473_v31, %v1457_v0  ;;  %v1621_v6 = vsel %vm1617_vm10, %v1588_v44, %v1604_v51  ;;  %v1637_v12 = vsel %vm1617_vm10, %v1604_v51, %v1588_v44 }
 0x126   : > { %v1429_v7 = vmax.f32 %v1298_v37, %v1359_v25  ;;  %v1528_v11 = vsel %vm1520_vm9, %v1506_v52, 0.0  ;;  %v1659_v19 = vsel %vm1651_vm11, %v1637_v12, 0.0  ;;  %v1104_v21 = vmax.f32 %v1039_v36, %v5390_v27 }
 0x127   : > { %v1428_v15 = vmax.f32 %v1297_v58, %v1396_v43  ;;  %v1168_v42 = vmax.f32 %v1103_v62, %v5418_v57  ;;  %v1041_v45 = vmax.f32 %v977_v46, %v5390_v27  ;;  %v1105_v9 = vmax.f32 %v1040_v30, %v5418_v57  ;;  %v5447_v46 = vld [vmem:[#allocation2 + $0x90] sm:$0xff]  ;;  %v5449_v30 = vld [vmem:[#allocation2 + $0x98] sm:$0xff] }
 0x128   : > { %v1560_v23 = vmax.f32 %v1429_v7, %v1528_v11  ;;  %v978_v13 = vmax.f32 %v5323_v56, %v5388_v4  ;;  %v1169_v55 = vmax.f32 %v1104_v21, %v5429_v3  ;;  %v979_v31 = vmax.f32 %v5325_v20, %v5390_v27 }
 0x129   : > { %v1559_v24 = vmax.f32 %v1428_v15, %v1490_v2  ;;  %v1196_v39 = vrot.slane %v1168_v42, 6  ;;  %v1327_v38 = vrot.slane %v1168_v42, 7  ;;  %v1458_v33 = vrot.slane %v1168_v42, 1 }
 0x12a   : > { %v1691_v59 = vmax.f32 %v1560_v23, %v1659_v19  ;;  %v1589_v26 = vrot.slane %v1168_v42, 2  ;;  %v1106_v36 = vmax.f32 %v1041_v45, %v5429_v3  ;;  %v1212_v62 = vrot.slane %v1169_v55, 6 }
 0x12b   : > { %v1690_v35 = vmax.f32 %v1559_v24, %v1621_v6  ;;  %v1343_v48 = vrot.slane %v1169_v55, 7  ;;  %v1474_v32 = vrot.slane %v1169_v55, 1  ;;  %4812 = vmatmul.mubr.msk.bf16.gmra.mrb[44].mxu1 %vm226_vm3, %v5258_v60  ;;  %v1605_v41 = vrot.slane %v1169_v55, 2 }
 0x12c   : > { %v1170_v5 = vmax.f32 %v1105_v9, %v5447_v46  ;;  %v1171_v0 = vmax.f32 %v1106_v36, %v5449_v30  ;;  %2049 = vst.msk [vmem:[#allocation2 + $0x58] sm:$0xff] %vm226_vm3, %v1691_v59  ;;  %v1229_v47 = vsel %vm1224_vm4, %v1196_v39, %v1212_v62  ;;  %v1245_v14 = vsel %vm1224_vm4, %v1212_v62, %v1196_v39 }
 0x12d   : > { %v1751_v44 = vpack.c.bf16 %v1691_v59, %v1690_v35  ;;  %v1360_v60 = vsel %vm1355_vm6, %v1327_v38, %v1343_v48  ;;  %2048 = vst.msk [vmem:[#allocation2 + $0x50] sm:$0xff] %vm226_vm3, %v1690_v35  ;;  %v1267_v50 = vsel %vm1257_vm5, %v1245_v14, 0.0  ;;  %v1300_v51 = vmax.f32 %v1169_v55, %v1229_v47 }
 0x12e   : > { %v1376_v17 = vsel %vm1355_vm6, %v1343_v48, %v1327_v38  ;;  %v1491_v20 = vsel %vm1486_vm8, %v1458_v33, %v1474_v32  ;;  %v1299_v37 = vmax.f32 %v1168_v42, %v1267_v50  ;;  %v1507_v18 = vsel %vm1486_vm8, %v1474_v32, %v1458_v33 }
 0x12f   : > { %4822 = vmatmul.mubr.msk.bf16.gmra.mrb[20].mxu0 %vm226_vm3, %v1751_v44  ;;  %v1398_v25 = vsel %vm1388_vm7, %v1376_v17, 0.0  ;;  %v1622_v58 = vsel %vm1617_vm10, %v1589_v26, %v1605_v41  ;;  %v1431_v43 = vmax.f32 %v1300_v51, %v1360_v60  ;;  %v1530_v2 = vsel %vm1520_vm9, %v1507_v18, 0.0 }
 0x130   : > { %v1638_v52 = vsel %vm1617_vm10, %v1605_v41, %v1589_v26  ;;  %v1197_v7 = vrot.slane %v1170_v5, 6  ;;  %v1430_v11 = vmax.f32 %v1299_v37, %v1398_v25  ;;  %v1213_v12 = vrot.slane %v1171_v0, 6  ;;  %v5519_v25 = vld [vmem:[#allocation2 + $0x20] sm:$0xff] }
 0x131   : > { %v1661_v6 = vsel %vm1651_vm11, %v1638_v52, 0.0  ;;  %v1328_v15 = vrot.slane %v1170_v5, 7  ;;  %v1562_v19 = vmax.f32 %v1431_v43, %v1530_v2  ;;  %v1344_v21 = vrot.slane %v1171_v0, 7 }
 0x132   : > { %v1459_v42 = vrot.slane %v1170_v5, 1  ;;  %v1475_v23 = vrot.slane %v1171_v0, 1  ;;  %v1561_v45 = vmax.f32 %v1430_v11, %v1491_v20  ;;  %v1230_v9 = vsel %vm1224_vm4, %v1197_v7, %v1213_v12 }
 0x133   : > { %v1246_v24 = vsel %vm1224_vm4, %v1213_v12, %v1197_v7  ;;  %v1590_v55 = vrot.slane %v1170_v5, 2  ;;  %v1693_v39 = vmax.f32 %v1562_v19, %v1661_v6  ;;  %v1302_v59 = vmax.f32 %v1171_v0, %v1230_v9 }
 0x134   : > { %v1269_v38 = vsel %vm1257_vm5, %v1246_v24, 0.0  ;;  %v1361_v33 = vsel %vm1355_vm6, %v1328_v15, %v1344_v21  ;;  %v1692_v26 = vmax.f32 %v1561_v45, %v1622_v58  ;;  %v1377_v35 = vsel %vm1355_vm6, %v1344_v21, %v1328_v15 }
 0x135   : > { %v1301_v36 = vmax.f32 %v1170_v5, %v1269_v38  ;;  %v1492_v62 = vsel %vm1486_vm8, %v1459_v42, %v1475_v23  ;;  %v1400_v48 = vsel %vm1388_vm7, %v1377_v35, 0.0  ;;  %v1433_v32 = vmax.f32 %v1302_v59, %v1361_v33  ;;  %2051 = vst.msk [vmem:[#allocation2 + $0x68] sm:$0xff] %vm226_vm3, %v1693_v39 }
 0x136   : > { %v1508_v41 = vsel %vm1486_vm8, %v1475_v23, %v1459_v42  ;;  %v1606_v44 = vrot.slane %v1171_v0, 2  ;;  %v1752_v47 = vpack.c.bf16 %v1693_v39, %v1692_v26  ;;  %v1042_v60 = vmax.f32 %v978_v13, %v5418_v57  ;;  %2050 = vst.msk [vmem:[#allocation2 + $0x60] sm:$0xff] %vm226_vm3, %v1692_v26 }
 0x137   : > { %v1432_v14 = vmax.f32 %v1301_v36, %v1400_v48  ;;  %v1532_v5 = vsel %vm1520_vm9, %v1508_v41, 0.0  ;;  %v1043_v17 = vmax.f32 %v979_v31, %v5429_v3  ;;  %v980_v13 = vmax.f32 %v5388_v4, %v5418_v57 }
 0x138   : > { %v1564_v50 = vmax.f32 %v1433_v32, %v1532_v5  ;;  %v1623_v51 = vsel %vm1617_vm10, %v1590_v55, %v1606_v44  ;;  %v1639_v0 = vsel %vm1617_vm10, %v1606_v44, %v1590_v55  ;;  %4825 = vmatprep.mubr.msk.bf16.mxu0 %vm226_vm3, %v1752_v47  ;;  %v1107_v56 = vmax.f32 %v1042_v60, %v5447_v46 }
 0x139   : > { %v1563_v20 = vmax.f32 %v1432_v14, %v1492_v62  ;;  %v1663_v37 = vsel %vm1651_vm11, %v1639_v0, 0.0  ;;  %v1108_v58 = vmax.f32 %v1043_v17, %v5449_v30  ;;  %v981_v43 = vmax.f32 %v5390_v27, %v5429_v3 }
 0x13a   : > { %v1695_v18 = vmax.f32 %v1564_v50, %v1663_v37  ;;  %v982_v31 = vmax.f32 %v5418_v57, %v5447_v46  ;;  %v1172_v52 = vmax.f32 %v1107_v56, %v5142_v34  ;;  %v1044_v7 = vmax.f32 %v980_v13, %v5447_v46 }
 0x13b   : > { %v1694_v2 = vmax.f32 %v1563_v20, %v1623_v51  ;;  %v983_v11 = vmax.f32 %v5429_v3, %v5449_v30  ;;  %v1173_v4 = vmax.f32 %v1108_v58, %v5178_v63  ;;  %v1045_v6 = vmax.f32 %v981_v43, %v5449_v30 }
 0x13c   : > { %2053 = vst.msk [vmem:[#allocation2 + $0x78] sm:$0xff] %vm226_vm3, %v1695_v18  ;;  %v1046_v12 = vmax.f32 %v982_v31, %v5142_v34  ;;  %v2140_v27 = vmax.f32 %v5118_v10, %v5519_v25  ;;  %v1198_v15 = vrot.slane %v1172_v52, 6  ;;  %v1329_v19 = vrot.slane %v1172_v52, 7 }
 0x13d   : > { %v1753_v57 = vpack.c.bf16 %v1695_v18, %v1694_v2  ;;  %v1460_v21 = vrot.slane %v1172_v52, 1  ;;  %2052 = vst.msk [vmem:[#allocation2 + $0x70] sm:$0xff] %vm226_vm3, %v1694_v2  ;;  %v1214_v42 = vrot.slane %v1173_v4, 6  ;;  %v1345_v23 = vrot.slane %v1173_v4, 7 }
 0x13e   : > { %v1476_v3 = vrot.slane %v1173_v4, 1  ;;  %v1591_v45 = vrot.slane %v1172_v52, 2  ;;  %v1607_v9 = vrot.slane %v1173_v4, 2  ;;  %v1109_v24 = vmax.f32 %v1044_v7, %v5142_v34 }
 0x13f   : > { %4826 = vmatmul.mubr.msk.bf16.gmra.mrb[24].mxu0 %vm226_vm3, %v1753_v57  ;;  %v1110_v55 = vmax.f32 %v1045_v6, %v5178_v63  ;;  %v1047_v39 = vmax.f32 %v983_v11, %v5178_v63  ;;  %v1231_v38 = vsel %vm1224_vm4, %v1198_v15, %v1214_v42  ;;  %v1247_v59 = vsel %vm1224_vm4, %v1214_v42, %v1198_v15 }
 0x140   : > { %v1362_v33 = vsel %vm1355_vm6, %v1329_v19, %v1345_v23  ;;  %v1378_v26 = vsel %vm1355_vm6, %v1345_v23, %v1329_v19  ;;  %v1271_v36 = vsel %vm1257_vm5, %v1247_v59, 0.0  ;;  %v1304_v35 = vmax.f32 %v1173_v4, %v1231_v38 }
 0x141   : > { %v1402_v62 = vsel %vm1388_vm7, %v1378_v26, 0.0  ;;  %v1493_v48 = vsel %vm1486_vm8, %v1460_v21, %v1476_v3  ;;  %v1303_v32 = vmax.f32 %v1172_v52, %v1271_v36  ;;  %v1509_v41 = vsel %vm1486_vm8, %v1476_v3, %v1460_v21  ;;  %v5569_v52 = vld [vmem:[#allocation2 + $0xc0] sm:$0xff]  ;;  %v5596_v26 = vld [vmem:[#allocation2 + $0xc8] sm:$0xff] }
 0x142   : > { %v1624_v44 = vsel %vm1617_vm10, %v1591_v45, %v1607_v9  ;;  %v1640_v47 = vsel %vm1617_vm10, %v1607_v9, %v1591_v45  ;;  %v1435_v14 = vmax.f32 %v1304_v35, %v1362_v33  ;;  %v1534_v5 = vsel %vm1520_vm9, %v1509_v41, 0.0 }
 0x143   : > { %v1665_v60 = vsel %vm1651_vm11, %v1640_v47, 0.0  ;;  %v1174_v50 = vmax.f32 %v1109_v24, %v5133_v28  ;;  %v1434_v51 = vmax.f32 %v1303_v32, %v1402_v62  ;;  %v1175_v0 = vmax.f32 %v1110_v55, %v5180_v1  ;;  %v5602_v32 = vld [vmem:[#allocation2 + $0x28] sm:$0xff] }
 0x144   : > { %v1111_v17 = vmax.f32 %v1046_v12, %v5133_v28  ;;  %v1112_v20 = vmax.f32 %v1047_v39, %v5180_v1  ;;  %v1566_v37 = vmax.f32 %v1435_v14, %v1534_v5  ;;  %v984_v54 = vmax.f32 %v5447_v46, %v5142_v34 }
 0x145   : > { %v1199_v56 = vrot.slane %v1174_v50, 6  ;;  %v1330_v13 = vrot.slane %v1174_v50, 7  ;;  %v1461_v18 = vrot.slane %v1174_v50, 1  ;;  %v1565_v58 = vmax.f32 %v1434_v51, %v1493_v48 }
 0x146   : > { %v1215_v43 = vrot.slane %v1175_v0, 6  ;;  %v1346_v31 = vrot.slane %v1175_v0, 7  ;;  %v1477_v2 = vrot.slane %v1175_v0, 1  ;;  %v1697_v7 = vmax.f32 %v1566_v37, %v1665_v60 }
 0x147   : > { %v1592_v11 = vrot.slane %v1174_v50, 2  ;;  %v1608_v4 = vrot.slane %v1175_v0, 2  ;;  %v1176_v6 = vmax.f32 %v1111_v17, %v5569_v52  ;;  %v1696_v57 = vmax.f32 %v1565_v58, %v1624_v44 }
 0x148   : > { %v1232_v12 = vsel %vm1224_vm4, %v1199_v56, %v1215_v43  ;;  %v1248_v15 = vsel %vm1224_vm4, %v1215_v43, %v1199_v56  ;;  %v1363_v19 = vsel %vm1355_vm6, %v1330_v13, %v1346_v31  ;;  %2055 = vst.msk [vmem:[#allocation2 + $0x88] sm:$0xff] %vm226_vm3, %v1697_v7  ;;  %v1379_v23 = vsel %vm1355_vm6, %v1346_v31, %v1330_v13 }
 0x149   : > { %v1273_v21 = vsel %vm1257_vm5, %v1248_v15, 0.0  ;;  %v1306_v42 = vmax.f32 %v1175_v0, %v1232_v12  ;;  %v1494_v3 = vsel %vm1486_vm8, %v1461_v18, %v1477_v2  ;;  %v1754_v45 = vpack.c.bf16 %v1697_v7, %v1696_v57  ;;  %2054 = vst.msk [vmem:[#allocation2 + $0x80] sm:$0xff] %vm226_vm3, %v1696_v57  ;;  %v5629_v12 = vld [vmem:[#allocation2 + $0x38] sm:$0xff] }
 0x14a   : > { %v1305_v9 = vmax.f32 %v1174_v50, %v1273_v21  ;;  %v1404_v24 = vsel %vm1388_vm7, %v1379_v23, 0.0  ;;  %v1510_v55 = vsel %vm1486_vm8, %v1477_v2, %v1461_v18  ;;  %v1625_v59 = vsel %vm1617_vm10, %v1592_v11, %v1608_v4 }
 0x14b   : > { %v1437_v39 = vmax.f32 %v1306_v42, %v1363_v19  ;;  %v1536_v38 = vsel %vm1520_vm9, %v1510_v55, 0.0  ;;  %v1641_v33 = vsel %vm1617_vm10, %v1608_v4, %v1592_v11  ;;  %4829 = vmatprep.mubr.msk.bf16.mxu0 %vm226_vm3, %v1754_v45  ;;  %v1177_v62 = vmax.f32 %v1112_v20, %v5596_v26 }
 0x14c   : > { %v1436_v36 = vmax.f32 %v1305_v9, %v1404_v24  ;;  %v1667_v35 = vsel %vm1651_vm11, %v1641_v33, 0.0  ;;  %v1200_v48 = vrot.slane %v1176_v6, 6  ;;  %v1331_v44 = vrot.slane %v1176_v6, 7  ;;  %v5651_v9 = vld [vmem:[#allocation2 + $0x40] sm:$0xff] }
 0x14d   : > { %v1568_v41 = vmax.f32 %v1437_v39, %v1536_v38  ;;  %v1462_v47 = vrot.slane %v1176_v6, 1  ;;  %v1593_v14 = vrot.slane %v1176_v6, 2  ;;  %v1216_v60 = vrot.slane %v1177_v62, 6  ;;  %v5657_v38 = vld [vmem:[#allocation2 + $0x48] sm:$0xff] }
 0x14e   : > { %v1567_v5 = vmax.f32 %v1436_v36, %v1494_v3  ;;  %v1347_v50 = vrot.slane %v1177_v62, 7  ;;  %v1478_v51 = vrot.slane %v1177_v62, 1  ;;  %v1609_v17 = vrot.slane %v1177_v62, 2 }
 0x14f   : > { %v1699_v0 = vmax.f32 %v1568_v41, %v1667_v35  ;;  %v2141_v37 = vmax.f32 %v5100_v61, %v5602_v32  ;;  %v2202_v20 = vmax.f32 %v2138_v29, %v5519_v25  ;;  %v1233_v13 = vsel %vm1224_vm4, %v1200_v48, %v1216_v60  ;;  %v5622_v29 = vld [vmem:[#allocation2 + $0x30] sm:$0xff] }
 0x150   : > { %v1698_v56 = vmax.f32 %v1567_v5, %v1625_v59  ;;  %v1249_v18 = vsel %vm1224_vm4, %v1216_v60, %v1200_v48  ;;  %v1364_v58 = vsel %vm1355_vm6, %v1331_v44, %v1347_v50  ;;  %v1308_v31 = vmax.f32 %v1177_v62, %v1233_v13  ;;  %v5670_v35 = vld [vmem:[#allocation2 + $0xd0] sm:$0xff] }
 0x151   : > { %v1275_v43 = vsel %vm1257_vm5, %v1249_v18, 0.0  ;;  %v1380_v2 = vsel %vm1355_vm6, %v1347_v50, %v1331_v44  ;;  %v1495_v49 = vsel %vm1486_vm8, %v1462_v47, %v1478_v51  ;;  %2057 = vst.msk [vmem:[#allocation2 + $0x98] sm:$0xff] %vm226_vm3, %v1699_v0  ;;  %v1511_v57 = vsel %vm1486_vm8, %v1478_v51, %v1462_v47  ;;  %v5680_v51 = vld [vmem:[#allocation2 + $0xd8] sm:$0xff] }
 0x152   : > { %v1755_v7 = vpack.c.bf16 %v1699_v0, %v1698_v56  ;;  %v1307_v11 = vmax.f32 %v1176_v6, %v1275_v43  ;;  %v1406_v4 = vsel %vm1388_vm7, %v1380_v2, 0.0  ;;  %2056 = vst.msk [vmem:[#allocation2 + $0x90] sm:$0xff] %vm226_vm3, %v1698_v56  ;;  %v1439_v15 = vmax.f32 %v1308_v31, %v1364_v58 }
 0x153   : > { %v1538_v19 = vsel %vm1520_vm9, %v1511_v57, 0.0  ;;  %v1626_v21 = vsel %vm1617_vm10, %v1593_v14, %v1609_v17  ;;  %v1642_v6 = vsel %vm1617_vm10, %v1609_v17, %v1593_v14  ;;  %v2203_v3 = vmax.f32 %v2139_v16, %v5602_v32 }
 0x154   : > { %4830 = vmatmul.mubr.msk.bf16.gmra.mrb[28].mxu0 %vm226_vm3, %v1755_v7  ;;  %v1438_v42 = vmax.f32 %v1307_v11, %v1406_v4  ;;  %v1669_v23 = vsel %vm1651_vm11, %v1642_v6, 0.0  ;;  %v5649_v45 = vmax.f32 %v2140_v27, %v5622_v29  ;;  %v1570_v24 = vmax.f32 %v1439_v15, %v1538_v19  ;;  %v5714_v6 = vld [vmem:[#allocation2 + $0xe8] sm:$0xff] }
 0x155   : > { %v5654_v55 = vmax.f32 %v2141_v37, %v5629_v12  ;;  %v2266_v39 = vmax.f32 %v2202_v20, %v5622_v29  ;;  %v2267_v16 = vmax.f32 %v2203_v3, %v5629_v12  ;;  %v985_v10 = vmax.f32 %v5449_v30, %v5178_v63 }
 0x156   : > { %v1569_v61 = vmax.f32 %v1438_v42, %v1495_v49  ;;  %v1050_v27 = vmax.f32 %v986_v40, %v5569_v52  ;;  %v1701_v59 = vmax.f32 %v1570_v24, %v1669_v23  ;;  %v1048_v36 = vmax.f32 %v984_v54, %v5133_v28 }
 0x157   : > { %v2330_v33 = vmax.f32 %v2266_v39, %v5651_v9  ;;  %v1051_v46 = vmax.f32 %v987_v22, %v5596_v26  ;;  %v2331_v30 = vmax.f32 %v2267_v16, %v5657_v38  ;;  %v1049_v48 = vmax.f32 %v985_v10, %v5180_v1 }
 0x158   : > { %v1700_v62 = vmax.f32 %v1569_v61, %v1626_v21  ;;  %v1115_v34 = vmax.f32 %v1050_v27, %v5670_v35  ;;  %2059 = vst.msk [vmem:[#allocation2 + $0xa8] sm:$0xff] %vm226_vm3, %v1701_v59  ;;  %v1113_v22 = vmax.f32 %v1048_v36, %v5569_v52  ;;  %v5712_v21 = vld [vmem:[#allocation2 + $0xe0] sm:$0xff] }
 0x159   : > { %v2362_v40 = vrot.slane %v2330_v33, 6  ;;  %v2490_v41 = vrot.slane %v2330_v33, 7  ;;  %v2618_v44 = vrot.slane %v2330_v33, 1  ;;  %v2746_v47 = vrot.slane %v2330_v33, 2 }
 0x15a   : > { %v1756_v14 = vpack.c.bf16 %v1701_v59, %v1700_v62  ;;  %v2378_v5 = vrot.slane %v2331_v30, 6  ;;  %v2506_v60 = vrot.slane %v2331_v30, 7  ;;  %v2634_v50 = vrot.slane %v2331_v30, 1  ;;  %2058 = vst.msk [vmem:[#allocation2 + $0xa0] sm:$0xff] %vm226_vm3, %v1700_v62 }
 0x15b   : > { %v2762_v63 = vrot.slane %v2331_v30, 2  ;;  %v1114_v0 = vmax.f32 %v1049_v48, %v5596_v26  ;;  %v1116_v17 = vmax.f32 %v1051_v46, %v5680_v51  ;;  %v1178_v19 = vmax.f32 %v1113_v22, %v5670_v35 }
 0x15c   : > { %4833 = vmatprep.mubr.msk.bf16.mxu0 %vm226_vm3, %v1756_v14  ;;  %v2394_v37 = vsel %vm1224_vm4, %v2362_v40, %v2378_v5  ;;  %v2410_v20 = vsel %vm1224_vm4, %v2378_v5, %v2362_v40  ;;  %v2522_v56 = vsel %vm1355_vm6, %v2490_v41, %v2506_v60  ;;  %v2538_v13 = vsel %vm1355_vm6, %v2506_v60, %v2490_v41 }
 0x15d   : > { %v2426_v18 = vsel %vm1257_vm5, %v2410_v20, 0.0  ;;  %v2459_v58 = vmax.f32 %v2331_v30, %v2394_v37  ;;  %v2554_v43 = vsel %vm1388_vm7, %v2538_v13, 0.0  ;;  %v2650_v31 = vsel %vm1486_vm8, %v2618_v44, %v2634_v50 }
 0x15e   : > { %v2458_v2 = vmax.f32 %v2330_v33, %v2426_v18  ;;  %v2666_v49 = vsel %vm1486_vm8, %v2634_v50, %v2618_v44  ;;  %v2778_v7 = vsel %vm1617_vm10, %v2746_v47, %v2762_v63  ;;  %v2794_v11 = vsel %vm1617_vm10, %v2762_v63, %v2746_v47 }
 0x15f   : > { %v2587_v4 = vmax.f32 %v2459_v58, %v2522_v56  ;;  %v2683_v57 = vsel %vm1520_vm9, %v2666_v49, 0.0  ;;  %v2811_v15 = vsel %vm1651_vm11, %v2794_v11, 0.0  ;;  %v1179_v23 = vmax.f32 %v1114_v0, %v5680_v51 }
 0x160   : > { %v2586_v42 = vmax.f32 %v2458_v2, %v2554_v43  ;;  %v5718_v3 = vmax.f32 %v1115_v34, %v5712_v21  ;;  %v5721_v24 = vmax.f32 %v1116_v17, %v5714_v6  ;;  %v1201_v54 = vrot.slane %v1178_v19, 6 }
 0x161   : > { %v2715_v39 = vmax.f32 %v2587_v4, %v2683_v57  ;;  %v1332_v61 = vrot.slane %v1178_v19, 7  ;;  %v1463_v16 = vrot.slane %v1178_v19, 1  ;;  %v1217_v27 = vrot.slane %v1179_v23, 6 }
 0x162   : > { %v2714_v10 = vmax.f32 %v2586_v42, %v2650_v31  ;;  %v1348_v59 = vrot.slane %v1179_v23, 7  ;;  %v1479_v33 = vrot.slane %v1179_v23, 1  ;;  %v1594_v46 = vrot.slane %v1178_v19, 2 }
 0x163   : > { %v2843_v36 = vmax.f32 %v2715_v39, %v2811_v15  ;;  %v1610_v62 = vrot.slane %v1179_v23, 2  ;;  %v1202_v30 = vrot.slane %v5718_v3, 6  ;;  %v1234_v34 = vsel %vm1224_vm4, %v1201_v54, %v1217_v27 }
 0x164   : > { %v2842_v48 = vmax.f32 %v2714_v10, %v2778_v7  ;;  %v1250_v40 = vsel %vm1224_vm4, %v1217_v27, %v1201_v54  ;;  %v1365_v41 = vsel %vm1355_vm6, %v1332_v61, %v1348_v59  ;;  %v1310_v47 = vmax.f32 %v1179_v23, %v1234_v34 }
 0x165   : > { %3201 = vst.msk [vmem:[#allocation2 + $0x28] sm:$0xff] %vm226_vm3, %v2843_v36  ;;  %v1277_v44 = vsel %vm1257_vm5, %v1250_v40, 0.0  ;;  %v1381_v14 = vsel %vm1355_vm6, %v1348_v59, %v1332_v61  ;;  %v1496_v5 = vsel %vm1486_vm8, %v1463_v16, %v1479_v33  ;;  %v1512_v22 = vsel %vm1486_vm8, %v1479_v33, %v1463_v16 }
 0x166   : > { %v2906_v60 = vpack.c.bf16 %v2843_v36, %v2842_v48  ;;  %3200 = vst.msk [vmem:[#allocation2 + $0x20] sm:$0xff] %vm226_vm3, %v2842_v48  ;;  %v1309_v50 = vmax.f32 %v1178_v19, %v1277_v44  ;;  %v1408_v63 = vsel %vm1388_vm7, %v1381_v14, 0.0  ;;  %v1441_v0 = vmax.f32 %v1310_v47, %v1365_v41  ;;  %v5776_v36 = vld [vmem:[#allocation2 + $0x50] sm:$0xff]  ;;  %v5783_v48 = vld [vmem:[#allocation2 + $0x58] sm:$0xff] }
 0x167   : > { %v1540_v17 = vsel %vm1520_vm9, %v1512_v22, 0.0  ;;  %v1627_v37 = vsel %vm1617_vm10, %v1594_v46, %v1610_v62  ;;  %v1643_v20 = vsel %vm1617_vm10, %v1610_v62, %v1594_v46  ;;  %v1218_v18 = vrot.slane %v5721_v24, 6 }
 0x168   : > { %4851 = vmatprep.mubr.msk.bf16.mxu1 %vm226_vm3, %v2906_v60  ;;  %v1440_v56 = vmax.f32 %v1309_v50, %v1408_v63  ;;  %v1671_v13 = vsel %vm1651_vm11, %v1643_v20, 0.0  ;;  %v1333_v58 = vrot.slane %v5718_v3, 7  ;;  %v1572_v43 = vmax.f32 %v1441_v0, %v1540_v17 }
 0x169   : > { %v1349_v31 = vrot.slane %v5721_v24, 7  ;;  %v1464_v2 = vrot.slane %v5718_v3, 1  ;;  %v1480_v49 = vrot.slane %v5721_v24, 1  ;;  %v1235_v11 = vsel %vm1224_vm4, %v1202_v30, %v1218_v18 }
 0x16a   : > { %v1571_v7 = vmax.f32 %v1440_v56, %v1496_v5  ;;  %v1251_v4 = vsel %vm1224_vm4, %v1218_v18, %v1202_v30  ;;  %v1595_v57 = vrot.slane %v5718_v3, 2  ;;  %v1703_v15 = vmax.f32 %v1572_v43, %v1671_v13 }
 0x16b   : > { %v1279_v19 = vsel %vm1257_vm5, %v1251_v4, 0.0  ;;  %v1312_v42 = vmax.f32 %v5721_v24, %v1235_v11  ;;  %v1366_v23 = vsel %vm1355_vm6, %v1333_v58, %v1349_v31  ;;  %v1382_v61 = vsel %vm1355_vm6, %v1349_v31, %v1333_v58 }
 0x16c   : > { %v1702_v39 = vmax.f32 %v1571_v7, %v1627_v37  ;;  %v1311_v54 = vmax.f32 %v5718_v3, %v1279_v19  ;;  %v1497_v16 = vsel %vm1486_vm8, %v1464_v2, %v1480_v49  ;;  %v1410_v10 = vsel %vm1388_vm7, %v1382_v61, 0.0  ;;  %2061 = vst.msk [vmem:[#allocation2 + $0xb8] sm:$0xff] %vm226_vm3, %v1703_v15 }
 0x16d   : > { %v1443_v27 = vmax.f32 %v1312_v42, %v1366_v23  ;;  %v1513_v59 = vsel %vm1486_vm8, %v1480_v49, %v1464_v2  ;;  %v1611_v33 = vrot.slane %v5721_v24, 2  ;;  %v2268_v30 = vmax.f32 %v5649_v45, %v5651_v9  ;;  %v5828_v23 = vld [vmem:[#allocation2 + $0x60] sm:$0xff] }
 0x16e   : > { %v1757_v3 = vpack.c.bf16 %v1703_v15, %v1702_v39  ;;  %v1442_v46 = vmax.f32 %v1311_v54, %v1410_v10  ;;  %v1542_v62 = vsel %vm1520_vm9, %v1513_v59, 0.0  ;;  %2060 = vst.msk [vmem:[#allocation2 + $0xb0] sm:$0xff] %vm226_vm3, %v1702_v39  ;;  %v2269_v41 = vmax.f32 %v5654_v55, %v5657_v38  ;;  %v5835_v10 = vld [vmem:[#allocation2 + $0x68] sm:$0xff] }
 0x16f   : > { %v1574_v34 = vmax.f32 %v1443_v27, %v1542_v62  ;;  %v1628_v24 = vsel %vm1617_vm10, %v1595_v57, %v1611_v33  ;;  %v1644_v40 = vsel %vm1617_vm10, %v1611_v33, %v1595_v57  ;;  %v2332_v47 = vmax.f32 %v2268_v30, %v5776_v36 }
 0x170   : > { %4834 = vmatmul.mubr.msk.bf16.gmra.mrb[32].mxu0 %vm226_vm3, %v1757_v3  ;;  %v1573_v44 = vmax.f32 %v1442_v46, %v1497_v16  ;;  %v1673_v45 = vsel %vm1651_vm11, %v1644_v40, 0.0  ;;  %v2142_v14 = vmax.f32 %v5519_v25, %v5622_v29  ;;  %v2333_v60 = vmax.f32 %v2269_v41, %v5783_v48 }
 0x171   : > { %v1705_v5 = vmax.f32 %v1574_v34, %v1673_v45  ;;  %v2143_v50 = vmax.f32 %v5602_v32, %v5629_v12  ;;  %v988_v55 = vmax.f32 %v5133_v28, %v5569_v52  ;;  %v2363_v22 = vrot.slane %v2332_v47, 6  ;;  %v5849_v45 = vld [vmem:[#allocation2 + $0xf0] sm:$0xff] }
 0x172   : > { %v1704_v63 = vmax.f32 %v1573_v44, %v1628_v24  ;;  %v2491_v0 = vrot.slane %v2332_v47, 7  ;;  %v2619_v17 = vrot.slane %v2332_v47, 1  ;;  %v2379_v37 = vrot.slane %v2333_v60, 6 }
 0x173   : > { %v2507_v20 = vrot.slane %v2333_v60, 7  ;;  %v2635_v56 = vrot.slane %v2333_v60, 1  ;;  %v2747_v13 = vrot.slane %v2332_v47, 2  ;;  %2063 = vst.msk [vmem:[#allocation2 + $0xc8] sm:$0xff] %vm226_vm3, %v1705_v5  ;;  %v2763_v18 = vrot.slane %v2333_v60, 2 }
 0x174   : > { %v1758_v25 = vpack.c.bf16 %v1705_v5, %v1704_v63  ;;  %v2206_v58 = vmax.f32 %v2142_v14, %v5651_v9  ;;  %v2207_v43 = vmax.f32 %v2143_v50, %v5657_v38  ;;  %2062 = vst.msk [vmem:[#allocation2 + $0xc0] sm:$0xff] %vm226_vm3, %v1704_v63  ;;  %v2395_v28 = vsel %vm1224_vm4, %v2363_v22, %v2379_v37 }
 0x175   : > { %v2411_v32 = vsel %vm1224_vm4, %v2379_v37, %v2363_v22  ;;  %v2523_v31 = vsel %vm1355_vm6, %v2491_v0, %v2507_v20  ;;  %v2539_v2 = vsel %vm1355_vm6, %v2507_v20, %v2491_v0  ;;  %v2461_v7 = vmax.f32 %v2333_v60, %v2395_v28 }
 0x176   : > { %4837 = vmatprep.mubr.msk.bf16.mxu0 %vm226_vm3, %v1758_v25  ;;  %v2428_v49 = vsel %vm1257_vm5, %v2411_v32, 0.0  ;;  %v2556_v11 = vsel %vm1388_vm7, %v2539_v2, 0.0  ;;  %v2651_v4 = vsel %vm1486_vm8, %v2619_v17, %v2635_v56  ;;  %v2667_v15 = vsel %vm1486_vm8, %v2635_v56, %v2619_v17 }
 0x177   : > { %v2460_v57 = vmax.f32 %v2332_v47, %v2428_v49  ;;  %v2779_v19 = vsel %vm1617_vm10, %v2747_v13, %v2763_v18  ;;  %v2795_v42 = vsel %vm1617_vm10, %v2763_v18, %v2747_v13  ;;  %v2589_v39 = vmax.f32 %v2461_v7, %v2523_v31  ;;  %v5860_v18 = vld [vmem:[#allocation2 + $0xf8] sm:$0xff] }
 0x178   : > { %v2685_v54 = vsel %vm1520_vm9, %v2667_v15, 0.0  ;;  %v2813_v61 = vsel %vm1651_vm11, %v2795_v42, 0.0  ;;  %v2270_v16 = vmax.f32 %v2206_v58, %v5776_v36  ;;  %v2271_v59 = vmax.f32 %v2207_v43, %v5783_v48 }
 0x179   : > { %v2588_v27 = vmax.f32 %v2460_v57, %v2556_v11  ;;  %v989_v33 = vmax.f32 %v5180_v1, %v5596_v26  ;;  %v1052_v3 = vmax.f32 %v988_v55, %v5670_v35  ;;  %v2717_v46 = vmax.f32 %v2589_v39, %v2685_v54 }
 0x17a   : > { %v2334_v62 = vmax.f32 %v2270_v16, %v5828_v23  ;;  %v990_v30 = vmax.f32 %v5569_v52, %v5670_v35  ;;  %v991_v34 = vmax.f32 %v5596_v26, %v5680_v51  ;;  %v2335_v40 = vmax.f32 %v2271_v59, %v5835_v10 }
 0x17b   : > { %v2716_v24 = vmax.f32 %v2588_v27, %v2651_v4  ;;  %v1053_v41 = vmax.f32 %v989_v33, %v5680_v51  ;;  %v1117_v44 = vmax.f32 %v1052_v3, %v5712_v21  ;;  %v2845_v1 = vmax.f32 %v2717_v46, %v2813_v61 }
 0x17c   : > { %v2364_v47 = vrot.slane %v2334_v62, 6  ;;  %v2492_v14 = vrot.slane %v2334_v62, 7  ;;  %v2620_v5 = vrot.slane %v2334_v62, 1  ;;  %v2380_v50 = vrot.slane %v2335_v40, 6 }
 0x17d   : > { %v2844_v60 = vmax.f32 %v2716_v24, %v2779_v19  ;;  %v2508_v55 = vrot.slane %v2335_v40, 7  ;;  %v2636_v63 = vrot.slane %v2335_v40, 1  ;;  %v2748_v22 = vrot.slane %v2334_v62, 2  ;;  %3203 = vst.msk [vmem:[#allocation2 + $0x38] sm:$0xff] %vm226_vm3, %v2845_v1 }
 0x17e   : > { %v2764_v0 = vrot.slane %v2335_v40, 2  ;;  %v1118_v17 = vmax.f32 %v1053_v41, %v5714_v6  ;;  %v1182_v37 = vmax.f32 %v1117_v44, %v5849_v45  ;;  %v2396_v56 = vsel %vm1224_vm4, %v2364_v47, %v2380_v50 }
 0x17f   : > { %v2907_v20 = vpack.c.bf16 %v2845_v1, %v2844_v60  ;;  %v2412_v13 = vsel %vm1224_vm4, %v2380_v50, %v2364_v47  ;;  %v2524_v25 = vsel %vm1355_vm6, %v2492_v14, %v2508_v55  ;;  %3202 = vst.msk [vmem:[#allocation2 + $0x30] sm:$0xff] %vm226_vm3, %v2844_v60  ;;  %v2463_v43 = vmax.f32 %v2335_v40, %v2396_v56 }
 0x180   : > { %v2430_v58 = vsel %vm1257_vm5, %v2412_v13, 0.0  ;;  %v2540_v28 = vsel %vm1355_vm6, %v2508_v55, %v2492_v14  ;;  %v2652_v32 = vsel %vm1486_vm8, %v2620_v5, %v2636_v63  ;;  %v2668_v49 = vsel %vm1486_vm8, %v2636_v63, %v2620_v5 }
 0x181   : > { %4852 = vmatmul.mubr.msk.bf16.vlgmr.msra.gmra.mrb[48].mxu1 %vm226_vm3, %v2907_v20  ;;  %v2462_v31 = vmax.f32 %v2334_v62, %v2430_v58  ;;  %v2558_v2 = vsel %vm1388_vm7, %v2540_v28, 0.0  ;;  %v2780_v7 = vsel %vm1617_vm10, %v2748_v22, %v2764_v0  ;;  %v2591_v11 = vmax.f32 %v2463_v43, %v2524_v25  ;;  %v5918_v28 = vld [vmem:[#allocation2 + $0x100] sm:$0xff] }
 0x182   : > { %v2687_v4 = vsel %vm1520_vm9, %v2668_v49, 0.0  ;;  %v2796_v57 = vsel %vm1617_vm10, %v2764_v0, %v2748_v22  ;;  %v1183_v15 = vmax.f32 %v1118_v17, %v5860_v18  ;;  %v1203_v39 = vrot.slane %v1182_v37, 6 }
 0x183   : > { %v2590_v19 = vmax.f32 %v2462_v31, %v2558_v2  ;;  %v2815_v42 = vsel %vm1651_vm11, %v2796_v57, 0.0  ;;  %v1334_v54 = vrot.slane %v1182_v37, 7  ;;  %v2719_v61 = vmax.f32 %v2591_v11, %v2687_v4 }
 0x184   : > { %v1219_v16 = vrot.slane %v1183_v15, 6  ;;  %v1350_v27 = vrot.slane %v1183_v15, 7  ;;  %v1465_v59 = vrot.slane %v1182_v37, 1  ;;  %v1481_v3 = vrot.slane %v1183_v15, 1 }
 0x185   : > { %v2718_v33 = vmax.f32 %v2590_v19, %v2652_v32  ;;  %v1596_v46 = vrot.slane %v1182_v37, 2  ;;  %v1612_v62 = vrot.slane %v1183_v15, 2  ;;  %v2847_v24 = vmax.f32 %v2719_v61, %v2815_v42  ;;  %v5920_v32 = vld [vmem:[#allocation2 + $0x108] sm:$0xff]  ;;  %v5941_v42 = vld [vmem:[#allocation2 + $0x70] sm:$0xff] }
 0x186   : > { %v1236_v40 = vsel %vm1224_vm4, %v1203_v39, %v1219_v16  ;;  %v1252_v41 = vsel %vm1224_vm4, %v1219_v16, %v1203_v39  ;;  %v1367_v44 = vsel %vm1355_vm6, %v1334_v54, %v1350_v27  ;;  %v1383_v5 = vsel %vm1355_vm6, %v1350_v27, %v1334_v54 }
 0x187   : > { %v2846_v1 = vmax.f32 %v2718_v33, %v2780_v7  ;;  %v1281_v47 = vsel %vm1257_vm5, %v1252_v41, 0.0  ;;  %v1314_v14 = vmax.f32 %v1183_v15, %v1236_v40  ;;  %v1412_v50 = vsel %vm1388_vm7, %v1383_v5, 0.0  ;;  %3205 = vst.msk [vmem:[#allocation2 + $0x48] sm:$0xff] %vm226_vm3, %v2847_v24  ;;  %v5962_v5 = vld [vmem:[#allocation2 + $0x78] sm:$0xff] }
 0x188   : > { %v1313_v60 = vmax.f32 %v1182_v37, %v1281_v47  ;;  %v1498_v55 = vsel %vm1486_vm8, %v1465_v59, %v1481_v3  ;;  %v1514_v63 = vsel %vm1486_vm8, %v1481_v3, %v1465_v59  ;;  %v1629_v20 = vsel %vm1617_vm10, %v1596_v46, %v1612_v62 }
 0x189   : > { %v2908_v22 = vpack.c.bf16 %v2847_v24, %v2846_v1  ;;  %v1445_v0 = vmax.f32 %v1314_v14, %v1367_v44  ;;  %v1544_v17 = vsel %vm1520_vm9, %v1514_v63, 0.0  ;;  %3204 = vst.msk [vmem:[#allocation2 + $0x40] sm:$0xff] %vm226_vm3, %v2846_v1  ;;  %v1645_v56 = vsel %vm1617_vm10, %v1612_v62, %v1596_v46 }
 0x18a   : > { %v1444_v37 = vmax.f32 %v1313_v60, %v1412_v50  ;;  %v1054_v13 = vmax.f32 %v990_v30, %v5712_v21  ;;  %v1055_v25 = vmax.f32 %v991_v34, %v5714_v6  ;;  %v1675_v43 = vsel %vm1651_vm11, %v1645_v56, 0.0 }
 0x18b   : > { %4855 = vmatprep.mubr.msk.bf16.mxu1 %vm226_vm3, %v2908_v22  ;;  %v1576_v58 = vmax.f32 %v1445_v0, %v1544_v17  ;;  %v2144_v31 = vmax.f32 %v5622_v29, %v5651_v9  ;;  %v2145_v52 = vmax.f32 %v5629_v12, %v5657_v38  ;;  %v2146_v2 = vmax.f32 %v5651_v9, %v5776_v36 }
 0x18c   : > { %v1575_v30 = vmax.f32 %v1444_v37, %v1498_v55  ;;  %v1119_v26 = vmax.f32 %v1054_v13, %v5849_v45  ;;  %v1120_v34 = vmax.f32 %v1055_v25, %v5860_v18  ;;  %v2147_v4 = vmax.f32 %v5657_v38, %v5783_v48 }
 0x18d   : > { %v1707_v49 = vmax.f32 %v1576_v58, %v1675_v43  ;;  %v2208_v7 = vmax.f32 %v2144_v31, %v5776_v36  ;;  %v2209_v11 = vmax.f32 %v2145_v52, %v5783_v48  ;;  %v5937_v15 = vmax.f32 %v2146_v2, %v5828_v23 }
 0x18e   : > { %v1706_v29 = vmax.f32 %v1575_v30, %v1629_v20  ;;  %v1184_v57 = vmax.f32 %v1119_v26, %v5918_v28  ;;  %v1185_v12 = vmax.f32 %v1120_v34, %v5920_v32  ;;  %v5944_v39 = vmax.f32 %v2147_v4, %v5835_v10 }
 0x18f   : > { %v2272_v19 = vmax.f32 %v2208_v7, %v5828_v23  ;;  %v2273_v9 = vmax.f32 %v2209_v11, %v5835_v10  ;;  %v992_v38 = vmax.f32 %v5670_v35, %v5712_v21  ;;  %2065 = vst.msk [vmem:[#allocation2 + $0xd8] sm:$0xff] %vm226_vm3, %v1707_v49  ;;  %v2274_v11 = vmax.f32 %v5937_v15, %v5941_v42 }
 0x190   : > { %v1759_v54 = vpack.c.bf16 %v1707_v49, %v1706_v29  ;;  %v1204_v61 = vrot.slane %v1184_v57, 6  ;;  %v1220_v16 = vrot.slane %v1185_v12, 6  ;;  %v1335_v27 = vrot.slane %v1184_v57, 7  ;;  %2064 = vst.msk [vmem:[#allocation2 + $0xd0] sm:$0xff] %vm226_vm3, %v1706_v29 }
 0x191   : > { %v1351_v59 = vrot.slane %v1185_v12, 7  ;;  %v1466_v33 = vrot.slane %v1184_v57, 1  ;;  %v1482_v3 = vrot.slane %v1185_v12, 1  ;;  %v1597_v46 = vrot.slane %v1184_v57, 2 }
 0x192   : > { %4838 = vmatmul.mubr.msk.bf16.gmra.mrb[36].mxu0 %vm226_vm3, %v1759_v54  ;;  %v1237_v62 = vsel %vm1224_vm4, %v1204_v61, %v1220_v16  ;;  %v1253_v24 = vsel %vm1224_vm4, %v1220_v16, %v1204_v61  ;;  %v1613_v40 = vrot.slane %v1185_v12, 2  ;;  %v2336_v41 = vmax.f32 %v2272_v19, %v5941_v42  ;;  %v5995_v61 = vld [vmem:[#allocation2 + $0x80] sm:$0xff]  ;;  %v5997_v16 = vld [vmem:[#allocation2 + $0x88] sm:$0xff] }
 0x193   : > { %v1283_v44 = vsel %vm1257_vm5, %v1253_v24, 0.0  ;;  %v1316_v1 = vmax.f32 %v1185_v12, %v1237_v62  ;;  %v1368_v47 = vsel %vm1355_vm6, %v1335_v27, %v1351_v59  ;;  %v1384_v14 = vsel %vm1355_vm6, %v1351_v59, %v1335_v27 }
 0x194   : > { %v1315_v60 = vmax.f32 %v1184_v57, %v1283_v44  ;;  %v1414_v50 = vsel %vm1388_vm7, %v1384_v14, 0.0  ;;  %v1499_v55 = vsel %vm1486_vm8, %v1466_v33, %v1482_v3  ;;  %v1515_v63 = vsel %vm1486_vm8, %v1482_v3, %v1466_v33 }
 0x195   : > { %v1447_v22 = vmax.f32 %v1316_v1, %v1368_v47  ;;  %v1546_v0 = vsel %vm1520_vm9, %v1515_v63, 0.0  ;;  %v1630_v17 = vsel %vm1617_vm10, %v1597_v46, %v1613_v40  ;;  %v1646_v20 = vsel %vm1617_vm10, %v1613_v40, %v1597_v46 }
 0x196   : > { %v1446_v37 = vmax.f32 %v1315_v60, %v1414_v50  ;;  %v1677_v56 = vsel %vm1651_vm11, %v1646_v20, 0.0  ;;  %v2337_v13 = vmax.f32 %v2273_v9, %v5962_v5  ;;  %v2365_v25 = vrot.slane %v2336_v41, 6 }
 0x197   : > { %v1578_v58 = vmax.f32 %v1447_v22, %v1546_v0  ;;  %v2493_v43 = vrot.slane %v2336_v41, 7  ;;  %v2621_v31 = vrot.slane %v2336_v41, 1  ;;  %v2749_v52 = vrot.slane %v2336_v41, 2 }
 0x198   : > { %v1577_v30 = vmax.f32 %v1446_v37, %v1499_v55  ;;  %v2381_v26 = vrot.slane %v2337_v13, 6  ;;  %v2509_v34 = vrot.slane %v2337_v13, 7  ;;  %v2637_v2 = vrot.slane %v2337_v13, 1 }
 0x199   : > { %v1709_v49 = vmax.f32 %v1578_v58, %v1677_v56  ;;  %v2765_v7 = vrot.slane %v2337_v13, 2  ;;  %v2275_v4 = vmax.f32 %v5944_v39, %v5962_v5  ;;  %v2338_v1 = vmax.f32 %v2274_v11, %v5995_v61 }
 0x19a   : > { %v1708_v29 = vmax.f32 %v1577_v30, %v1630_v17  ;;  %v2397_v57 = vsel %vm1224_vm4, %v2365_v25, %v2381_v26  ;;  %v2413_v12 = vsel %vm1224_vm4, %v2381_v26, %v2365_v25  ;;  %v2525_v19 = vsel %vm1355_vm6, %v2493_v43, %v2509_v34 }
 0x19b   : > { %v2432_v9 = vsel %vm1257_vm5, %v2413_v12, 0.0  ;;  %v2465_v54 = vmax.f32 %v2337_v13, %v2397_v57  ;;  %v2541_v15 = vsel %vm1355_vm6, %v2509_v34, %v2493_v43  ;;  %v2653_v39 = vsel %vm1486_vm8, %v2621_v31, %v2637_v2  ;;  %2067 = vst.msk [vmem:[#allocation2 + $0xe8] sm:$0xff] %vm226_vm3, %v1709_v49 }
 0x19c   : > { %v1760_v27 = vpack.c.bf16 %v1709_v49, %v1708_v29  ;;  %v2464_v59 = vmax.f32 %v2336_v41, %v2432_v9  ;;  %v2560_v33 = vsel %vm1388_vm7, %v2541_v15, 0.0  ;;  %v2669_v3 = vsel %vm1486_vm8, %v2637_v2, %v2621_v31  ;;  %2066 = vst.msk [vmem:[#allocation2 + $0xe0] sm:$0xff] %vm226_vm3, %v1708_v29 }
 0x19d   : > { %v2593_v46 = vmax.f32 %v2465_v54, %v2525_v19  ;;  %v2689_v62 = vsel %vm1520_vm9, %v2669_v3, 0.0  ;;  %v2781_v24 = vsel %vm1617_vm10, %v2749_v52, %v2765_v7  ;;  %v2797_v40 = vsel %vm1617_vm10, %v2765_v7, %v2749_v52  ;;  %v6049_v19 = vld [vmem:[#allocation2 + $0x118] sm:$0xff] }
 0x19e   : > { %4841 = vmatprep.mubr.msk.bf16.mxu0 %vm226_vm3, %v1760_v27  ;;  %v2592_v41 = vmax.f32 %v2464_v59, %v2560_v33  ;;  %v2817_v44 = vsel %vm1651_vm11, %v2797_v40, 0.0  ;;  %v2339_v47 = vmax.f32 %v2275_v4, %v5997_v16  ;;  %v993_v60 = vmax.f32 %v5680_v51, %v5714_v6  ;;  %v6043_v4 = vld [vmem:[#allocation2 + $0x110] sm:$0xff] }
 0x19f   : > { %v2721_v14 = vmax.f32 %v2593_v46, %v2689_v62  ;;  %v1056_v50 = vmax.f32 %v992_v38, %v5849_v45  ;;  %v994_v55 = vmax.f32 %v5712_v21, %v5849_v45  ;;  %v2366_v22 = vrot.slane %v2338_v1, 6 }
 0x1a0   : > { %v2720_v63 = vmax.f32 %v2592_v41, %v2653_v39  ;;  %v2382_v0 = vrot.slane %v2339_v47, 6  ;;  %v2494_v17 = vrot.slane %v2338_v1, 7  ;;  %v2510_v37 = vrot.slane %v2339_v47, 7 }
 0x1a1   : > { %v2849_v20 = vmax.f32 %v2721_v14, %v2817_v44  ;;  %v2622_v56 = vrot.slane %v2338_v1, 1  ;;  %v2638_v13 = vrot.slane %v2339_v47, 1  ;;  %v2750_v35 = vrot.slane %v2338_v1, 2 }
 0x1a2   : > { %v2848_v25 = vmax.f32 %v2720_v63, %v2781_v24  ;;  %v2398_v51 = vsel %vm1224_vm4, %v2366_v22, %v2382_v0  ;;  %v2414_v58 = vsel %vm1224_vm4, %v2382_v0, %v2366_v22  ;;  %v2526_v43 = vsel %vm1355_vm6, %v2494_v17, %v2510_v37 }
 0x1a3   : > { %v2434_v38 = vsel %vm1257_vm5, %v2414_v58, 0.0  ;;  %v2467_v21 = vmax.f32 %v2339_v47, %v2398_v51  ;;  %v2542_v31 = vsel %vm1355_vm6, %v2510_v37, %v2494_v17  ;;  %3207 = vst.msk [vmem:[#allocation2 + $0x58] sm:$0xff] %vm226_vm3, %v2849_v20  ;;  %v2654_v34 = vsel %vm1486_vm8, %v2622_v56, %v2638_v13  ;;  %v6078_v37 = vld [vmem:[#allocation2 + $0x120] sm:$0xff]  ;;  %v6087_v58 = vld [vmem:[#allocation2 + $0x128] sm:$0xff] }
 0x1a4   : > { %v2909_v52 = vpack.c.bf16 %v2849_v20, %v2848_v25  ;;  %v2466_v30 = vmax.f32 %v2338_v1, %v2434_v38  ;;  %v2562_v26 = vsel %vm1388_vm7, %v2542_v31, 0.0  ;;  %3206 = vst.msk [vmem:[#allocation2 + $0x50] sm:$0xff] %vm226_vm3, %v2848_v25  ;;  %v2670_v49 = vsel %vm1486_vm8, %v2638_v13, %v2622_v56 }
 0x1a5   : > { %v2595_v2 = vmax.f32 %v2467_v21, %v2526_v43  ;;  %v2766_v7 = vrot.slane %v2339_v47, 2  ;;  %v1057_v11 = vmax.f32 %v993_v60, %v5860_v18  ;;  %v2691_v57 = vsel %vm1520_vm9, %v2670_v49, 0.0 }
 0x1a6   : > { %4856 = vmatmul.mubr.msk.bf16.gmra.mrb[52].mxu1 %vm226_vm3, %v2909_v52  ;;  %v2594_v29 = vmax.f32 %v2466_v30, %v2562_v26  ;;  %v1121_v12 = vmax.f32 %v1056_v50, %v5918_v28  ;;  %v995_v9 = vmax.f32 %v5714_v6, %v5860_v18  ;;  %v1058_v46 = vmax.f32 %v994_v55, %v5918_v28 }
 0x1a7   : > { %v2723_v54 = vmax.f32 %v2595_v2, %v2691_v57  ;;  %v2782_v15 = vsel %vm1617_vm10, %v2750_v35, %v2766_v7  ;;  %v2798_v39 = vsel %vm1617_vm10, %v2766_v7, %v2750_v35  ;;  %v1122_v27 = vmax.f32 %v1057_v11, %v5920_v32 }
 0x1a8   : > { %v2722_v59 = vmax.f32 %v2594_v29, %v2654_v34  ;;  %v2819_v33 = vsel %vm1651_vm11, %v2798_v39, 0.0  ;;  %v1186_v3 = vmax.f32 %v1121_v12, %v6043_v4  ;;  %v1059_v24 = vmax.f32 %v995_v9, %v5920_v32 }
 0x1a9   : > { %v2851_v62 = vmax.f32 %v2723_v54, %v2819_v33  ;;  %v1187_v6 = vmax.f32 %v1122_v27, %v6049_v19  ;;  %v2148_v40 = vmax.f32 %v5776_v36, %v5828_v23  ;;  %v1123_v55 = vmax.f32 %v1058_v46, %v6043_v4 }
 0x1aa   : > { %v2850_v41 = vmax.f32 %v2722_v59, %v2782_v15  ;;  %v1205_v44 = vrot.slane %v1186_v3, 6  ;;  %v1336_v1 = vrot.slane %v1186_v3, 7  ;;  %v1467_v47 = vrot.slane %v1186_v3, 1 }
 0x1ab   : > { %v1221_v14 = vrot.slane %v1187_v6, 6  ;;  %v1352_v60 = vrot.slane %v1187_v6, 7  ;;  %v1483_v50 = vrot.slane %v1187_v6, 1  ;;  %v1598_v63 = vrot.slane %v1186_v3, 2  ;;  %3209 = vst.msk [vmem:[#allocation2 + $0x68] sm:$0xff] %vm226_vm3, %v2851_v62 }
 0x1ac   : > { %v2910_v22 = vpack.c.bf16 %v2851_v62, %v2850_v41  ;;  %v1614_v28 = vrot.slane %v1187_v6, 2  ;;  %v1124_v0 = vmax.f32 %v1059_v24, %v6049_v19  ;;  %3208 = vst.msk [vmem:[#allocation2 + $0x60] sm:$0xff] %vm226_vm3, %v2850_v41  ;;  %v1188_v26 = vmax.f32 %v1123_v55, %v6078_v37 }
 0x1ad   : > { %v1238_v36 = vsel %vm1224_vm4, %v1205_v44, %v1221_v14  ;;  %v1254_v32 = vsel %vm1224_vm4, %v1221_v14, %v1205_v44  ;;  %v1369_v17 = vsel %vm1355_vm6, %v1336_v1, %v1352_v60  ;;  %v1385_v20 = vsel %vm1355_vm6, %v1352_v60, %v1336_v1  ;;  %v964_v1 = vld [vmem:[#allocation2 + $0x100] sm:$0xff] }
 0x1ae   : > { %4859 = vmatprep.mubr.msk.bf16.mxu1 %vm226_vm3, %v2910_v22  ;;  %v1285_v56 = vsel %vm1257_vm5, %v1254_v32, 0.0  ;;  %v1318_v13 = vmax.f32 %v1187_v6, %v1238_v36  ;;  %v1416_v25 = vsel %vm1388_vm7, %v1385_v20, 0.0  ;;  %v1500_v51 = vsel %vm1486_vm8, %v1467_v47, %v1483_v50  ;;  %v6129_v36 = vld [vmem:[#allocation2 + $0x90] sm:$0xff]  ;;  %v6131_v32 = vld [vmem:[#allocation2 + $0x98] sm:$0xff] }
 0x1af   : > { %v1317_v35 = vmax.f32 %v1186_v3, %v1285_v56  ;;  %v1516_v38 = vsel %vm1486_vm8, %v1483_v50, %v1467_v47  ;;  %v1631_v21 = vsel %vm1617_vm10, %v1598_v63, %v1614_v28  ;;  %v1647_v43 = vsel %vm1617_vm10, %v1614_v28, %v1598_v63  ;;  %v965_v63 = vld [vmem:[#allocation2 + $0x108] sm:$0xff] }
 0x1b0   : > { %v1449_v31 = vmax.f32 %v1318_v13, %v1369_v17  ;;  %v1548_v52 = vsel %vm1520_vm9, %v1516_v38, 0.0  ;;  %v1679_v30 = vsel %vm1651_vm11, %v1647_v43, 0.0  ;;  %v1189_v2 = vmax.f32 %v1124_v0, %v6087_v58 }
 0x1b1   : > { %v1448_v34 = vmax.f32 %v1317_v35, %v1416_v25  ;;  %v2149_v49 = vmax.f32 %v5783_v48, %v5835_v10  ;;  %v2212_v7 = vmax.f32 %v2148_v40, %v5941_v42  ;;  %v1206_v29 = vrot.slane %v1188_v26, 6 }
 0x1b2   : > { %v1580_v11 = vmax.f32 %v1449_v31, %v1548_v52  ;;  %v1337_v57 = vrot.slane %v1188_v26, 7  ;;  %v1468_v12 = vrot.slane %v1188_v26, 1  ;;  %v1222_v54 = vrot.slane %v1189_v2, 6 }
 0x1b3   : > { %v1579_v9 = vmax.f32 %v1448_v34, %v1500_v51  ;;  %v1353_v15 = vrot.slane %v1189_v2, 7  ;;  %v1484_v39 = vrot.slane %v1189_v2, 1  ;;  %v1599_v59 = vrot.slane %v1188_v26, 2 }
 0x1b4   : > { %v1711_v27 = vmax.f32 %v1580_v11, %v1679_v30  ;;  %v1615_v33 = vrot.slane %v1189_v2, 2  ;;  %v2213_v3 = vmax.f32 %v2149_v49, %v5962_v5  ;;  %v1239_v62 = vsel %vm1224_vm4, %v1206_v29, %v1222_v54 }
 0x1b5   : > { %v1710_v46 = vmax.f32 %v1579_v9, %v1631_v21  ;;  %v1255_v48 = vsel %vm1224_vm4, %v1222_v54, %v1206_v29  ;;  %v1370_v6 = vsel %vm1355_vm6, %v1337_v57, %v1353_v15  ;;  %v1320_v40 = vmax.f32 %v1189_v2, %v1239_v62 }
 0x1b6   : > { %v1287_v24 = vsel %vm1257_vm5, %v1255_v48, 0.0  ;;  %v1386_v41 = vsel %vm1355_vm6, %v1353_v15, %v1337_v57  ;;  %v1501_v44 = vsel %vm1486_vm8, %v1468_v12, %v1484_v39  ;;  %2069 = vst.msk [vmem:[#allocation2 + $0xf8] sm:$0xff] %vm226_vm3, %v1711_v27  ;;  %v1517_v50 = vsel %vm1486_vm8, %v1484_v39, %v1468_v12 }
 0x1b7   : > { %v1761_v47 = vpack.c.bf16 %v1711_v27, %v1710_v46  ;;  %v1319_v14 = vmax.f32 %v1188_v26, %v1287_v24  ;;  %v1418_v60 = vsel %vm1388_vm7, %v1386_v41, 0.0  ;;  %2068 = vst.msk [vmem:[#allocation2 + $0xf0] sm:$0xff] %vm226_vm3, %v1710_v46  ;;  %v1451_v22 = vmax.f32 %v1320_v40, %v1370_v6 }
 0x1b8   : > { %v1550_v28 = vsel %vm1520_vm9, %v1517_v50, 0.0  ;;  %v1632_v55 = vsel %vm1617_vm10, %v1599_v59, %v1615_v33  ;;  %v1648_v0 = vsel %vm1617_vm10, %v1615_v33, %v1599_v59  ;;  %v2276_v56 = vmax.f32 %v2212_v7, %v5995_v61  ;;  %v6180_v50 = vld [vmem:[#allocation2 + $0xa8] sm:$0xff] }
 0x1b9   : > { %4842 = vmatmul.mubr.msk.bf16.gmra.mrb[40].mxu0 %vm226_vm3, %v1761_v47  ;;  %v1450_v17 = vmax.f32 %v1319_v14, %v1418_v60  ;;  %v1681_v20 = vsel %vm1651_vm11, %v1648_v0, 0.0  ;;  %v2277_v13 = vmax.f32 %v2213_v3, %v5997_v16  ;;  %v1582_v25 = vmax.f32 %v1451_v22, %v1550_v28  ;;  %v1158_v47 = vld [vmem:[#allocation2 + $0x130] sm:$0xff]  ;;  %v6178_v60 = vld [vmem:[#allocation2 + $0xa0] sm:$0xff] }
 0x1ba   : > { %v2150_v51 = vmax.f32 %v5828_v23, %v5941_v42  ;;  %v2151_v35 = vmax.f32 %v5835_v10, %v5962_v5  ;;  %v996_v38 = vmax.f32 %v5849_v45, %v964_v1  ;;  %v2340_v43 = vmax.f32 %v2276_v56, %v6129_v36 }
 0x1bb   : > { %v1581_v21 = vmax.f32 %v1450_v17, %v1501_v44  ;;  %v2341_v31 = vmax.f32 %v2277_v13, %v6131_v32  ;;  %v997_v52 = vmax.f32 %v5860_v18, %v965_v63  ;;  %v1713_v30 = vmax.f32 %v1582_v25, %v1681_v20 }
 0x1bc   : > { %v2214_v26 = vmax.f32 %v2150_v51, %v5995_v61  ;;  %v2215_v34 = vmax.f32 %v2151_v35, %v5997_v16  ;;  %v1060_v2 = vmax.f32 %v996_v38, %v6043_v4  ;;  %v2367_v49 = vrot.slane %v2340_v43, 6 }
 0x1bd   : > { %v1712_v23 = vmax.f32 %v1581_v21, %v1632_v55  ;;  %v2383_v7 = vrot.slane %v2341_v31, 6  ;;  %v2495_v10 = vrot.slane %v2340_v43, 7  ;;  %2071 = vst.msk [vmem:[#allocation2 + $0x108] sm:$0xff] %vm226_vm3, %v1713_v30  ;;  %v2511_v45 = vrot.slane %v2341_v31, 7 }
 0x1be   : > { %v2623_v11 = vrot.slane %v2340_v43, 1  ;;  %v2639_v29 = vrot.slane %v2341_v31, 1  ;;  %v2751_v57 = vrot.slane %v2340_v43, 2  ;;  %v2767_v4 = vrot.slane %v2341_v31, 2 }
 0x1bf   : > { %v1762_v12 = vpack.c.bf16 %v1713_v30, %v1712_v23  ;;  %2070 = vst.msk [vmem:[#allocation2 + $0x100] sm:$0xff] %vm226_vm3, %v1712_v23  ;;  %v2399_v18 = vsel %vm1224_vm4, %v2367_v49, %v2383_v7  ;;  %v2415_v9 = vsel %vm1224_vm4, %v2383_v7, %v2367_v49  ;;  %v2527_v39 = vsel %vm1355_vm6, %v2495_v10, %v2511_v45  ;;  %v1159_v49 = vld [vmem:[#allocation2 + $0x138] sm:$0xff] }
 0x1c0   : > { %v2436_v54 = vsel %vm1257_vm5, %v2415_v9, 0.0  ;;  %v2469_v15 = vmax.f32 %v2341_v31, %v2399_v18  ;;  %v2543_v27 = vsel %vm1355_vm6, %v2511_v45, %v2495_v10  ;;  %v2655_v3 = vsel %vm1486_vm8, %v2623_v11, %v2639_v29 }
 0x1c1   : > { %4845 = vmatprep.mubr.msk.bf16.mxu0 %vm226_vm3, %v1762_v12  ;;  %v2468_v59 = vmax.f32 %v2340_v43, %v2436_v54  ;;  %v2564_v33 = vsel %vm1388_vm7, %v2543_v27, 0.0  ;;  %v2671_v46 = vsel %vm1486_vm8, %v2639_v29, %v2623_v11  ;;  %v2783_v6 = vsel %vm1617_vm10, %v2751_v57, %v2767_v4 }
 0x1c2   : > { %v2597_v62 = vmax.f32 %v2469_v15, %v2527_v39  ;;  %v2693_v48 = vsel %vm1520_vm9, %v2671_v46, 0.0  ;;  %v2799_v24 = vsel %vm1617_vm10, %v2767_v4, %v2751_v57  ;;  %v2278_v44 = vmax.f32 %v2214_v26, %v6129_v36 }
 0x1c3   : > { %v2596_v40 = vmax.f32 %v2468_v59, %v2564_v33  ;;  %v2821_v41 = vsel %vm1651_vm11, %v2799_v24, 0.0  ;;  %v2279_v1 = vmax.f32 %v2215_v34, %v6131_v32  ;;  %v1061_v63 = vmax.f32 %v997_v52, %v6049_v19 }
 0x1c4   : > { %v2725_v14 = vmax.f32 %v2597_v62, %v2693_v48  ;;  %v1125_v22 = vmax.f32 %v1060_v2, %v6078_v37  ;;  %v2152_v28 = vmax.f32 %v5941_v42, %v5995_v61  ;;  %v2342_v0 = vmax.f32 %v2278_v44, %v6178_v60 }
 0x1c5   : > { %v2724_v55 = vmax.f32 %v2596_v40, %v2655_v3  ;;  %v2343_v17 = vmax.f32 %v2279_v1, %v6180_v50  ;;  %v2153_v20 = vmax.f32 %v5962_v5, %v5997_v16  ;;  %v1126_v13 = vmax.f32 %v1061_v63, %v6087_v58 }
 0x1c6   : > { %v2853_v56 = vmax.f32 %v2725_v14, %v2821_v41  ;;  %v6191_v25 = vmax.f32 %v1125_v22, %v1158_v47  ;;  %v6194_v19 = vmax.f32 %v2152_v28, %v6129_v36  ;;  %v2368_v51 = vrot.slane %v2342_v0, 6 }
 0x1c7   : > { %v2852_v37 = vmax.f32 %v2724_v55, %v2783_v6  ;;  %v2384_v35 = vrot.slane %v2343_v17, 6  ;;  %v2496_v42 = vrot.slane %v2342_v0, 7  ;;  %v2512_v38 = vrot.slane %v2343_v17, 7 }
 0x1c8   : > { %v2624_v21 = vrot.slane %v2342_v0, 1  ;;  %v2640_v43 = vrot.slane %v2343_v17, 1  ;;  %v2752_v31 = vrot.slane %v2342_v0, 2  ;;  %3211 = vst.msk [vmem:[#allocation2 + $0x78] sm:$0xff] %vm226_vm3, %v2853_v56  ;;  %v2768_v30 = vrot.slane %v2343_v17, 2 }
 0x1c9   : > { %v2911_v52 = vpack.c.bf16 %v2853_v56, %v2852_v37  ;;  %v2400_v5 = vsel %vm1224_vm4, %v2368_v51, %v2384_v35  ;;  %v2416_v58 = vsel %vm1224_vm4, %v2384_v35, %v2368_v51  ;;  %3210 = vst.msk [vmem:[#allocation2 + $0x70] sm:$0xff] %vm226_vm3, %v2852_v37  ;;  %v2528_v2 = vsel %vm1355_vm6, %v2496_v42, %v2512_v38 }
 0x1ca   : > { %v2438_v26 = vsel %vm1257_vm5, %v2416_v58, 0.0  ;;  %v2471_v34 = vmax.f32 %v2343_v17, %v2400_v5  ;;  %v2544_v23 = vsel %vm1355_vm6, %v2512_v38, %v2496_v42  ;;  %v2656_v45 = vsel %vm1486_vm8, %v2624_v21, %v2640_v43  ;;  %v6257_v42 = vld [vmem:[#allocation2 + $0xb0] sm:$0xff]  ;;  %v6264_v5 = vld [vmem:[#allocation2 + $0xb8] sm:$0xff] }
 0x1cb   : > { %4860 = vmatmul.mubr.msk.bf16.gmra.mrb[56].mxu1 %vm226_vm3, %v2911_v52  ;;  %v2470_v7 = vmax.f32 %v2342_v0, %v2438_v26  ;;  %v2566_v10 = vsel %vm1388_vm7, %v2544_v23, 0.0  ;;  %v2672_v11 = vsel %vm1486_vm8, %v2640_v43, %v2624_v21  ;;  %v2784_v12 = vsel %vm1617_vm10, %v2752_v31, %v2768_v30 }
 0x1cc   : > { %v2599_v29 = vmax.f32 %v2471_v34, %v2528_v2  ;;  %v2695_v57 = vsel %vm1520_vm9, %v2672_v11, 0.0  ;;  %v2800_v18 = vsel %vm1617_vm10, %v2768_v30, %v2752_v31  ;;  %v1191_v54 = vmax.f32 %v1126_v13, %v1159_v49  ;;  %v3232_v13 = vld [vmem:[#allocation2] sm:$0xff] }
 0x1cd   : > { %v2598_v9 = vmax.f32 %v2470_v7, %v2566_v10  ;;  %v2823_v4 = vsel %vm1651_vm11, %v2800_v18, 0.0  ;;  %v1207_v15 = vrot.slane %v6191_v25, 6  ;;  %v1338_v27 = vrot.slane %v6191_v25, 7  ;;  %v3233_v7 = vld [vmem:[#allocation2 + $0x8] sm:$0xff]  ;;  %v6272_v10 = vld [vmem:[#allocation2 + $0x18] sm:$0xff] }
 0x1ce   : > { %v2727_v39 = vmax.f32 %v2599_v29, %v2695_v57  ;;  %v1469_v59 = vrot.slane %v6191_v25, 1  ;;  %v1600_v33 = vrot.slane %v6191_v25, 2  ;;  %v1223_v46 = vrot.slane %v1191_v54, 6 }
 0x1cf   : > { %v2726_v3 = vmax.f32 %v2598_v9, %v2656_v45  ;;  %v1354_v62 = vrot.slane %v1191_v54, 7  ;;  %v1485_v48 = vrot.slane %v1191_v54, 1  ;;  %v1616_v24 = vrot.slane %v1191_v54, 2 }
 0x1d0   : > { %v2855_v6 = vmax.f32 %v2727_v39, %v2823_v4  ;;  %v2217_v40 = vmax.f32 %v2153_v20, %v6131_v32  ;;  %v2280_v41 = vmax.f32 %v6194_v19, %v6178_v60  ;;  %v1240_v1 = vsel %vm1224_vm4, %v1207_v15, %v1223_v46  ;;  %v6249_v19 = vld [vmem:[#allocation2 + $0x10] sm:$0xff] }
 0x1d1   : > { %v2854_v44 = vmax.f32 %v2726_v3, %v2784_v12  ;;  %v1256_v47 = vsel %vm1224_vm4, %v1223_v46, %v1207_v15  ;;  %v1371_v14 = vsel %vm1355_vm6, %v1338_v27, %v1354_v62  ;;  %v1322_v22 = vmax.f32 %v1191_v54, %v1240_v1  ;;  %v6301_v1 = vld [vmem:[#allocation2 + $0x28] sm:$0xff] }
 0x1d2   : > { %v1289_v63 = vsel %vm1257_vm5, %v1256_v47, 0.0  ;;  %v1387_v28 = vsel %vm1355_vm6, %v1354_v62, %v1338_v27  ;;  %v1502_v55 = vsel %vm1486_vm8, %v1469_v59, %v1485_v48  ;;  %3213 = vst.msk [vmem:[#allocation2 + $0x88] sm:$0xff] %vm226_vm3, %v2855_v6  ;;  %v1518_v56 = vsel %vm1486_vm8, %v1485_v48, %v1469_v59 }
 0x1d3   : > { %v2912_v0 = vpack.c.bf16 %v2855_v6, %v2854_v44  ;;  %v1321_v17 = vmax.f32 %v6191_v25, %v1289_v63  ;;  %v1420_v20 = vsel %vm1388_vm7, %v1387_v28, 0.0  ;;  %3212 = vst.msk [vmem:[#allocation2 + $0x80] sm:$0xff] %vm226_vm3, %v2854_v44  ;;  %v1453_v37 = vmax.f32 %v1322_v22, %v1371_v14  ;;  %v6292_v6 = vld [vmem:[#allocation2 + $0x20] sm:$0xff] }
 0x1d4   : > { %v1552_v51 = vsel %vm1520_vm9, %v1518_v56, 0.0  ;;  %v1633_v35 = vsel %vm1617_vm10, %v1600_v33, %v1616_v24  ;;  %v1649_v25 = vsel %vm1617_vm10, %v1616_v24, %v1600_v33  ;;  %v2281_v43 = vmax.f32 %v2217_v40, %v6180_v50  ;;  %v6308_v28 = vld [vmem:[#allocation2 + $0xc0] sm:$0xff] }
 0x1d5   : > { %4863 = vmatprep.mubr.msk.bf16.mxu1 %vm226_vm3, %v2912_v0  ;;  %v1452_v38 = vmax.f32 %v1321_v17, %v1420_v20  ;;  %v1683_v21 = vsel %vm1651_vm11, %v1649_v25, 0.0  ;;  %v2344_v31 = vmax.f32 %v2280_v41, %v6257_v42  ;;  %v1584_v52 = vmax.f32 %v1453_v37, %v1552_v51  ;;  %v6312_v17 = vld [vmem:[#allocation2 + $0xc8] sm:$0xff] }
 0x1d6   : > { %v2154_v58 = vmax.f32 %v5995_v61, %v6129_v36  ;;  %v2155_v30 = vmax.f32 %v5997_v16, %v6131_v32  ;;  %v3296_v26 = vmax.f32 %v3232_v13, %v6249_v19  ;;  %v2345_v2 = vmax.f32 %v2281_v43, %v6264_v5 }
 0x1d7   : > { %v1583_v34 = vmax.f32 %v1452_v38, %v1502_v55  ;;  %v2369_v23 = vrot.slane %v2344_v31, 6  ;;  %v2497_v49 = vrot.slane %v2344_v31, 7  ;;  %v1715_v45 = vmax.f32 %v1584_v52, %v1683_v21 }
 0x1d8   : > { %v2625_v11 = vrot.slane %v2344_v31, 1  ;;  %v2753_v29 = vrot.slane %v2344_v31, 2  ;;  %v2218_v57 = vmax.f32 %v2154_v58, %v6178_v60  ;;  %v2385_v61 = vrot.slane %v2345_v2, 6 }
 0x1d9   : > { %v1714_v12 = vmax.f32 %v1583_v34, %v1633_v35  ;;  %v2513_v18 = vrot.slane %v2345_v2, 7  ;;  %v2641_v9 = vrot.slane %v2345_v2, 1  ;;  %2073 = vst.msk [vmem:[#allocation2 + $0x118] sm:$0xff] %vm226_vm3, %v1715_v45  ;;  %v2769_v16 = vrot.slane %v2345_v2, 2  ;;  %v6318_v35 = vld [vmem:[#allocation2 + $0x30] sm:$0xff] }
 0x1da   : > { %v2219_v4 = vmax.f32 %v2155_v30, %v6180_v50  ;;  %v2282_v54 = vmax.f32 %v2218_v57, %v6257_v42  ;;  %v3297_v15 = vmax.f32 %v3233_v7, %v6272_v10  ;;  %v2401_v27 = vsel %vm1224_vm4, %v2369_v23, %v2385_v61 }
 0x1db   : > { %v1763_v39 = vpack.c.bf16 %v1715_v45, %v1714_v12  ;;  %2072 = vst.msk [vmem:[#allocation2 + $0x110] sm:$0xff] %vm226_vm3, %v1714_v12  ;;  %v2417_v59 = vsel %vm1224_vm4, %v2385_v61, %v2369_v23  ;;  %v2529_v33 = vsel %vm1355_vm6, %v2497_v49, %v2513_v18  ;;  %v2473_v46 = vmax.f32 %v2345_v2, %v2401_v27 }
 0x1dc   : > { %v2440_v3 = vsel %vm1257_vm5, %v2417_v59, 0.0  ;;  %v2545_v62 = vsel %vm1355_vm6, %v2513_v18, %v2497_v49  ;;  %v2657_v48 = vsel %vm1486_vm8, %v2625_v11, %v2641_v9  ;;  %v2673_v41 = vsel %vm1486_vm8, %v2641_v9, %v2625_v11  ;;  %v6338_v9 = vld [vmem:[#allocation2 + $0x40] sm:$0xff] }
 0x1dd   : > { %4846 = vmatmul.mubr.msk.bf16.gmra.mrb[44].mxu0 %vm226_vm3, %v1763_v39  ;;  %v2472_v24 = vmax.f32 %v2344_v31, %v2440_v3  ;;  %v2568_v40 = vsel %vm1388_vm7, %v2545_v62, 0.0  ;;  %v2785_v44 = vsel %vm1617_vm10, %v2753_v29, %v2769_v16  ;;  %v2601_v47 = vmax.f32 %v2473_v46, %v2529_v33  ;;  %v6347_v39 = vld [vmem:[#allocation2 + $0x48] sm:$0xff] }
 0x1de   : > { %v2697_v14 = vsel %vm1520_vm9, %v2673_v41, 0.0  ;;  %v2801_v63 = vsel %vm1617_vm10, %v2769_v16, %v2753_v29  ;;  %v2283_v22 = vmax.f32 %v2219_v4, %v6264_v5  ;;  %v2346_v20 = vmax.f32 %v2282_v54, %v6308_v28  ;;  %v6331_v29 = vld [vmem:[#allocation2 + $0x38] sm:$0xff] }
 0x1df   : > { %v2600_v55 = vmax.f32 %v2472_v24, %v2568_v40  ;;  %v2825_v0 = vsel %vm1651_vm11, %v2801_v63, 0.0  ;;  %v3360_v56 = vmax.f32 %v3296_v26, %v6292_v6  ;;  %v2729_v13 = vmax.f32 %v2601_v47, %v2697_v14 }
 0x1e0   : > { %v2347_v37 = vmax.f32 %v2283_v22, %v6312_v17  ;;  %v3361_v51 = vmax.f32 %v3297_v15, %v6301_v1  ;;  %v3298_v25 = vmax.f32 %v6249_v19, %v6292_v6  ;;  %v2370_v21 = vrot.slane %v2346_v20, 6 }
 0x1e1   : > { %v2728_v38 = vmax.f32 %v2600_v55, %v2657_v48  ;;  %v2498_v43 = vrot.slane %v2346_v20, 7  ;;  %v2626_v31 = vrot.slane %v2346_v20, 1  ;;  %v2857_v52 = vmax.f32 %v2729_v13, %v2825_v0 }
 0x1e2   : > { %v2386_v58 = vrot.slane %v2347_v37, 6  ;;  %v2514_v30 = vrot.slane %v2347_v37, 7  ;;  %v2642_v34 = vrot.slane %v2347_v37, 1  ;;  %v2754_v26 = vrot.slane %v2346_v20, 2 }
 0x1e3   : > { %v2856_v2 = vmax.f32 %v2728_v38, %v2785_v44  ;;  %v2770_v23 = vrot.slane %v2347_v37, 2  ;;  %v3424_v49 = vmax.f32 %v3360_v56, %v6318_v35  ;;  %3215 = vst.msk [vmem:[#allocation2 + $0x98] sm:$0xff] %vm226_vm3, %v2857_v52  ;;  %v3425_v3 = vmax.f32 %v3361_v51, %v6331_v29 }
 0x1e4   : > { %v2402_v7 = vsel %vm1224_vm4, %v2370_v21, %v2386_v58  ;;  %v2418_v45 = vsel %vm1224_vm4, %v2386_v58, %v2370_v21  ;;  %v2530_v19 = vsel %vm1355_vm6, %v2498_v43, %v2514_v30  ;;  %v2546_v11 = vsel %vm1355_vm6, %v2514_v30, %v2498_v43 }
 0x1e5   : > { %v2913_v57 = vpack.c.bf16 %v2857_v52, %v2856_v2  ;;  %v2442_v12 = vsel %vm1257_vm5, %v2418_v45, 0.0  ;;  %v2475_v61 = vmax.f32 %v2347_v37, %v2402_v7  ;;  %v2570_v18 = vsel %vm1388_vm7, %v2546_v11, 0.0  ;;  %3214 = vst.msk [vmem:[#allocation2 + $0x90] sm:$0xff] %vm226_vm3, %v2856_v2 }
 0x1e6   : > { %v2474_v16 = vmax.f32 %v2346_v20, %v2442_v12  ;;  %v2658_v4 = vsel %vm1486_vm8, %v2626_v31, %v2642_v34  ;;  %v2674_v54 = vsel %vm1486_vm8, %v2642_v34, %v2626_v31  ;;  %v2786_v15 = vsel %vm1617_vm10, %v2754_v26, %v2770_v23 }
 0x1e7   : > { %4864 = vmatmul.mubr.msk.bf16.gmra.mrb[60].mxu1 %vm226_vm3, %v2913_v57  ;;  %v2603_v27 = vmax.f32 %v2475_v61, %v2530_v19  ;;  %v2699_v59 = vsel %vm1520_vm9, %v2674_v54, 0.0  ;;  %v2802_v33 = vsel %vm1617_vm10, %v2770_v23, %v2754_v26  ;;  %v3488_v48 = vmax.f32 %v3424_v49, %v6338_v9  ;;  %v6385_v49 = vld [vmem:[#allocation2 + $0x50] sm:$0xff]  ;;  %v6393_v57 = vld [vmem:[#allocation2 + $0x58] sm:$0xff] }
 0x1e8   : > { %v2602_v46 = vmax.f32 %v2474_v16, %v2570_v18  ;;  %v2827_v62 = vsel %vm1651_vm11, %v2802_v33, 0.0  ;;  %v3299_v24 = vmax.f32 %v6272_v10, %v6301_v1  ;;  %v3489_v41 = vmax.f32 %v3425_v3, %v6347_v39 }
 0x1e9   : > { %v2731_v40 = vmax.f32 %v2603_v27, %v2699_v59  ;;  %v3362_v44 = vmax.f32 %v3298_v25, %v6318_v35  ;;  %v2156_v47 = vmax.f32 %v6129_v36, %v6178_v60  ;;  %v3520_v63 = vrot.slane %v3488_v48, 6 }
 0x1ea   : > { %v2730_v14 = vmax.f32 %v2602_v46, %v2658_v4  ;;  %v3648_v22 = vrot.slane %v3488_v48, 7  ;;  %v3776_v55 = vrot.slane %v3488_v48, 1  ;;  %v3536_v20 = vrot.slane %v3489_v41, 6 }
 0x1eb   : > { %v2859_v0 = vmax.f32 %v2731_v40, %v2827_v62  ;;  %v3664_v56 = vrot.slane %v3489_v41, 7  ;;  %v3792_v13 = vrot.slane %v3489_v41, 1  ;;  %v3904_v51 = vrot.slane %v3488_v48, 2 }
 0x1ec   : > { %v2858_v37 = vmax.f32 %v2730_v14, %v2786_v15  ;;  %v3920_v38 = vrot.slane %v3489_v41, 2  ;;  %v3363_v10 = vmax.f32 %v3299_v24, %v6331_v29  ;;  %v3552_v21 = vsel %vm1224_vm4, %v3520_v63, %v3536_v20 }
 0x1ed   : > { %v3568_v25 = vsel %vm1224_vm4, %v3536_v20, %v3520_v63  ;;  %v3680_v36 = vsel %vm1355_vm6, %v3648_v22, %v3664_v56  ;;  %v3696_v43 = vsel %vm1355_vm6, %v3664_v56, %v3648_v22  ;;  %3217 = vst.msk [vmem:[#allocation2 + $0xa8] sm:$0xff] %vm226_vm3, %v2859_v0  ;;  %v3617_v58 = vmax.f32 %v3489_v41, %v3552_v21 }
 0x1ee   : > { %v2914_v31 = vpack.c.bf16 %v2859_v0, %v2858_v37  ;;  %v3584_v52 = vsel %vm1257_vm5, %v3568_v25, 0.0  ;;  %v3712_v30 = vsel %vm1388_vm7, %v3696_v43, 0.0  ;;  %3216 = vst.msk [vmem:[#allocation2 + $0xa0] sm:$0xff] %vm226_vm3, %v2858_v37  ;;  %v3808_v2 = vsel %vm1486_vm8, %v3776_v55, %v3792_v13 }
 0x1ef   : > { %v3616_v34 = vmax.f32 %v3488_v48, %v3584_v52  ;;  %v3824_v26 = vsel %vm1486_vm8, %v3792_v13, %v3776_v55  ;;  %v3936_v23 = vsel %vm1617_vm10, %v3904_v51, %v3920_v38  ;;  %v3745_v7 = vmax.f32 %v3617_v58, %v3680_v36  ;;  %v6429_v36 = vld [vmem:[#allocation2 + $0xd0] sm:$0xff]  ;;  %v6435_v58 = vld [vmem:[#allocation2 + $0xd8] sm:$0xff] }
 0x1f0   : > { %4867 = vmatprep.mubr.msk.bf16.mxu1 %vm226_vm3, %v2914_v31  ;;  %v3841_v45 = vsel %vm1520_vm9, %v3824_v26, 0.0  ;;  %v3952_v19 = vsel %vm1617_vm10, %v3920_v38, %v3904_v51  ;;  %v3426_v11 = vmax.f32 %v3362_v44, %v6338_v9  ;;  %v3427_v18 = vmax.f32 %v3363_v10, %v6347_v39 }
 0x1f1   : > { %v3744_v12 = vmax.f32 %v3616_v34, %v3712_v30  ;;  %v3969_v61 = vsel %vm1651_vm11, %v3952_v19, 0.0  ;;  %v2157_v16 = vmax.f32 %v6131_v32, %v6180_v50  ;;  %v3873_v4 = vmax.f32 %v3745_v7, %v3841_v45 }
 0x1f2   : > { %v3490_v54 = vmax.f32 %v3426_v11, %v6385_v49  ;;  %v2220_v15 = vmax.f32 %v2156_v47, %v6257_v42  ;;  %v3300_v27 = vmax.f32 %v6292_v6, %v6318_v35  ;;  %v3491_v33 = vmax.f32 %v3427_v18, %v6393_v57 }
 0x1f3   : > { %v3872_v59 = vmax.f32 %v3744_v12, %v3808_v2  ;;  %v2221_v3 = vmax.f32 %v2157_v16, %v6264_v5  ;;  %v3301_v46 = vmax.f32 %v6301_v1, %v6331_v29  ;;  %v4001_v62 = vmax.f32 %v3873_v4, %v3969_v61 }
 0x1f4   : > { %v3521_v48 = vrot.slane %v3490_v54, 6  ;;  %v3649_v24 = vrot.slane %v3490_v54, 7  ;;  %v3777_v32 = vrot.slane %v3490_v54, 1  ;;  %v3537_v41 = vrot.slane %v3491_v33, 6 }
 0x1f5   : > { %v4000_v40 = vmax.f32 %v3872_v59, %v3936_v23  ;;  %v3665_v44 = vrot.slane %v3491_v33, 7  ;;  %v3793_v14 = vrot.slane %v3491_v33, 1  ;;  %v3905_v47 = vrot.slane %v3490_v54, 2 }
 0x1f6   : > { %v3921_v63 = vrot.slane %v3491_v33, 2  ;;  %v2284_v6 = vmax.f32 %v2220_v15, %v6308_v28  ;;  %v2285_v22 = vmax.f32 %v2221_v3, %v6312_v17  ;;  %v3553_v0 = vsel %vm1224_vm4, %v3521_v48, %v3537_v41 }
 0x1f7   : > { %v4064_v55 = vpack.c.bf16 %v4001_v62, %v4000_v40  ;;  %v3569_v1 = vsel %vm1224_vm4, %v3537_v41, %v3521_v48  ;;  %v3681_v20 = vsel %vm1355_vm6, %v3649_v24, %v3665_v44  ;;  %v3619_v13 = vmax.f32 %v3491_v33, %v3553_v0  ;;  %v6467_v0 = vld [vmem:[#allocation2 + $0x68] sm:$0xff] }
 0x1f8   : > { %v3586_v56 = vsel %vm1257_vm5, %v3569_v1, 0.0  ;;  %v3697_v37 = vsel %vm1355_vm6, %v3665_v44, %v3649_v24  ;;  %v3809_v51 = vsel %vm1486_vm8, %v3777_v32, %v3793_v14  ;;  %v3825_v21 = vsel %vm1486_vm8, %v3793_v14, %v3777_v32 }
 0x1f9   : > { %4885 = vmatprep.mubr.msk.bf16.mxu0 %vm226_vm3, %v4064_v55  ;;  %v3618_v38 = vmax.f32 %v3490_v54, %v3586_v56  ;;  %v3714_v10 = vsel %vm1388_vm7, %v3697_v37, 0.0  ;;  %v3937_v25 = vsel %vm1617_vm10, %v3905_v47, %v3921_v63  ;;  %v3747_v43 = vmax.f32 %v3619_v13, %v3681_v20  ;;  %v6465_v55 = vld [vmem:[#allocation2 + $0x60] sm:$0xff] }
 0x1fa   : > { %v3843_v31 = vsel %vm1520_vm9, %v3825_v21, 0.0  ;;  %v3953_v52 = vsel %vm1617_vm10, %v3921_v63, %v3905_v47  ;;  %v2348_v30 = vmax.f32 %v2284_v6, %v6429_v36  ;;  %v2349_v26 = vmax.f32 %v2285_v22, %v6435_v58 }
 0x1fb   : > { %v3746_v34 = vmax.f32 %v3618_v38, %v3714_v10  ;;  %v3971_v2 = vsel %vm1651_vm11, %v3953_v52, 0.0  ;;  %v3364_v23 = vmax.f32 %v3300_v27, %v6338_v9  ;;  %v3875_v7 = vmax.f32 %v3747_v43, %v3843_v31 }
 0x1fc   : > { %v2371_v45 = vrot.slane %v2348_v30, 6  ;;  %v2499_v19 = vrot.slane %v2348_v30, 7  ;;  %v2627_v11 = vrot.slane %v2348_v30, 1  ;;  %v2387_v61 = vrot.slane %v2349_v26, 6 }
 0x1fd   : > { %v3874_v12 = vmax.f32 %v3746_v34, %v3809_v51  ;;  %v2515_v18 = vrot.slane %v2349_v26, 7  ;;  %v2643_v16 = vrot.slane %v2349_v26, 1  ;;  %v4003_v4 = vmax.f32 %v3875_v7, %v3971_v2 }
 0x1fe   : > { %v2755_v54 = vrot.slane %v2348_v30, 2  ;;  %v2771_v15 = vrot.slane %v2349_v26, 2  ;;  %v3365_v59 = vmax.f32 %v3301_v46, %v6347_v39  ;;  %v2403_v3 = vsel %vm1224_vm4, %v2371_v45, %v2387_v61 }
 0x1ff   : > { %v4002_v33 = vmax.f32 %v3874_v12, %v3937_v25  ;;  %v2419_v27 = vsel %vm1224_vm4, %v2387_v61, %v2371_v45  ;;  %v2531_v62 = vsel %vm1355_vm6, %v2499_v19, %v2515_v18  ;;  %v2477_v24 = vmax.f32 %v2349_v26, %v2403_v3 }
 0x200   : > { %v2444_v48 = vsel %vm1257_vm5, %v2419_v27, 0.0  ;;  %v2547_v32 = vsel %vm1355_vm6, %v2515_v18, %v2499_v19  ;;  %v2659_v46 = vsel %vm1486_vm8, %v2627_v11, %v2643_v16  ;;  %v2675_v14 = vsel %vm1486_vm8, %v2643_v16, %v2627_v11 }
 0x201   : > { %v4065_v40 = vpack.c.bf16 %v4003_v4, %v4002_v33  ;;  %v2476_v41 = vmax.f32 %v2348_v30, %v2444_v48  ;;  %v2572_v44 = vsel %vm1388_vm7, %v2547_v32, 0.0  ;;  %v2605_v47 = vmax.f32 %v2477_v24, %v2531_v62 }
 0x202   : > { %v2701_v63 = vsel %vm1520_vm9, %v2675_v14, 0.0  ;;  %v2787_v6 = vsel %vm1617_vm10, %v2755_v54, %v2771_v15  ;;  %v2803_v22 = vsel %vm1617_vm10, %v2771_v15, %v2755_v54  ;;  %v3428_v56 = vmax.f32 %v3364_v23, %v6385_v49 }
 0x203   : > { %4886 = vmatmul.mubr.msk.bf16.vlgmr.msra.gmra.mrb[48].mxu0 %vm226_vm3, %v4065_v40  ;;  %v2604_v1 = vmax.f32 %v2476_v41, %v2572_v44  ;;  %v2829_v20 = vsel %vm1651_vm11, %v2803_v22, 0.0  ;;  %v3429_v13 = vmax.f32 %v3365_v59, %v6393_v57  ;;  %v2733_v37 = vmax.f32 %v2605_v47, %v2701_v63  ;;  %v6516_v44 = vld [vmem:[#allocation2 + $0x70] sm:$0xff]  ;;  %v6518_v47 = vld [vmem:[#allocation2 + $0xe0] sm:$0xff]  ;;  %v6520_v63 = vld [vmem:[#allocation2 + $0xe8] sm:$0xff] }
 0x204   : > { %v2158_v51 = vmax.f32 %v6178_v60, %v6257_v42  ;;  %v2159_v38 = vmax.f32 %v6180_v50, %v6264_v5  ;;  %v3302_v10 = vmax.f32 %v6318_v35, %v6338_v9  ;;  %v3492_v25 = vmax.f32 %v3428_v56, %v6465_v55 }
 0x205   : > { %v2732_v21 = vmax.f32 %v2604_v1, %v2659_v46  ;;  %v3493_v43 = vmax.f32 %v3429_v13, %v6467_v0  ;;  %v3303_v31 = vmax.f32 %v6331_v29, %v6347_v39  ;;  %v2861_v52 = vmax.f32 %v2733_v37, %v2829_v20 }
 0x206   : > { %v2222_v30 = vmax.f32 %v2158_v51, %v6308_v28  ;;  %v2223_v34 = vmax.f32 %v2159_v38, %v6312_v17  ;;  %v3366_v60 = vmax.f32 %v3302_v10, %v6385_v49  ;;  %v3522_v50 = vrot.slane %v3492_v25, 6 }
 0x207   : > { %v2860_v2 = vmax.f32 %v2732_v21, %v2787_v6  ;;  %v3538_v26 = vrot.slane %v3493_v43, 6  ;;  %v3650_v23 = vrot.slane %v3492_v25, 7  ;;  %v3666_v35 = vrot.slane %v3493_v43, 7  ;;  %3219 = vst.msk [vmem:[#allocation2 + $0xb8] sm:$0xff] %vm226_vm3, %v2861_v52 }
 0x208   : > { %v3778_v7 = vrot.slane %v3492_v25, 1  ;;  %v3794_v45 = vrot.slane %v3493_v43, 1  ;;  %v3906_v19 = vrot.slane %v3492_v25, 2  ;;  %v3922_v61 = vrot.slane %v3493_v43, 2 }
 0x209   : > { %v2915_v11 = vpack.c.bf16 %v2861_v52, %v2860_v2  ;;  %v3554_v29 = vsel %vm1224_vm4, %v3522_v50, %v3538_v26  ;;  %v3570_v12 = vsel %vm1224_vm4, %v3538_v26, %v3522_v50  ;;  %3218 = vst.msk [vmem:[#allocation2 + $0xb0] sm:$0xff] %vm226_vm3, %v2860_v2  ;;  %v3682_v4 = vsel %vm1355_vm6, %v3650_v23, %v3666_v35 }
 0x20a   : > { %v3588_v18 = vsel %vm1257_vm5, %v3570_v12, 0.0  ;;  %v3621_v16 = vmax.f32 %v3493_v43, %v3554_v29  ;;  %v3698_v54 = vsel %vm1355_vm6, %v3666_v35, %v3650_v23  ;;  %v3810_v33 = vsel %vm1486_vm8, %v3778_v7, %v3794_v45 }
 0x20b   : > { %4868 = vmatmul.mubr.msk.bf16.gmra.mrb[64].mxu1 %vm226_vm3, %v2915_v11  ;;  %v3620_v15 = vmax.f32 %v3492_v25, %v3588_v18  ;;  %v3716_v59 = vsel %vm1388_vm7, %v3698_v54, 0.0  ;;  %v3826_v3 = vsel %vm1486_vm8, %v3794_v45, %v3778_v7  ;;  %v3938_v48 = vsel %vm1617_vm10, %v3906_v19, %v3922_v61 }
 0x20c   : > { %v3749_v27 = vmax.f32 %v3621_v16, %v3682_v4  ;;  %v3845_v62 = vsel %vm1520_vm9, %v3826_v3, 0.0  ;;  %v3954_v24 = vsel %vm1617_vm10, %v3922_v61, %v3906_v19  ;;  %v2286_v40 = vmax.f32 %v2222_v30, %v6429_v36  ;;  %v6547_v19 = vld [vmem:[#allocation2 + $0x78] sm:$0xff] }
 0x20d   : > { %v3748_v32 = vmax.f32 %v3620_v15, %v3716_v59  ;;  %v3973_v46 = vsel %vm1651_vm11, %v3954_v24, 0.0  ;;  %v2287_v41 = vmax.f32 %v2223_v34, %v6435_v58  ;;  %v3367_v6 = vmax.f32 %v3303_v31, %v6393_v57 }
 0x20e   : > { %v3877_v14 = vmax.f32 %v3749_v27, %v3845_v62  ;;  %v3430_v22 = vmax.f32 %v3366_v60, %v6465_v55  ;;  %v2160_v1 = vmax.f32 %v6257_v42, %v6308_v28  ;;  %v2350_v56 = vmax.f32 %v2286_v40, %v6518_v47 }
 0x20f   : > { %v3876_v20 = vmax.f32 %v3748_v32, %v3810_v33  ;;  %v2351_v13 = vmax.f32 %v2287_v41, %v6520_v63  ;;  %v2161_v37 = vmax.f32 %v6264_v5, %v6312_v17  ;;  %v3431_v38 = vmax.f32 %v3367_v6, %v6467_v0 }
 0x210   : > { %v4005_v51 = vmax.f32 %v3877_v14, %v3973_v46  ;;  %v6532_v10 = vmax.f32 %v3430_v22, %v6516_v44  ;;  %v6535_v21 = vmax.f32 %v2160_v1, %v6429_v36  ;;  %v2372_v43 = vrot.slane %v2350_v56, 6 }
 0x211   : > { %v4004_v25 = vmax.f32 %v3876_v20, %v3938_v48  ;;  %v2388_v42 = vrot.slane %v2351_v13, 6  ;;  %v2500_v31 = vrot.slane %v2350_v56, 7  ;;  %v2516_v52 = vrot.slane %v2351_v13, 7 }
 0x212   : > { %v2628_v30 = vrot.slane %v2350_v56, 1  ;;  %v2644_v34 = vrot.slane %v2351_v13, 1  ;;  %v2756_v60 = vrot.slane %v2350_v56, 2  ;;  %v2772_v26 = vrot.slane %v2351_v13, 2 }
 0x213   : > { %v4066_v2 = vpack.c.bf16 %v4005_v51, %v4004_v25  ;;  %v2404_v5 = vsel %vm1224_vm4, %v2372_v43, %v2388_v42  ;;  %v2420_v50 = vsel %vm1224_vm4, %v2388_v42, %v2372_v43  ;;  %v2532_v7 = vsel %vm1355_vm6, %v2500_v31, %v2516_v52 }
 0x214   : > { %v2446_v23 = vsel %vm1257_vm5, %v2420_v50, 0.0  ;;  %v2479_v35 = vmax.f32 %v2351_v13, %v2404_v5  ;;  %v2548_v45 = vsel %vm1355_vm6, %v2516_v52, %v2500_v31  ;;  %v2660_v12 = vsel %vm1486_vm8, %v2628_v30, %v2644_v34  ;;  %v6597_v5 = vld [vmem:[#allocation2 + $0xf0] sm:$0xff] }
 0x215   : > { %4889 = vmatprep.mubr.msk.bf16.mxu0 %vm226_vm3, %v4066_v2  ;;  %v2478_v11 = vmax.f32 %v2350_v56, %v2446_v23  ;;  %v2574_v29 = vsel %vm1388_vm7, %v2548_v45, 0.0  ;;  %v2676_v61 = vsel %vm1486_vm8, %v2644_v34, %v2628_v30  ;;  %v2788_v4 = vsel %vm1617_vm10, %v2756_v60, %v2772_v26 }
 0x216   : > { %v2607_v18 = vmax.f32 %v2479_v35, %v2532_v7  ;;  %v2703_v16 = vsel %vm1520_vm9, %v2676_v61, 0.0  ;;  %v2804_v54 = vsel %vm1617_vm10, %v2772_v26, %v2756_v60  ;;  %v3495_v33 = vmax.f32 %v3431_v38, %v6547_v19  ;;  %v6604_v7 = vld [vmem:[#allocation2 + $0xf8] sm:$0xff] }
 0x217   : > { %v2606_v15 = vmax.f32 %v2478_v11, %v2574_v29  ;;  %v2831_v59 = vsel %vm1651_vm11, %v2804_v54, 0.0  ;;  %v3523_v3 = vrot.slane %v6532_v10, 6  ;;  %v3651_v62 = vrot.slane %v6532_v10, 7 }
 0x218   : > { %v2735_v27 = vmax.f32 %v2607_v18, %v2703_v16  ;;  %v3779_v48 = vrot.slane %v6532_v10, 1  ;;  %v3907_v24 = vrot.slane %v6532_v10, 2  ;;  %v3539_v46 = vrot.slane %v3495_v33, 6 }
 0x219   : > { %v2734_v32 = vmax.f32 %v2606_v15, %v2660_v12  ;;  %v3667_v40 = vrot.slane %v3495_v33, 7  ;;  %v3795_v41 = vrot.slane %v3495_v33, 1  ;;  %v3923_v6 = vrot.slane %v3495_v33, 2 }
 0x21a   : > { %v2863_v14 = vmax.f32 %v2735_v27, %v2831_v59  ;;  %v2225_v22 = vmax.f32 %v2161_v37, %v6435_v58  ;;  %v2288_v1 = vmax.f32 %v6535_v21, %v6518_v47  ;;  %v3555_v56 = vsel %vm1224_vm4, %v3523_v3, %v3539_v46 }
 0x21b   : > { %v2862_v20 = vmax.f32 %v2734_v32, %v2788_v4  ;;  %v3571_v13 = vsel %vm1224_vm4, %v3539_v46, %v3523_v3  ;;  %v3683_v51 = vsel %vm1355_vm6, %v3651_v62, %v3667_v40  ;;  %v3623_v25 = vmax.f32 %v3495_v33, %v3555_v56 }
 0x21c   : > { %v3590_v38 = vsel %vm1257_vm5, %v3571_v13, 0.0  ;;  %v3699_v37 = vsel %vm1355_vm6, %v3667_v40, %v3651_v62  ;;  %v3811_v21 = vsel %vm1486_vm8, %v3779_v48, %v3795_v41  ;;  %3221 = vst.msk [vmem:[#allocation2 + $0xc8] sm:$0xff] %vm226_vm3, %v2863_v14  ;;  %v3827_v52 = vsel %vm1486_vm8, %v3795_v41, %v3779_v48 }
 0x21d   : > { %v2916_v43 = vpack.c.bf16 %v2863_v14, %v2862_v20  ;;  %v3622_v42 = vmax.f32 %v6532_v10, %v3590_v38  ;;  %v3718_v31 = vsel %vm1388_vm7, %v3699_v37, 0.0  ;;  %3220 = vst.msk [vmem:[#allocation2 + $0xc0] sm:$0xff] %vm226_vm3, %v2862_v20  ;;  %v3751_v30 = vmax.f32 %v3623_v25, %v3683_v51  ;;  %v6639_v51 = vld [vmem:[#allocation2 + $0x88] sm:$0xff] }
 0x21e   : > { %v3847_v34 = vsel %vm1520_vm9, %v3827_v52, 0.0  ;;  %v3939_v60 = vsel %vm1617_vm10, %v3907_v24, %v3923_v6  ;;  %v3955_v2 = vsel %vm1617_vm10, %v3923_v6, %v3907_v24  ;;  %v2289_v26 = vmax.f32 %v2225_v22, %v6520_v63  ;;  %v6630_v22 = vld [vmem:[#allocation2 + $0x80] sm:$0xff] }
 0x21f   : > { %4871 = vmatprep.mubr.msk.bf16.mxu1 %vm226_vm3, %v2916_v43  ;;  %v3750_v10 = vmax.f32 %v3622_v42, %v3718_v31  ;;  %v3975_v50 = vsel %vm1651_vm11, %v3955_v2, 0.0  ;;  %v2352_v23 = vmax.f32 %v2288_v1, %v6597_v5  ;;  %v3879_v35 = vmax.f32 %v3751_v30, %v3847_v34 }
 0x220   : > { %v3304_v45 = vmax.f32 %v6338_v9, %v6385_v49  ;;  %v3305_v11 = vmax.f32 %v6347_v39, %v6393_v57  ;;  %v2162_v29 = vmax.f32 %v6308_v28, %v6429_v36  ;;  %v2353_v61 = vmax.f32 %v2289_v26, %v6604_v7 }
 0x221   : > { %v3878_v12 = vmax.f32 %v3750_v10, %v3811_v21  ;;  %v2373_v18 = vrot.slane %v2352_v23, 6  ;;  %v2501_v16 = vrot.slane %v2352_v23, 7  ;;  %v4007_v4 = vmax.f32 %v3879_v35, %v3975_v50 }
 0x222   : > { %v2629_v54 = vrot.slane %v2352_v23, 1  ;;  %v2757_v15 = vrot.slane %v2352_v23, 2  ;;  %v3368_v59 = vmax.f32 %v3304_v45, %v6465_v55  ;;  %v2389_v3 = vrot.slane %v2353_v61, 6 }
 0x223   : > { %v4006_v33 = vmax.f32 %v3878_v12, %v3939_v60  ;;  %v2517_v27 = vrot.slane %v2353_v61, 7  ;;  %v2645_v9 = vrot.slane %v2353_v61, 1  ;;  %v2773_v62 = vrot.slane %v2353_v61, 2 }
 0x224   : > { %v3369_v39 = vmax.f32 %v3305_v11, %v6467_v0  ;;  %v3432_v48 = vmax.f32 %v3368_v59, %v6516_v44  ;;  %v2163_v28 = vmax.f32 %v6312_v17, %v6435_v58  ;;  %v2405_v32 = vsel %vm1224_vm4, %v2373_v18, %v2389_v3 }
 0x225   : > { %v4067_v24 = vpack.c.bf16 %v4007_v4, %v4006_v33  ;;  %v2421_v46 = vsel %vm1224_vm4, %v2389_v3, %v2373_v18  ;;  %v2533_v40 = vsel %vm1355_vm6, %v2501_v16, %v2517_v27  ;;  %v2481_v14 = vmax.f32 %v2353_v61, %v2405_v32 }
 0x226   : > { %v2448_v41 = vsel %vm1257_vm5, %v2421_v46, 0.0  ;;  %v2549_v6 = vsel %vm1355_vm6, %v2517_v27, %v2501_v16  ;;  %v2661_v17 = vsel %vm1486_vm8, %v2629_v54, %v2645_v9  ;;  %v2677_v56 = vsel %vm1486_vm8, %v2645_v9, %v2629_v54  ;;  %v6668_v9 = vld [vmem:[#allocation2 + $0x100] sm:$0xff] }
 0x227   : > { %4890 = vmatmul.mubr.msk.bf16.gmra.mrb[52].mxu0 %vm226_vm3, %v4067_v24  ;;  %v2480_v1 = vmax.f32 %v2352_v23, %v2448_v41  ;;  %v2576_v20 = vsel %vm1388_vm7, %v2549_v6, 0.0  ;;  %v2789_v13 = vsel %vm1617_vm10, %v2757_v15, %v2773_v62  ;;  %v2609_v38 = vmax.f32 %v2481_v14, %v2533_v40  ;;  %v6677_v24 = vld [vmem:[#allocation2 + $0x108] sm:$0xff] }
 0x228   : > { %v2705_v25 = vsel %vm1520_vm9, %v2677_v56, 0.0  ;;  %v2805_v37 = vsel %vm1617_vm10, %v2773_v62, %v2757_v15  ;;  %v3433_v21 = vmax.f32 %v3369_v39, %v6547_v19  ;;  %v3496_v31 = vmax.f32 %v3432_v48, %v6630_v22 }
 0x229   : > { %v2608_v43 = vmax.f32 %v2480_v1, %v2576_v20  ;;  %v2833_v42 = vsel %vm1651_vm11, %v2805_v37, 0.0  ;;  %v2226_v52 = vmax.f32 %v2162_v29, %v6518_v47  ;;  %v2737_v30 = vmax.f32 %v2609_v38, %v2705_v25 }
 0x22a   : > { %v3497_v34 = vmax.f32 %v3433_v21, %v6639_v51  ;;  %v2227_v60 = vmax.f32 %v2163_v28, %v6520_v63  ;;  %v3306_v2 = vmax.f32 %v6385_v49, %v6465_v55  ;;  %v3524_v50 = vrot.slane %v3496_v31, 6 }
 0x22b   : > { %v2736_v10 = vmax.f32 %v2608_v43, %v2661_v17  ;;  %v3652_v26 = vrot.slane %v3496_v31, 7  ;;  %v3780_v23 = vrot.slane %v3496_v31, 1  ;;  %v2865_v35 = vmax.f32 %v2737_v30, %v2833_v42 }
 0x22c   : > { %v3540_v45 = vrot.slane %v3497_v34, 6  ;;  %v3668_v11 = vrot.slane %v3497_v34, 7  ;;  %v3796_v12 = vrot.slane %v3497_v34, 1  ;;  %v3908_v18 = vrot.slane %v3496_v31, 2 }
 0x22d   : > { %v2864_v61 = vmax.f32 %v2736_v10, %v2789_v13  ;;  %v3924_v16 = vrot.slane %v3497_v34, 2  ;;  %v2290_v29 = vmax.f32 %v2226_v52, %v6597_v5  ;;  %3223 = vst.msk [vmem:[#allocation2 + $0xd8] sm:$0xff] %vm226_vm3, %v2865_v35  ;;  %v2291_v41 = vmax.f32 %v2227_v60, %v6604_v7 }
 0x22e   : > { %v3556_v4 = vsel %vm1224_vm4, %v3524_v50, %v3540_v45  ;;  %v3572_v54 = vsel %vm1224_vm4, %v3540_v45, %v3524_v50  ;;  %v3684_v49 = vsel %vm1355_vm6, %v3652_v26, %v3668_v11  ;;  %v3700_v15 = vsel %vm1355_vm6, %v3668_v11, %v3652_v26 }
 0x22f   : > { %v2917_v59 = vpack.c.bf16 %v2865_v35, %v2864_v61  ;;  %v3592_v33 = vsel %vm1257_vm5, %v3572_v54, 0.0  ;;  %v3625_v3 = vmax.f32 %v3497_v34, %v3556_v4  ;;  %v3720_v27 = vsel %vm1388_vm7, %v3700_v15, 0.0  ;;  %3222 = vst.msk [vmem:[#allocation2 + $0xd0] sm:$0xff] %vm226_vm3, %v2864_v61 }
 0x230   : > { %v3624_v62 = vmax.f32 %v3496_v31, %v3592_v33  ;;  %v3812_v39 = vsel %vm1486_vm8, %v3780_v23, %v3796_v12  ;;  %v3828_v48 = vsel %vm1486_vm8, %v3796_v12, %v3780_v23  ;;  %v3940_v28 = vsel %vm1617_vm10, %v3908_v18, %v3924_v16 }
 0x231   : > { %4872 = vmatmul.mubr.msk.bf16.gmra.mrb[68].mxu1 %vm226_vm3, %v2917_v59  ;;  %v3753_v32 = vmax.f32 %v3625_v3, %v3684_v49  ;;  %v3849_v46 = vsel %vm1520_vm9, %v3828_v48, 0.0  ;;  %v3956_v40 = vsel %vm1617_vm10, %v3924_v16, %v3908_v18  ;;  %v2354_v17 = vmax.f32 %v2290_v29, %v6668_v9  ;;  %v6713_v29 = vld [vmem:[#allocation2 + $0x90] sm:$0xff]  ;;  %v6721_v59 = vld [vmem:[#allocation2 + $0x98] sm:$0xff] }
 0x232   : > { %v3752_v14 = vmax.f32 %v3624_v62, %v3720_v27  ;;  %v3977_v6 = vsel %vm1651_vm11, %v3956_v40, 0.0  ;;  %v3307_v1 = vmax.f32 %v6393_v57, %v6467_v0  ;;  %v2355_v56 = vmax.f32 %v2291_v41, %v6677_v24 }
 0x233   : > { %v3881_v20 = vmax.f32 %v3753_v32, %v3849_v46  ;;  %v3370_v13 = vmax.f32 %v3306_v2, %v6516_v44  ;;  %v2164_v38 = vmax.f32 %v6429_v36, %v6518_v47  ;;  %v2374_v37 = vrot.slane %v2354_v17, 6 }
 0x234   : > { %v3880_v25 = vmax.f32 %v3752_v14, %v3812_v39  ;;  %v2502_v21 = vrot.slane %v2354_v17, 7  ;;  %v2630_v43 = vrot.slane %v2354_v17, 1  ;;  %v2390_v31 = vrot.slane %v2355_v56, 6 }
 0x235   : > { %v4009_v42 = vmax.f32 %v3881_v20, %v3977_v6  ;;  %v2518_v52 = vrot.slane %v2355_v56, 7  ;;  %v2646_v30 = vrot.slane %v2355_v56, 1  ;;  %v2758_v60 = vrot.slane %v2354_v17, 2 }
 0x236   : > { %v4008_v34 = vmax.f32 %v3880_v25, %v3940_v28  ;;  %v2774_v10 = vrot.slane %v2355_v56, 2  ;;  %v3371_v57 = vmax.f32 %v3307_v1, %v6547_v19  ;;  %v2406_v50 = vsel %vm1224_vm4, %v2374_v37, %v2390_v31 }
 0x237   : > { %v2422_v2 = vsel %vm1224_vm4, %v2390_v31, %v2374_v37  ;;  %v2534_v36 = vsel %vm1355_vm6, %v2502_v21, %v2518_v52  ;;  %v2550_v26 = vsel %vm1355_vm6, %v2518_v52, %v2502_v21  ;;  %v2483_v45 = vmax.f32 %v2355_v56, %v2406_v50  ;;  %v6745_v52 = vld [vmem:[#allocation2 + $0x110] sm:$0xff] }
 0x238   : > { %v4068_v23 = vpack.c.bf16 %v4009_v42, %v4008_v34  ;;  %v2450_v35 = vsel %vm1257_vm5, %v2422_v2, 0.0  ;;  %v2578_v11 = vsel %vm1388_vm7, %v2550_v26, 0.0  ;;  %v2662_v61 = vsel %vm1486_vm8, %v2630_v43, %v2646_v30 }
 0x239   : > { %v2482_v12 = vmax.f32 %v2354_v17, %v2450_v35  ;;  %v2678_v18 = vsel %vm1486_vm8, %v2646_v30, %v2630_v43  ;;  %v2790_v16 = vsel %vm1617_vm10, %v2758_v60, %v2774_v10  ;;  %v2611_v4 = vmax.f32 %v2483_v45, %v2534_v36 }
 0x23a   : > { %4893 = vmatprep.mubr.msk.bf16.mxu0 %vm226_vm3, %v4068_v23  ;;  %v2707_v54 = vsel %vm1520_vm9, %v2678_v18, 0.0  ;;  %v2806_v49 = vsel %vm1617_vm10, %v2774_v10, %v2758_v60  ;;  %v3434_v15 = vmax.f32 %v3370_v13, %v6630_v22  ;;  %v3435_v27 = vmax.f32 %v3371_v57, %v6639_v51  ;;  %v6754_v57 = vld [vmem:[#allocation2 + $0x118] sm:$0xff] }
 0x23b   : > { %v2610_v33 = vmax.f32 %v2482_v12, %v2578_v11  ;;  %v2835_v3 = vsel %vm1651_vm11, %v2806_v49, 0.0  ;;  %v2165_v62 = vmax.f32 %v6435_v58, %v6520_v63  ;;  %v2739_v39 = vmax.f32 %v2611_v4, %v2707_v54  ;;  %v6772_v4 = vpop.f32.mrb[16].mxu1  ;;  %v6774_v54 = vpop.f32.mrb[16].mxu0 }
 0x23c   : > { %v3498_v48 = vmax.f32 %v3434_v15, %v6713_v29  ;;  %v2228_v28 = vmax.f32 %v2164_v38, %v6597_v5  ;;  %v3308_v32 = vmax.f32 %v6465_v55, %v6516_v44  ;;  %v3499_v40 = vmax.f32 %v3435_v27, %v6721_v59  ;;  %7782 = vst [vmem:[#allocation4_spill] sm:$0xff] %v6774_v54  ;;  %v6776_v27 = vpop.f32.mrb[17].mxu1 }
 0x23d   : > { %v2738_v46 = vmax.f32 %v2610_v33, %v2662_v61  ;;  %v2229_v41 = vmax.f32 %v2165_v62, %v6604_v7  ;;  %v3309_v14 = vmax.f32 %v6467_v0, %v6547_v19  ;;  %v2867_v6 = vmax.f32 %v2739_v39, %v2835_v3  ;;  %v6778_v62 = vpop.f32.mrb[17].mxu0  ;;  %835 = vst.msk [vmem:[#allocation3 + $0x10] sm:$0xff] %vm832_vm12, %v6772_v4 }
 0x23e   : > { %v3525_v17 = vrot.slane %v3498_v48, 6  ;;  %v3653_v1 = vrot.slane %v3498_v48, 7  ;;  %v3781_v58 = vrot.slane %v3498_v48, 1  ;;  %v3541_v56 = vrot.slane %v3499_v40, 6  ;;  %7783 = vst [vmem:[#allocation5_spill] sm:$0xff] %v6778_v62  ;;  %833 = vst.msk [vmem:[#allocation3] sm:$0xff] %vm832_vm12, %v6776_v27 }
 0x23f   : > { %v2866_v20 = vmax.f32 %v2738_v46, %v2790_v16  ;;  %v3669_v13 = vrot.slane %v3499_v40, 7  ;;  %v3797_v25 = vrot.slane %v3499_v40, 1  ;;  %v3909_v38 = vrot.slane %v3498_v48, 2  ;;  %3225 = vst.msk [vmem:[#allocation2 + $0xe8] sm:$0xff] %vm226_vm3, %v2867_v6 }
 0x240   : > { %v3925_v37 = vrot.slane %v3499_v40, 2  ;;  %v2292_v55 = vmax.f32 %v2228_v28, %v6668_v9  ;;  %v2293_v21 = vmax.f32 %v2229_v41, %v6677_v24  ;;  %v3557_v0 = vsel %vm1224_vm4, %v3525_v17, %v3541_v56  ;;  %v6782_v41 = vpop.f32.mrb[18].mxu0 }
 0x241   : > { %v2918_v43 = vpack.c.bf16 %v2867_v6, %v2866_v20  ;;  %v3573_v42 = vsel %vm1224_vm4, %v3541_v56, %v3525_v17  ;;  %v3685_v31 = vsel %vm1355_vm6, %v3653_v1, %v3669_v13  ;;  %3224 = vst.msk [vmem:[#allocation2 + $0xe0] sm:$0xff] %vm226_vm3, %v2866_v20  ;;  %v3627_v34 = vmax.f32 %v3499_v40, %v3557_v0  ;;  %v6780_v40 = vpop.f32.mrb[18].mxu1  ;;  %v6787_v20 = vpop.f32.mrb[19].mxu0 }
 0x242   : > { %v3594_v30 = vsel %vm1257_vm5, %v3573_v42, 0.0  ;;  %v3701_v60 = vsel %vm1355_vm6, %v3669_v13, %v3653_v1  ;;  %v3813_v10 = vsel %vm1486_vm8, %v3781_v58, %v3797_v25  ;;  %v3829_v36 = vsel %vm1486_vm8, %v3797_v25, %v3781_v58  ;;  %7784 = vst [vmem:[#allocation6_spill] sm:$0xff] %v6782_v41  ;;  %v6785_v58 = vpop.f32.mrb[19].mxu1  ;;  %7785 = vst [vmem:[#allocation7_spill] sm:$0xff] %v6787_v20 }
 0x243   : > { %4875 = vmatprep.mubr.msk.bf16.mxu1 %vm226_vm3, %v2918_v43  ;;  %v3626_v50 = vmax.f32 %v3498_v48, %v3594_v30  ;;  %v3722_v2 = vsel %vm1388_vm7, %v3701_v60, 0.0  ;;  %v3941_v26 = vsel %vm1617_vm10, %v3909_v38, %v3925_v37  ;;  %v3755_v23 = vmax.f32 %v3627_v34, %v3685_v31  ;;  %836 = vst.msk [vmem:[#allocation3 + $0x18] sm:$0xff] %vm832_vm12, %v6780_v40 }
 0x244   : > { %v3851_v35 = vsel %vm1520_vm9, %v3829_v36, 0.0  ;;  %v3957_v45 = vsel %vm1617_vm10, %v3925_v37, %v3909_v38  ;;  %v2356_v11 = vmax.f32 %v2292_v55, %v6745_v52  ;;  %v2357_v18 = vmax.f32 %v2293_v21, %v6754_v57  ;;  %v6795_v37 = vpop.f32.mrb[20].mxu1  ;;  %v6797_v55 = vpop.f32.mrb[20].mxu0  ;;  %834 = vst.msk [vmem:[#allocation3 + $0x8] sm:$0xff] %vm832_vm12, %v6785_v58 }
 0x245   : > { %v3754_v12 = vmax.f32 %v3626_v50, %v3722_v2  ;;  %v3979_v61 = vsel %vm1651_vm11, %v3957_v45, 0.0  ;;  %v3372_v16 = vmax.f32 %v3308_v32, %v6630_v22  ;;  %v3883_v49 = vmax.f32 %v3755_v23, %v3851_v35  ;;  %7786 = vst [vmem:[#allocation8_spill] sm:$0xff] %v6797_v55  ;;  %v6805_v42 = vpop.f32.mrb[21].mxu1  ;;  %v6807_v31 = vpop.f32.mrb[21].mxu0  ;;  %v6823_v45 = vld [vmem:[#allocation2 + $0xa0] sm:$0xff]  ;;  %839 = vst.msk [vmem:[#allocation3 + $0x30] sm:$0xff] %vm832_vm12, %v6795_v37 }
 0x246   : > { %v2375_v15 = vrot.slane %v2356_v11, 6  ;;  %v2503_v33 = vrot.slane %v2356_v11, 7  ;;  %v2631_v3 = vrot.slane %v2356_v11, 1  ;;  %v2391_v48 = vrot.slane %v2357_v18, 6  ;;  %7787 = vst [vmem:[#allocation9_spill] sm:$0xff] %v6807_v31  ;;  %v6813_v50 = vpop.f32.mrb[22].mxu1 }
 0x247   : > { %v3882_v39 = vmax.f32 %v3754_v12, %v3813_v10  ;;  %v2519_v28 = vrot.slane %v2357_v18, 7  ;;  %v2647_v46 = vrot.slane %v2357_v18, 1  ;;  %v4011_v32 = vmax.f32 %v3883_v49, %v3979_v61  ;;  %v6815_v2 = vpop.f32.mrb[22].mxu0  ;;  %v6827_v12 = vpop.f32.mrb[23].mxu1  ;;  %837 = vst.msk [vmem:[#allocation3 + $0x20] sm:$0xff] %vm832_vm12, %v6805_v42  ;;  %840 = vst.msk [vmem:[#allocation3 + $0x38] sm:$0xff] %vm832_vm12, %v6813_v50 }
 0x248   : > { %v2759_v6 = vrot.slane %v2356_v11, 2  ;;  %v2775_v17 = vrot.slane %v2357_v18, 2  ;;  %v3373_v1 = vmax.f32 %v3309_v14, %v6639_v51  ;;  %v2407_v13 = vsel %vm1224_vm4, %v2375_v15, %v2391_v48  ;;  %7788 = vst [vmem:[#allocation10_spill] sm:$0xff] %v6815_v2  ;;  %v6829_v61 = vpop.f32.mrb[23].mxu0  ;;  %838 = vst.msk [vmem:[#allocation3 + $0x28] sm:$0xff] %vm832_vm12, %v6827_v12 }
 0x249   : > { %v4010_v56 = vmax.f32 %v3882_v39, %v3941_v26  ;;  %v2423_v25 = vsel %vm1224_vm4, %v2391_v48, %v2375_v15  ;;  %v2535_v38 = vsel %vm1355_vm6, %v2503_v33, %v2519_v28  ;;  %v2485_v21 = vmax.f32 %v2357_v18, %v2407_v13  ;;  %7789 = vst [vmem:[#allocation11_spill] sm:$0xff] %v6829_v61  ;;  %v6838_v39 = vpop.f32.mrb[24].mxu0 }
 0x24a   : > { %v2452_v14 = vsel %vm1257_vm5, %v2423_v25, 0.0  ;;  %v2551_v43 = vsel %vm1355_vm6, %v2519_v28, %v2503_v33  ;;  %v2663_v0 = vsel %vm1486_vm8, %v2631_v3, %v2647_v46  ;;  %v2679_v10 = vsel %vm1486_vm8, %v2647_v46, %v2631_v3  ;;  %v6836_v3 = vpop.f32.mrb[24].mxu1  ;;  %7790 = vst [vmem:[#allocation12_spill] sm:$0xff] %v6838_v39  ;;  %v6939_v39 = vld [vmem:[#allocation2 + $0xb0] sm:$0xff] }
 0x24b   : > { %v4069_v30 = vpack.c.bf16 %v4011_v32, %v4010_v56  ;;  %v2484_v34 = vmax.f32 %v2356_v11, %v2452_v14  ;;  %v2580_v60 = vsel %vm1388_vm7, %v2551_v43, 0.0  ;;  %v2613_v36 = vmax.f32 %v2485_v21, %v2535_v38  ;;  %v6825_v11 = vld [vmem:[#allocation2 + $0xa8] sm:$0xff]  ;;  %843 = vst.msk [vmem:[#allocation3 + $0x50] sm:$0xff] %vm832_vm12, %v6836_v3 }
 0x24c   : > { %v2709_v26 = vsel %vm1520_vm9, %v2679_v10, 0.0  ;;  %v2791_v23 = vsel %vm1617_vm10, %v2759_v6, %v2775_v17  ;;  %v2807_v35 = vsel %vm1617_vm10, %v2775_v17, %v2759_v6  ;;  %v3436_v15 = vmax.f32 %v3372_v16, %v6713_v29  ;;  %v6846_v6 = vpop.f32.mrb[25].mxu1  ;;  %v6848_v17 = vpop.f32.mrb[25].mxu0 }
 0x24d   : > { %4894 = vmatmul.mubr.msk.bf16.gmra.mrb[56].mxu0 %vm226_vm3, %v4069_v30  ;;  %v2612_v18 = vmax.f32 %v2484_v34, %v2580_v60  ;;  %v2837_v49 = vsel %vm1651_vm11, %v2807_v35, 0.0  ;;  %v3437_v33 = vmax.f32 %v3373_v1, %v6721_v59  ;;  %v2741_v48 = vmax.f32 %v2613_v36, %v2709_v26  ;;  %7791 = vst [vmem:[#allocation13_spill] sm:$0xff] %v6848_v17  ;;  %v6854_v25 = vpop.f32.mrb[26].mxu1 }
 0x24e   : > { %v2166_v28 = vmax.f32 %v6518_v47, %v6597_v5  ;;  %v2167_v46 = vmax.f32 %v6520_v63, %v6604_v7  ;;  %v3310_v32 = vmax.f32 %v6516_v44, %v6630_v22  ;;  %v3500_v1 = vmax.f32 %v3436_v15, %v6823_v45  ;;  %v6856_v47 = vpop.f32.mrb[26].mxu0  ;;  %v6863_v21 = vpop.f32.mrb[27].mxu1  ;;  %841 = vst.msk [vmem:[#allocation3 + $0x40] sm:$0xff] %vm832_vm12, %v6846_v6 }
 0x24f   : > { %v2740_v16 = vmax.f32 %v2612_v18, %v2663_v0  ;;  %v3501_v56 = vmax.f32 %v3437_v33, %v6825_v11  ;;  %v3311_v13 = vmax.f32 %v6547_v19, %v6639_v51  ;;  %7792 = vst [vmem:[#allocation14_spill] sm:$0xff] %v6856_v47  ;;  %v2869_v63 = vmax.f32 %v2741_v48, %v2837_v49  ;;  %v6865_v43 = vpop.f32.mrb[27].mxu0  ;;  %v6867_v60 = vpop.f32.mrb[28].mxu1 }
 0x250   : > { %v2230_v38 = vmax.f32 %v2166_v28, %v6668_v9  ;;  %v2231_v44 = vmax.f32 %v2167_v46, %v6677_v24  ;;  %v6861_v14 = vmax.f32 %v3310_v32, %v6713_v29  ;;  %7793 = vst [vmem:[#allocation15_spill] sm:$0xff] %v6865_v43  ;;  %v3526_v30 = vrot.slane %v3500_v1, 6  ;;  %v6869_v10 = vpop.f32.mrb[28].mxu0  ;;  %v6872_v49 = vpop.f32.mrb[29].mxu1  ;;  %844 = vst.msk [vmem:[#allocation3 + $0x58] sm:$0xff] %vm832_vm12, %v6854_v25 }
 0x251   : > { %v2868_v0 = vmax.f32 %v2740_v16, %v2791_v23  ;;  %v3542_v34 = vrot.slane %v3501_v56, 6  ;;  %v3654_v19 = vrot.slane %v3500_v1, 7  ;;  %7794 = vst [vmem:[#allocation16_spill] sm:$0xff] %v6869_v10  ;;  %v3670_v36 = vrot.slane %v3501_v56, 7  ;;  %3227 = vst.msk [vmem:[#allocation2 + $0xf8] sm:$0xff] %vm226_vm3, %v2869_v63  ;;  %v6874_v15 = vpop.f32.mrb[29].mxu0 }
 0x252   : > { %v3782_v26 = vrot.slane %v3500_v1, 1  ;;  %v3798_v35 = vrot.slane %v3501_v56, 1  ;;  %v3910_v18 = vrot.slane %v3500_v1, 2  ;;  %7795 = vst [vmem:[#allocation17_spill] sm:$0xff] %v6874_v15  ;;  %v3926_v28 = vrot.slane %v3501_v56, 2  ;;  %v6881_v46 = vpop.f32.mrb[30].mxu1 }
 0x253   : > { %v2919_v33 = vpack.c.bf16 %v2869_v63, %v2868_v0  ;;  %v3558_v23 = vsel %vm1224_vm4, %v3526_v30, %v3542_v34  ;;  %v3574_v48 = vsel %vm1224_vm4, %v3542_v34, %v3526_v30  ;;  %3226 = vst.msk [vmem:[#allocation2 + $0xf0] sm:$0xff] %vm226_vm3, %v2868_v0  ;;  %v6883_v32 = vpop.f32.mrb[30].mxu0  ;;  %v3686_v63 = vsel %vm1355_vm6, %v3654_v19, %v3670_v36  ;;  %v6891_v43 = vpop.f32.mrb[31].mxu1  ;;  %v1726_v8 = vld [vmem:[#allocation3 + $0x50] sm:$0xff] }
 0x254   : > { %7796 = vst [vmem:[#allocation18_spill] sm:$0xff] %v6883_v32  ;;  %v3596_v16 = vsel %vm1257_vm5, %v3574_v48, 0.0  ;;  %v3629_v10 = vmax.f32 %v3501_v56, %v3558_v23  ;;  %v3702_v15 = vsel %vm1355_vm6, %v3670_v36, %v3654_v19  ;;  %v6893_v30 = vpop.f32.mrb[31].mxu0  ;;  %v3814_v48 = vsel %vm1486_vm8, %v3782_v26, %v3798_v35  ;;  %v6902_v23 = vpop.f32.mrb[32].mxu1  ;;  %842 = vst.msk [vmem:[#allocation3 + $0x48] sm:$0xff] %vm832_vm12, %v6863_v21 }
 0x255   : > { %7797 = vst [vmem:[#allocation19_spill] sm:$0xff] %v6893_v30  ;;  %4876 = vmatmul.mubr.msk.bf16.gmra.mrb[72].mxu1 %vm226_vm3, %v2919_v33  ;;  %v3628_v0 = vmax.f32 %v3500_v1, %v3596_v16  ;;  %v3724_v34 = vsel %vm1388_vm7, %v3702_v15, 0.0  ;;  %v3830_v56 = vsel %vm1486_vm8, %v3798_v35, %v3782_v26  ;;  %v6904_v32 = vpop.f32.mrb[32].mxu0  ;;  %v3942_v1 = vsel %vm1617_vm10, %v3910_v18, %v3926_v28  ;;  %v6912_v33 = vld [vmem:[#allocation2 + $0x120] sm:$0xff]  ;;  %v6914_v16 = vld [vmem:[#allocation2 + $0x128] sm:$0xff]  ;;  %v6916_v30 = vpop.f32.mrb[33].mxu1 }
 0x256   : > { %7798 = vst [vmem:[#allocation20_spill] sm:$0xff] %v6904_v32  ;;  %v3757_v19 = vmax.f32 %v3629_v10, %v3686_v63  ;;  %v3853_v36 = vsel %vm1520_vm9, %v3830_v56, 0.0  ;;  %v3958_v15 = vsel %vm1617_vm10, %v3926_v28, %v3910_v18  ;;  %v6918_v26 = vpop.f32.mrb[33].mxu0  ;;  %v2294_v63 = vmax.f32 %v2230_v38, %v6745_v52  ;;  %v6924_v32 = vpop.f32.mrb[34].mxu1  ;;  %847 = vst.msk [vmem:[#allocation3 + $0x70] sm:$0xff] %vm832_vm12, %v6867_v60 }
 0x257   : > { %7799 = vst [vmem:[#allocation21_spill] sm:$0xff] %v6918_v26  ;;  %v3756_v35 = vmax.f32 %v3628_v0, %v3724_v34  ;;  %v3981_v10 = vsel %vm1651_vm11, %v3958_v15, 0.0  ;;  %v2295_v56 = vmax.f32 %v2231_v44, %v6754_v57  ;;  %v6926_v47 = vpop.f32.mrb[34].mxu0  ;;  %v3375_v28 = vmax.f32 %v3311_v13, %v6721_v59  ;;  %v6933_v34 = vpop.f32.mrb[35].mxu1  ;;  %845 = vst.msk [vmem:[#allocation3 + $0x60] sm:$0xff] %vm832_vm12, %v6872_v49 }
 0x258   : > { %7800 = vst [vmem:[#allocation22_spill] sm:$0xff] %v6926_v47  ;;  %v3885_v18 = vmax.f32 %v3757_v19, %v3853_v36  ;;  %v3438_v17 = vmax.f32 %v6861_v14, %v6823_v45  ;;  %v2168_v0 = vmax.f32 %v6597_v5, %v6668_v9  ;;  %v6935_v15 = vpop.f32.mrb[35].mxu0  ;;  %v2358_v44 = vmax.f32 %v2294_v63, %v6912_v33  ;;  %v6943_v19 = vpop.f32.mrb[36].mxu1 }
 0x259   : > { %7801 = vst [vmem:[#allocation23_spill] sm:$0xff] %v6935_v15  ;;  %v3884_v38 = vmax.f32 %v3756_v35, %v3814_v48  ;;  %v2359_v26 = vmax.f32 %v2295_v56, %v6914_v16  ;;  %v2169_v13 = vmax.f32 %v6604_v7, %v6677_v24  ;;  %v3439_v36 = vmax.f32 %v3375_v28, %v6825_v11  ;;  %v6952_v48 = vpop.f32.mrb[37].mxu1 }
 0x25a   : > { %v4013_v14 = vmax.f32 %v3885_v18, %v3981_v10  ;;  %v6947_v5 = vmax.f32 %v3438_v17, %v6939_v39  ;;  %v6950_v9 = vmax.f32 %v2168_v0, %v6745_v52  ;;  %v2376_v63 = vrot.slane %v2358_v44, 6  ;;  %v6954_v47 = vpop.f32.mrb[38].mxu1  ;;  %848 = vst.msk [vmem:[#allocation3 + $0x78] sm:$0xff] %vm832_vm12, %v6881_v46  ;;  %846 = vst.msk [vmem:[#allocation3 + $0x68] sm:$0xff] %vm832_vm12, %v6891_v43 }
 0x25b   : > { %v4012_v35 = vmax.f32 %v3884_v38, %v3942_v1  ;;  %v2392_v56 = vrot.slane %v2359_v26, 6  ;;  %v2504_v15 = vrot.slane %v2358_v44, 7  ;;  %v2520_v7 = vrot.slane %v2359_v26, 7  ;;  %v6956_v18 = vpop.f32.mrb[39].mxu1  ;;  %851 = vst.msk [vmem:[#allocation3 + $0x90] sm:$0xff] %vm832_vm12, %v6902_v23  ;;  %849 = vst.msk [vmem:[#allocation3 + $0x80] sm:$0xff] %vm832_vm12, %v6916_v30 }
 0x25c   : > { %v2632_v24 = vrot.slane %v2358_v44, 1  ;;  %v2648_v61 = vrot.slane %v2359_v26, 1  ;;  %v2760_v10 = vrot.slane %v2358_v44, 2  ;;  %v2776_v0 = vrot.slane %v2359_v26, 2  ;;  %v6962_v1 = vpop.f32.mrb[40].mxu1  ;;  %852 = vst.msk [vmem:[#allocation3 + $0x98] sm:$0xff] %vm832_vm12, %v6924_v32 }
 0x25d   : > { %v4070_v28 = vpack.c.bf16 %v4013_v14, %v4012_v35  ;;  %v2408_v17 = vsel %vm1224_vm4, %v2376_v63, %v2392_v56  ;;  %v2424_v52 = vsel %vm1224_vm4, %v2392_v56, %v2376_v63  ;;  %v2536_v31 = vsel %vm1355_vm6, %v2504_v15, %v2520_v7  ;;  %v6970_v14 = vpop.f32.mrb[41].mxu1  ;;  %850 = vst.msk [vmem:[#allocation3 + $0x88] sm:$0xff] %vm832_vm12, %v6933_v34 }
 0x25e   : > { %v2454_v38 = vsel %vm1257_vm5, %v2424_v52, 0.0  ;;  %v2487_v2 = vmax.f32 %v2359_v26, %v2408_v17  ;;  %v2552_v55 = vsel %vm1355_vm6, %v2520_v7, %v2504_v15  ;;  %7802 = vst [vmem:[#allocation24_spill] sm:$0xff] %v6970_v14  ;;  %v2664_v56 = vsel %vm1486_vm8, %v2632_v24, %v2648_v61  ;;  %v6979_v17 = vpop.f32.mrb[42].mxu1  ;;  %855 = vst.msk [vmem:[#allocation3 + $0xb0] sm:$0xff] %vm832_vm12, %v6943_v19 }
 0x25f   : > { %4897 = vmatprep.mubr.msk.bf16.mxu0 %vm226_vm3, %v4070_v28  ;;  %v2486_v35 = vmax.f32 %v2358_v44, %v2454_v38  ;;  %v2582_v63 = vsel %vm1388_vm7, %v2552_v55, 0.0  ;;  %v2680_v26 = vsel %vm1486_vm8, %v2648_v61, %v2632_v24  ;;  %7803 = vst [vmem:[#allocation25_spill] sm:$0xff] %v6979_v17  ;;  %v2792_v7 = vsel %vm1617_vm10, %v2760_v10, %v2776_v0  ;;  %v6987_v28 = vld [vmem:[#allocation2 + $0xb8] sm:$0xff]  ;;  %v6989_v55 = vpop.f32.mrb[43].mxu1 }
 0x260   : > { %v2615_v52 = vmax.f32 %v2487_v2, %v2536_v31  ;;  %v2711_v15 = vsel %vm1520_vm9, %v2680_v26, 0.0  ;;  %v2808_v44 = vsel %vm1617_vm10, %v2776_v0, %v2760_v10  ;;  %7804 = vst [vmem:[#allocation26_spill] sm:$0xff] %v6989_v55  ;;  %v3503_v24 = vmax.f32 %v3439_v36, %v6987_v28  ;;  %v6995_v2 = vpop.f32.mrb[44].mxu1  ;;  %853 = vst.msk [vmem:[#allocation3 + $0xa0] sm:$0xff] %vm832_vm12, %v6952_v48 }
 0x261   : > { %v2614_v38 = vmax.f32 %v2486_v35, %v2582_v63  ;;  %v2839_v61 = vsel %vm1651_vm11, %v2808_v44, 0.0  ;;  %v3527_v31 = vrot.slane %v6947_v5, 6  ;;  %7805 = vst [vmem:[#allocation27_spill] sm:$0xff] %v6995_v2  ;;  %v3655_v20 = vrot.slane %v6947_v5, 7  ;;  %v7000_v0 = vpop.f32.mrb[45].mxu1  ;;  %856 = vst.msk [vmem:[#allocation3 + $0xb8] sm:$0xff] %vm832_vm12, %v6954_v47 }
 0x262   : > { %v2743_v26 = vmax.f32 %v2615_v52, %v2711_v15  ;;  %v3783_v41 = vrot.slane %v6947_v5, 1  ;;  %v3911_v10 = vrot.slane %v6947_v5, 2  ;;  %v3543_v35 = vrot.slane %v3503_v24, 6  ;;  %v7002_v44 = vpop.f32.mrb[46].mxu1  ;;  %854 = vst.msk [vmem:[#allocation3 + $0xa8] sm:$0xff] %vm832_vm12, %v6956_v18  ;;  %859 = vst.msk [vmem:[#allocation3 + $0xd0] sm:$0xff] %vm832_vm12, %v6962_v1 }
 0x263   : > { %v2742_v62 = vmax.f32 %v2614_v38, %v2664_v56  ;;  %v3671_v63 = vrot.slane %v3503_v24, 7  ;;  %v3799_v54 = vrot.slane %v3503_v24, 1  ;;  %7806 = vst [vmem:[#allocation28_spill] sm:$0xff] %v7002_v44  ;;  %v3927_v55 = vrot.slane %v3503_v24, 2  ;;  %v7007_v15 = vpop.f32.mrb[47].mxu1  ;;  %861 = vst.msk [vmem:[#allocation3 + $0xe0] sm:$0xff] %vm832_vm12, %v7000_v0 }
 0x264   : > { %v2871_v36 = vmax.f32 %v2743_v26, %v2839_v61  ;;  %v2233_v17 = vmax.f32 %v2169_v13, %v6754_v57  ;;  %v2296_v52 = vmax.f32 %v6950_v9, %v6912_v33  ;;  %7807 = vst [vmem:[#allocation29_spill] sm:$0xff] %v7007_v15  ;;  %v3559_v14 = vsel %vm1224_vm4, %v3527_v31, %v3543_v35  ;;  %v7015_v44 = vpop.f32.mrb[48].mxu1 }
 0x265   : > { %v2870_v2 = vmax.f32 %v2742_v62, %v2792_v7  ;;  %v3575_v56 = vsel %vm1224_vm4, %v3543_v35, %v3527_v31  ;;  %v3687_v38 = vsel %vm1355_vm6, %v3655_v20, %v3671_v63  ;;  %7808 = vst [vmem:[#allocation30_spill] sm:$0xff] %v7015_v44  ;;  %v7017_v61 = vpop.f32.mrb[36].mxu0  ;;  %v3631_v13 = vmax.f32 %v3503_v24, %v3559_v14  ;;  %v7026_v7 = vld [vmem:[#allocation2 + $0x130] sm:$0xff]  ;;  %v7028_v31 = vpop.f32.mrb[49].mxu1  ;;  %v7825_v4 = vld [vmem:[#allocation24_spill] sm:$0xff] }
 0x266   : > { %7809 = vst [vmem:[#allocation31_spill] sm:$0xff] %v7017_v61  ;;  %3229 = vst.msk [vmem:[#allocation2 + $0x108] sm:$0xff] %vm226_vm3, %v2871_v36  ;;  %v3598_v57 = vsel %vm1257_vm5, %v3575_v56, 0.0  ;;  %v3703_v62 = vsel %vm1355_vm6, %v3671_v63, %v3655_v20  ;;  %v3815_v9 = vsel %vm1486_vm8, %v3783_v41, %v3799_v54  ;;  %v7030_v26 = vpop.f32.mrb[37].mxu0  ;;  %v3831_v20 = vsel %vm1486_vm8, %v3799_v54, %v3783_v41  ;;  %v7038_v24 = vpop.f32.mrb[50].mxu1  ;;  %v7826_v27 = vld [vmem:[#allocation25_spill] sm:$0xff] }
 0x267   : > { %7810 = vst [vmem:[#allocation32_spill] sm:$0xff] %v7028_v31  ;;  %7811 = vst [vmem:[#allocation33_spill] sm:$0xff] %v7030_v26  ;;  %v2920_v35 = vpack.c.bf16 %v2871_v36, %v2870_v2  ;;  %v3630_v44 = vmax.f32 %v6947_v5, %v3598_v57  ;;  %v3726_v14 = vsel %vm1388_vm7, %v3703_v62, 0.0  ;;  %v7040_v63 = vpop.f32.mrb[38].mxu0  ;;  %v3759_v56 = vmax.f32 %v3631_v13, %v3687_v38  ;;  %v7050_v57 = vpop.f32.mrb[51].mxu1  ;;  %v7827_v40 = vld [vmem:[#allocation26_spill] sm:$0xff] }
 0x268   : > { %3228 = vst.msk [vmem:[#allocation2 + $0x100] sm:$0xff] %vm226_vm3, %v2870_v2  ;;  %7812 = vst [vmem:[#allocation34_spill] sm:$0xff] %v7038_v24  ;;  %v3855_v31 = vsel %vm1520_vm9, %v3831_v20, 0.0  ;;  %v3943_v36 = vsel %vm1617_vm10, %v3911_v10, %v3927_v55  ;;  %v3959_v5 = vsel %vm1617_vm10, %v3927_v55, %v3911_v10  ;;  %v7048_v2 = vld [vmem:[#allocation2 + $0x138] sm:$0xff]  ;;  %v7052_v62 = vpop.f32.mrb[39].mxu0  ;;  %v2297_v38 = vmax.f32 %v2233_v17, %v6914_v16 }
 0x269   : > { %7813 = vst [vmem:[#allocation35_spill] sm:$0xff] %v7040_v63  ;;  %7814 = vst [vmem:[#allocation36_spill] sm:$0xff] %v7050_v57  ;;  %4879 = vmatprep.mubr.msk.bf16.mxu1 %vm226_vm3, %v2920_v35  ;;  %v3758_v54 = vmax.f32 %v3630_v44, %v3726_v14  ;;  %v3983_v41 = vsel %vm1651_vm11, %v3959_v5, 0.0  ;;  %v2360_v13 = vmax.f32 %v2296_v52, %v7026_v7  ;;  %v7828_v58 = vld [vmem:[#allocation27_spill] sm:$0xff] }
 0x26a   : > { %7815 = vst [vmem:[#allocation37_spill] sm:$0xff] %v7052_v62  ;;  %v3887_v20 = vmax.f32 %v3759_v56, %v3855_v31  ;;  %v3312_v55 = vmax.f32 %v6630_v22, %v6713_v29  ;;  %v3313_v10 = vmax.f32 %v6639_v51, %v6721_v59  ;;  %v3314_v57 = vmax.f32 %v6713_v29, %v6823_v45  ;;  %v7829_v37 = vld [vmem:[#allocation28_spill] sm:$0xff] }
 0x26b   : > { %v3886_v24 = vmax.f32 %v3758_v54, %v3815_v9  ;;  %v2361_v44 = vmax.f32 %v2297_v38, %v7048_v2  ;;  %v2377_v35 = vrot.slane %v2360_v13, 6  ;;  %v2505_v14 = vrot.slane %v2360_v13, 7  ;;  %857 = vst.msk [vmem:[#allocation3 + $0xc0] sm:$0xff] %vm832_vm12, %v7825_v4  ;;  %860 = vst.msk [vmem:[#allocation3 + $0xd8] sm:$0xff] %vm832_vm12, %v7826_v27  ;;  %v7830_v42 = vld [vmem:[#allocation29_spill] sm:$0xff] }
 0x26c   : > { %v4015_v5 = vmax.f32 %v3887_v20, %v3983_v41  ;;  %v2633_v62 = vrot.slane %v2360_v13, 1  ;;  %v2761_v17 = vrot.slane %v2360_v13, 2  ;;  %v3376_v52 = vmax.f32 %v3312_v55, %v6823_v45  ;;  %858 = vst.msk [vmem:[#allocation3 + $0xc8] sm:$0xff] %vm832_vm12, %v7827_v40  ;;  %863 = vst.msk [vmem:[#allocation3 + $0xf0] sm:$0xff] %vm832_vm12, %v7828_v58  ;;  %v7836_v27 = vld [vmem:[#allocation9_spill] sm:$0xff]  ;;  %v7837_v58 = vld [vmem:[#allocation10_spill] sm:$0xff] }
 0x26d   : > { %v4014_v31 = vmax.f32 %v3886_v24, %v3943_v36  ;;  %v2393_v56 = vrot.slane %v2361_v44, 6  ;;  %v2521_v63 = vrot.slane %v2361_v44, 7  ;;  %v2649_v22 = vrot.slane %v2361_v44, 1  ;;  %864 = vst.msk [vmem:[#allocation3 + $0xf8] sm:$0xff] %vm832_vm12, %v7829_v37  ;;  %862 = vst.msk [vmem:[#allocation3 + $0xe8] sm:$0xff] %vm832_vm12, %v7830_v42  ;;  %v7838_v42 = vld [vmem:[#allocation11_spill] sm:$0xff] }
 0x26e   : > { %v2777_v26 = vrot.slane %v2361_v44, 2  ;;  %v3377_v51 = vmax.f32 %v3313_v10, %v6825_v11  ;;  %v3440_v61 = vmax.f32 %v3376_v52, %v6939_v39  ;;  %v3315_v29 = vmax.f32 %v6721_v59, %v6825_v11 }
 0x26f   : > { %v4071_v9 = vpack.c.bf16 %v4015_v5, %v4014_v31  ;;  %v2409_v54 = vsel %vm1224_vm4, %v2377_v35, %v2393_v56  ;;  %v2425_v41 = vsel %vm1224_vm4, %v2393_v56, %v2377_v35  ;;  %v2537_v24 = vsel %vm1355_vm6, %v2505_v14, %v2521_v63  ;;  %v7095_v31 = vld [vmem:[#allocation2 + $0xc0] sm:$0xff] }
 0x270   : > { %v2456_v36 = vsel %vm1257_vm5, %v2425_v41, 0.0  ;;  %v2489_v38 = vmax.f32 %v2361_v44, %v2409_v54  ;;  %v2553_v20 = vsel %vm1355_vm6, %v2521_v63, %v2505_v14  ;;  %v2665_v59 = vsel %vm1486_vm8, %v2633_v62, %v2649_v22 }
 0x271   : > { %4898 = vmatmul.mubr.msk.bf16.gmra.mrb[60].mxu0 %vm226_vm3, %v4071_v9  ;;  %v2488_v55 = vmax.f32 %v2360_v13, %v2456_v36  ;;  %v2584_v10 = vsel %vm1388_vm7, %v2553_v20, 0.0  ;;  %v2681_v35 = vsel %vm1486_vm8, %v2649_v22, %v2633_v62  ;;  %v2793_v5 = vsel %vm1617_vm10, %v2761_v17, %v2777_v26  ;;  %v7099_v9 = vld [vmem:[#allocation2 + $0xc8] sm:$0xff] }
 0x272   : > { %v2617_v52 = vmax.f32 %v2489_v38, %v2537_v24  ;;  %v2713_v44 = vsel %vm1520_vm9, %v2681_v35, 0.0  ;;  %v2809_v63 = vsel %vm1617_vm10, %v2777_v26, %v2761_v17  ;;  %v3441_v14 = vmax.f32 %v3377_v51, %v6987_v28 }
 0x273   : > { %v2616_v13 = vmax.f32 %v2488_v55, %v2584_v10  ;;  %v2841_v56 = vsel %vm1651_vm11, %v2809_v63, 0.0  ;;  %v3504_v62 = vmax.f32 %v3440_v61, %v7095_v31  ;;  %v3378_v41 = vmax.f32 %v3314_v57, %v6939_v39 }
 0x274   : > { %v2745_v22 = vmax.f32 %v2617_v52, %v2713_v44  ;;  %v3505_v54 = vmax.f32 %v3441_v14, %v7099_v9  ;;  %v3379_v24 = vmax.f32 %v3315_v29, %v6987_v28  ;;  %v3316_v61 = vmax.f32 %v6823_v45, %v6939_v39 }
 0x275   : > { %v2744_v26 = vmax.f32 %v2616_v13, %v2665_v59  ;;  %v3528_v17 = vrot.slane %v3504_v62, 6  ;;  %v3656_v51 = vrot.slane %v3504_v62, 7  ;;  %v3784_v36 = vrot.slane %v3504_v62, 1 }
 0x276   : > { %v2873_v38 = vmax.f32 %v2745_v22, %v2841_v56  ;;  %v3544_v20 = vrot.slane %v3505_v54, 6  ;;  %v3672_v55 = vrot.slane %v3505_v54, 7  ;;  %v3800_v10 = vrot.slane %v3505_v54, 1 }
 0x277   : > { %v2872_v35 = vmax.f32 %v2744_v26, %v2793_v5  ;;  %v3912_v63 = vrot.slane %v3504_v62, 2  ;;  %v3928_v15 = vrot.slane %v3505_v54, 2  ;;  %v3442_v52 = vmax.f32 %v3378_v41, %v7095_v31 }
 0x278   : > { %3231 = vst.msk [vmem:[#allocation2 + $0x118] sm:$0xff] %vm226_vm3, %v2873_v38  ;;  %v3560_v57 = vsel %vm1224_vm4, %v3528_v17, %v3544_v20  ;;  %v3576_v29 = vsel %vm1224_vm4, %v3544_v20, %v3528_v17  ;;  %v3704_v59 = vsel %vm1355_vm6, %v3672_v55, %v3656_v51  ;;  %v3688_v14 = vsel %vm1355_vm6, %v3656_v51, %v3672_v55  ;;  %v7136_v20 = vld [vmem:[#allocation2 + $0xd0] sm:$0xff] }
 0x279   : > { %v2921_v44 = vpack.c.bf16 %v2873_v38, %v2872_v35  ;;  %3230 = vst.msk [vmem:[#allocation2 + $0x110] sm:$0xff] %vm226_vm3, %v2872_v35  ;;  %v3600_v5 = vsel %vm1257_vm5, %v3576_v29, 0.0  ;;  %v3633_v45 = vmax.f32 %v3505_v54, %v3560_v57  ;;  %v7120_v13 = vpop.f32.mrb[52].mxu1  ;;  %v3728_v22 = vsel %vm1388_vm7, %v3704_v59, 0.0  ;;  %v7144_v57 = vld [vmem:[#allocation2 + $0xd8] sm:$0xff] }
 0x27a   : > { %7816 = vst [vmem:[#allocation38_spill] sm:$0xff] %v7120_v13  ;;  %v3632_v56 = vmax.f32 %v3504_v62, %v3600_v5  ;;  %v3816_v26 = vsel %vm1486_vm8, %v3784_v36, %v3800_v10  ;;  %v3832_v41 = vsel %vm1486_vm8, %v3800_v10, %v3784_v36  ;;  %v7128_v17 = vpop.f32.mrb[53].mxu1  ;;  %v3944_v51 = vsel %vm1617_vm10, %v3912_v63, %v3928_v15 }
 0x27b   : > { %7817 = vst [vmem:[#allocation39_spill] sm:$0xff] %v7128_v17  ;;  %4880 = vmatmul.mubr.msk.bf16.gmra.mrb[76].mxu1 %vm226_vm3, %v2921_v44  ;;  %v3761_v54 = vmax.f32 %v3633_v45, %v3688_v14  ;;  %v3960_v62 = vsel %vm1617_vm10, %v3928_v15, %v3912_v63  ;;  %v3443_v38 = vmax.f32 %v3379_v24, %v7099_v9  ;;  %v7138_v55 = vpop.f32.mrb[54].mxu1  ;;  %v3857_v36 = vsel %vm1520_vm9, %v3832_v41, 0.0 }
 0x27c   : > { %7818 = vst [vmem:[#allocation40_spill] sm:$0xff] %v7138_v55  ;;  %v3760_v35 = vmax.f32 %v3632_v56, %v3728_v22  ;;  %v3985_v10 = vsel %vm1651_vm11, %v3960_v62, 0.0  ;;  %v3506_v29 = vmax.f32 %v3442_v52, %v7136_v20  ;;  %v7147_v59 = vpop.f32.mrb[55].mxu1  ;;  %v3317_v63 = vmax.f32 %v6825_v11, %v6987_v28 }
 0x27d   : > { %7819 = vst [vmem:[#allocation41_spill] sm:$0xff] %v7147_v59  ;;  %v3889_v15 = vmax.f32 %v3761_v54, %v3857_v36  ;;  %v3507_v24 = vmax.f32 %v3443_v38, %v7144_v57  ;;  %v3380_v44 = vmax.f32 %v3316_v61, %v7095_v31  ;;  %v3318_v54 = vmax.f32 %v6939_v39, %v7095_v31 }
 0x27e   : > { %v3888_v5 = vmax.f32 %v3760_v35, %v3816_v26  ;;  %v3529_v45 = vrot.slane %v3506_v29, 6  ;;  %v3657_v14 = vrot.slane %v3506_v29, 7  ;;  %v3785_v56 = vrot.slane %v3506_v29, 1 }
 0x27f   : > { %v4017_v22 = vmax.f32 %v3889_v15, %v3985_v10  ;;  %v3545_v41 = vrot.slane %v3507_v24, 6  ;;  %v3673_v62 = vrot.slane %v3507_v24, 7  ;;  %v3801_v55 = vrot.slane %v3507_v24, 1 }
 0x280   : > { %v4016_v17 = vmax.f32 %v3888_v5, %v3944_v51  ;;  %v3913_v52 = vrot.slane %v3506_v29, 2  ;;  %v3929_v13 = vrot.slane %v3507_v24, 2  ;;  %v3381_v26 = vmax.f32 %v3317_v63, %v7099_v9 }
 0x281   : > { %v3561_v38 = vsel %vm1224_vm4, %v3529_v45, %v3545_v41  ;;  %v3577_v11 = vsel %vm1224_vm4, %v3545_v41, %v3529_v45  ;;  %v3705_v61 = vsel %vm1355_vm6, %v3673_v62, %v3657_v14  ;;  %v3689_v10 = vsel %vm1355_vm6, %v3657_v14, %v3673_v62  ;;  %v7181_v62 = vld [vmem:[#allocation2 + $0xe0] sm:$0xff] }
 0x282   : > { %v4072_v35 = vpack.c.bf16 %v4017_v22, %v4016_v17  ;;  %v3602_v51 = vsel %vm1257_vm5, %v3577_v11, 0.0  ;;  %v3635_v36 = vmax.f32 %v3507_v24, %v3561_v38  ;;  %v3730_v15 = vsel %vm1388_vm7, %v3705_v61, 0.0  ;;  %v7187_v11 = vld [vmem:[#allocation2 + $0xe8] sm:$0xff] }
 0x283   : > { %v3634_v39 = vmax.f32 %v3506_v29, %v3602_v51  ;;  %v3817_v5 = vsel %vm1486_vm8, %v3785_v56, %v3801_v55  ;;  %v3833_v45 = vsel %vm1486_vm8, %v3801_v55, %v3785_v56  ;;  %v3945_v63 = vsel %vm1617_vm10, %v3913_v52, %v3929_v13 }
 0x284   : > { %4901 = vmatprep.mubr.msk.bf16.mxu0 %vm226_vm3, %v4072_v35  ;;  %v3763_v17 = vmax.f32 %v3635_v36, %v3689_v10  ;;  %v3961_v24 = vsel %vm1617_vm10, %v3929_v13, %v3913_v52  ;;  %v3444_v29 = vmax.f32 %v3380_v44, %v7136_v20  ;;  %v3859_v22 = vsel %vm1520_vm9, %v3833_v45, 0.0 }
 0x285   : > { %v3762_v14 = vmax.f32 %v3634_v39, %v3730_v15  ;;  %v3445_v41 = vmax.f32 %v3381_v26, %v7144_v57  ;;  %v3319_v55 = vmax.f32 %v6987_v28, %v7099_v9  ;;  %v3987_v38 = vsel %vm1651_vm11, %v3961_v24, 0.0 }
 0x286   : > { %v3891_v56 = vmax.f32 %v3763_v17, %v3859_v22  ;;  %v3508_v13 = vmax.f32 %v3444_v29, %v7181_v62  ;;  %v3382_v44 = vmax.f32 %v3318_v54, %v7136_v20  ;;  %v3320_v35 = vmax.f32 %v7095_v31, %v7136_v20 }
 0x287   : > { %v3890_v52 = vmax.f32 %v3762_v14, %v3817_v5  ;;  %v3509_v61 = vmax.f32 %v3445_v41, %v7187_v11  ;;  %v3383_v26 = vmax.f32 %v3319_v55, %v7144_v57  ;;  %v3321_v5 = vmax.f32 %v7099_v9, %v7144_v57 }
 0x288   : > { %v4019_v51 = vmax.f32 %v3891_v56, %v3987_v38  ;;  %v3530_v28 = vrot.slane %v3508_v13, 6  ;;  %v3658_v36 = vrot.slane %v3508_v13, 7  ;;  %v3786_v10 = vrot.slane %v3508_v13, 1 }
 0x289   : > { %v4018_v39 = vmax.f32 %v3890_v52, %v3945_v63  ;;  %v3546_v15 = vrot.slane %v3509_v61, 6  ;;  %v3674_v45 = vrot.slane %v3509_v61, 7  ;;  %v3802_v17 = vrot.slane %v3509_v61, 1 }
 0x28a   : > { %v3914_v24 = vrot.slane %v3508_v13, 2  ;;  %v3930_v29 = vrot.slane %v3509_v61, 2  ;;  %v3446_v54 = vmax.f32 %v3382_v44, %v7181_v62  ;;  %v3447_v41 = vmax.f32 %v3383_v26, %v7187_v11 }
 0x28b   : > { %v4073_v14 = vpack.c.bf16 %v4019_v51, %v4018_v39  ;;  %v3562_v22 = vsel %vm1224_vm4, %v3530_v28, %v3546_v15  ;;  %v3578_v31 = vsel %vm1224_vm4, %v3546_v15, %v3530_v28  ;;  %v3690_v56 = vsel %vm1355_vm6, %v3658_v36, %v3674_v45  ;;  %v7218_v51 = vld [vmem:[#allocation2 + $0xf0] sm:$0xff]  ;;  %v7226_v15 = vld [vmem:[#allocation2 + $0xf8] sm:$0xff] }
 0x28c   : > { %v3604_v63 = vsel %vm1257_vm5, %v3578_v31, 0.0  ;;  %v3637_v55 = vmax.f32 %v3509_v61, %v3562_v22  ;;  %v3706_v38 = vsel %vm1355_vm6, %v3674_v45, %v3658_v36  ;;  %v7209_v9 = vpop.f32.mrb[40].mxu0  ;;  %v3818_v26 = vsel %vm1486_vm8, %v3786_v10, %v3802_v17 }
 0x28d   : > { %7820 = vst [vmem:[#allocation42_spill] sm:$0xff] %v7209_v9  ;;  %4902 = vmatmul.mubr.msk.bf16.gmra.mrb[64].mxu0 %vm226_vm3, %v4073_v14  ;;  %v3636_v44 = vmax.f32 %v3508_v13, %v3604_v63  ;;  %v3732_v52 = vsel %vm1388_vm7, %v3706_v38, 0.0  ;;  %v3834_v61 = vsel %vm1486_vm8, %v3802_v17, %v3786_v10  ;;  %v7220_v28 = vpop.f32.mrb[41].mxu0  ;;  %v3946_v36 = vsel %vm1617_vm10, %v3914_v24, %v3930_v29 }
 0x28e   : > { %7821 = vst [vmem:[#allocation43_spill] sm:$0xff] %v7220_v28  ;;  %v3765_v39 = vmax.f32 %v3637_v55, %v3690_v56  ;;  %v3962_v13 = vsel %vm1617_vm10, %v3930_v29, %v3914_v24  ;;  %v3510_v45 = vmax.f32 %v3446_v54, %v7218_v51  ;;  %v7229_v14 = vpop.f32.mrb[42].mxu0  ;;  %v3861_v10 = vsel %vm1520_vm9, %v3834_v61, 0.0 }
 0x28f   : > { %7822 = vst [vmem:[#allocation44_spill] sm:$0xff] %v7229_v14  ;;  %v3764_v22 = vmax.f32 %v3636_v44, %v3732_v52  ;;  %v3989_v17 = vsel %vm1651_vm11, %v3962_v13, 0.0  ;;  %v3511_v31 = vmax.f32 %v3447_v41, %v7226_v15  ;;  %v7236_v63 = vpop.f32.mrb[43].mxu0  ;;  %v3384_v61 = vmax.f32 %v3320_v35, %v7181_v62 }
 0x290   : > { %v3893_v55 = vmax.f32 %v3765_v39, %v3861_v10  ;;  %v3531_v56 = vrot.slane %v3510_v45, 6  ;;  %v3659_v24 = vrot.slane %v3510_v45, 7  ;;  %v3787_v29 = vrot.slane %v3510_v45, 1 }
 0x291   : > { %v3892_v38 = vmax.f32 %v3764_v22, %v3818_v26  ;;  %v3547_v59 = vrot.slane %v3511_v31, 6  ;;  %v3675_v54 = vrot.slane %v3511_v31, 7  ;;  %v3803_v28 = vrot.slane %v3511_v31, 1 }
 0x292   : > { %v4021_v14 = vmax.f32 %v3893_v55, %v3989_v17  ;;  %v3915_v44 = vrot.slane %v3510_v45, 2  ;;  %v3931_v52 = vrot.slane %v3511_v31, 2  ;;  %v3385_v39 = vmax.f32 %v3321_v5, %v7187_v11 }
 0x293   : > { %v4020_v9 = vmax.f32 %v3892_v38, %v3946_v36  ;;  %v3563_v13 = vsel %vm1224_vm4, %v3531_v56, %v3547_v59  ;;  %v3579_v41 = vsel %vm1224_vm4, %v3547_v59, %v3531_v56  ;;  %v3691_v10 = vsel %vm1355_vm6, %v3659_v24, %v3675_v54 }
 0x294   : > { %v3606_v26 = vsel %vm1257_vm5, %v3579_v41, 0.0  ;;  %v3639_v22 = vmax.f32 %v3511_v31, %v3563_v13  ;;  %v3707_v17 = vsel %vm1355_vm6, %v3675_v54, %v3659_v24  ;;  %v3819_v55 = vsel %vm1486_vm8, %v3787_v29, %v3803_v28  ;;  %v7267_v54 = vld [vmem:[#allocation2 + $0x100] sm:$0xff]  ;;  %v7269_v13 = vld [vmem:[#allocation2 + $0x108] sm:$0xff] }
 0x295   : > { %v4074_v35 = vpack.c.bf16 %v4021_v14, %v4020_v9  ;;  %v3638_v36 = vmax.f32 %v3510_v45, %v3606_v26  ;;  %v3835_v59 = vsel %vm1486_vm8, %v3803_v28, %v3787_v29  ;;  %v3734_v5 = vsel %vm1388_vm7, %v3707_v17, 0.0 }
 0x296   : > { %v3767_v56 = vmax.f32 %v3639_v22, %v3691_v10  ;;  %v3863_v31 = vsel %vm1520_vm9, %v3835_v59, 0.0  ;;  %v3963_v38 = vsel %vm1617_vm10, %v3931_v52, %v3915_v44  ;;  %v3947_v45 = vsel %vm1617_vm10, %v3915_v44, %v3931_v52 }
 0x297   : > { %4905 = vmatprep.mubr.msk.bf16.mxu0 %vm226_vm3, %v4074_v35  ;;  %v3766_v9 = vmax.f32 %v3638_v36, %v3734_v5  ;;  %v3448_v14 = vmax.f32 %v3384_v61, %v7218_v51  ;;  %v3449_v28 = vmax.f32 %v3385_v39, %v7226_v15  ;;  %v3991_v29 = vsel %vm1651_vm11, %v3963_v38, 0.0 }
 0x298   : > { %v3895_v24 = vmax.f32 %v3767_v56, %v3863_v31  ;;  %v3322_v41 = vmax.f32 %v7136_v20, %v7181_v62  ;;  %v3323_v26 = vmax.f32 %v7144_v57, %v7187_v11  ;;  %v3324_v61 = vmax.f32 %v7181_v62, %v7218_v51 }
 0x299   : > { %v3894_v22 = vmax.f32 %v3766_v9, %v3819_v55  ;;  %v3512_v44 = vmax.f32 %v3448_v14, %v7267_v54  ;;  %v3513_v52 = vmax.f32 %v3449_v28, %v7269_v13  ;;  %v3325_v35 = vmax.f32 %v7187_v11, %v7226_v15 }
 0x29a   : > { %v4023_v39 = vmax.f32 %v3895_v24, %v3991_v29  ;;  %v3386_v10 = vmax.f32 %v3322_v41, %v7218_v51  ;;  %v3387_v17 = vmax.f32 %v3323_v26, %v7226_v15  ;;  %v3388_v24 = vmax.f32 %v3324_v61, %v7267_v54 }
 0x29b   : > { %v4022_v20 = vmax.f32 %v3894_v22, %v3947_v45  ;;  %v3532_v36 = vrot.slane %v3512_v44, 6  ;;  %v3548_v59 = vrot.slane %v3513_v52, 6  ;;  %v3660_v57 = vrot.slane %v3512_v44, 7 }
 0x29c   : > { %v3676_v55 = vrot.slane %v3513_v52, 7  ;;  %v3788_v5 = vrot.slane %v3512_v44, 1  ;;  %v3804_v56 = vrot.slane %v3513_v52, 1  ;;  %v3916_v31 = vrot.slane %v3512_v44, 2 }
 0x29d   : > { %v4075_v38 = vpack.c.bf16 %v4023_v39, %v4022_v20  ;;  %v3564_v62 = vsel %vm1224_vm4, %v3532_v36, %v3548_v59  ;;  %v3580_v9 = vsel %vm1224_vm4, %v3548_v59, %v3532_v36  ;;  %v3932_v14 = vrot.slane %v3513_v52, 2 }
 0x29e   : > { %v3608_v28 = vsel %vm1257_vm5, %v3580_v9, 0.0  ;;  %v3641_v11 = vmax.f32 %v3513_v52, %v3564_v62  ;;  %v3708_v45 = vsel %vm1355_vm6, %v3676_v55, %v3660_v57  ;;  %v7292_v29 = vpop.f32.mrb[56].mxu1  ;;  %v3692_v26 = vsel %vm1355_vm6, %v3660_v57, %v3676_v55  ;;  %v3482_v52 = vld [vmem:[#allocation2 + $0x110] sm:$0xff] }
 0x29f   : > { %4906 = vmatmul.mubr.msk.bf16.gmra.mrb[68].mxu0 %vm226_vm3, %v4075_v38  ;;  %v3640_v41 = vmax.f32 %v3512_v44, %v3608_v28  ;;  %v3736_v22 = vsel %vm1388_vm7, %v3708_v45, 0.0  ;;  %v3836_v39 = vsel %vm1486_vm8, %v3804_v56, %v3788_v5  ;;  %v7301_v20 = vpop.f32.mrb[57].mxu1  ;;  %v3820_v61 = vsel %vm1486_vm8, %v3788_v5, %v3804_v56  ;;  %v3483_v28 = vld [vmem:[#allocation2 + $0x118] sm:$0xff] }
 0x2a0   : > { %v3769_v36 = vmax.f32 %v3641_v11, %v3692_v26  ;;  %v3865_v59 = vsel %vm1520_vm9, %v3836_v39, 0.0  ;;  %v3964_v44 = vsel %vm1617_vm10, %v3932_v14, %v3916_v31  ;;  %v7309_v57 = vpop.f32.mrb[58].mxu1  ;;  %v3948_v38 = vsel %vm1617_vm10, %v3916_v31, %v3932_v14 }
 0x2a1   : > { %7823 = vst [vmem:[#allocation45_spill] sm:$0xff] %v7309_v57  ;;  %v3768_v55 = vmax.f32 %v3640_v41, %v3736_v22  ;;  %v3450_v62 = vmax.f32 %v3386_v10, %v7267_v54  ;;  %v3451_v9 = vmax.f32 %v3387_v17, %v7269_v13  ;;  %v7315_v11 = vpop.f32.mrb[59].mxu1  ;;  %v3993_v56 = vsel %vm1651_vm11, %v3964_v44, 0.0 }
 0x2a2   : > { %7824 = vst [vmem:[#allocation46_spill] sm:$0xff] %v7315_v11  ;;  %v3897_v5 = vmax.f32 %v3769_v36, %v3865_v59  ;;  %v3389_v45 = vmax.f32 %v3325_v35, %v7269_v13  ;;  %v3452_v26 = vmax.f32 %v3388_v24, %v3482_v52  ;;  %v3326_v31 = vmax.f32 %v7218_v51, %v7267_v54 }
 0x2a3   : > { %v3896_v39 = vmax.f32 %v3768_v55, %v3820_v61  ;;  %v3514_v57 = vmax.f32 %v3450_v62, %v3482_v52  ;;  %v3515_v41 = vmax.f32 %v3451_v9, %v3483_v28  ;;  %v3327_v22 = vmax.f32 %v7226_v15, %v7269_v13 }
 0x2a4   : > { %v4025_v14 = vmax.f32 %v3897_v5, %v3993_v56  ;;  %v3453_v10 = vmax.f32 %v3389_v45, %v3483_v28  ;;  %v7323_v17 = vmax.f32 %v3452_v26, %v6912_v33 }
 0x2a5   : > { %v4024_v36 = vmax.f32 %v3896_v39, %v3948_v38  ;;  %v3533_v59 = vrot.slane %v3514_v57, 6  ;;  %v3549_v44 = vrot.slane %v3515_v41, 6  ;;  %v3661_v11 = vrot.slane %v3514_v57, 7 }
 0x2a6   : > { %v3677_v35 = vrot.slane %v3515_v41, 7  ;;  %v3789_v24 = vrot.slane %v3514_v57, 1  ;;  %v3805_v61 = vrot.slane %v3515_v41, 1  ;;  %v3917_v55 = vrot.slane %v3514_v57, 2 }
 0x2a7   : > { %v4076_v62 = vpack.c.bf16 %v4025_v14, %v4024_v36  ;;  %v3565_v51 = vsel %vm1224_vm4, %v3533_v59, %v3549_v44  ;;  %v3581_v54 = vsel %vm1224_vm4, %v3549_v44, %v3533_v59  ;;  %v3933_v9 = vrot.slane %v3515_v41, 2 }
 0x2a8   : > { %v3610_v5 = vsel %vm1257_vm5, %v3581_v54, 0.0  ;;  %v3643_v15 = vmax.f32 %v3515_v41, %v3565_v51  ;;  %v3709_v13 = vsel %vm1355_vm6, %v3677_v35, %v3661_v11  ;;  %v3390_v38 = vmax.f32 %v3326_v31, %v3482_v52 }
 0x2a9   : > { %4909 = vmatprep.mubr.msk.bf16.mxu0 %vm226_vm3, %v4076_v62  ;;  %v3642_v56 = vmax.f32 %v3514_v57, %v3610_v5  ;;  %v3693_v45 = vsel %vm1355_vm6, %v3661_v11, %v3677_v35  ;;  %v3738_v26 = vsel %vm1388_vm7, %v3709_v13, 0.0  ;;  %v3837_v39 = vsel %vm1486_vm8, %v3805_v61, %v3789_v24 }
 0x2aa   : > { %v3771_v14 = vmax.f32 %v3643_v15, %v3693_v45  ;;  %v3821_v41 = vsel %vm1486_vm8, %v3789_v24, %v3805_v61  ;;  %v3867_v36 = vsel %vm1520_vm9, %v3837_v39, 0.0  ;;  %v3965_v52 = vsel %vm1617_vm10, %v3933_v9, %v3917_v55 }
 0x2ab   : > { %v3770_v57 = vmax.f32 %v3642_v56, %v3738_v26  ;;  %v3949_v11 = vsel %vm1617_vm10, %v3917_v55, %v3933_v9  ;;  %v7351_v31 = vmax.f32 %v3453_v10, %v6914_v16  ;;  %v3534_v59 = vrot.slane %v7323_v17, 6 }
 0x2ac   : > { %v3899_v44 = vmax.f32 %v3771_v14, %v3867_v36  ;;  %v3995_v35 = vsel %vm1651_vm11, %v3965_v52, 0.0  ;;  %v3662_v24 = vrot.slane %v7323_v17, 7  ;;  %v3790_v61 = vrot.slane %v7323_v17, 1 }
 0x2ad   : > { %v3898_v62 = vmax.f32 %v3770_v57, %v3821_v41  ;;  %v3550_v51 = vrot.slane %v7351_v31, 6  ;;  %v3678_v54 = vrot.slane %v7351_v31, 7  ;;  %v3806_v55 = vrot.slane %v7351_v31, 1 }
 0x2ae   : > { %v4027_v9 = vmax.f32 %v3899_v44, %v3995_v35  ;;  %v3918_v10 = vrot.slane %v7323_v17, 2  ;;  %v3934_v5 = vrot.slane %v7351_v31, 2  ;;  %v3391_v15 = vmax.f32 %v3327_v22, %v3483_v28 }
 0x2af   : > { %v4026_v13 = vmax.f32 %v3898_v62, %v3949_v11  ;;  %v3566_v56 = vsel %vm1224_vm4, %v3534_v59, %v3550_v51  ;;  %v3582_v45 = vsel %vm1224_vm4, %v3550_v51, %v3534_v59  ;;  %v3454_v26 = vmax.f32 %v3390_v38, %v6912_v33 }
 0x2b0   : > { %v3612_v39 = vsel %vm1257_vm5, %v3582_v45, 0.0  ;;  %v3645_v14 = vmax.f32 %v7351_v31, %v3566_v56  ;;  %v3710_v41 = vsel %vm1355_vm6, %v3678_v54, %v3662_v24  ;;  %v7373_v36 = vpop.f32.mrb[44].mxu0  ;;  %v3694_v52 = vsel %vm1355_vm6, %v3662_v24, %v3678_v54 }
 0x2b1   : > { %v4077_v28 = vpack.c.bf16 %v4027_v9, %v4026_v13  ;;  %v3644_v22 = vmax.f32 %v7323_v17, %v3612_v39  ;;  %v3838_v57 = vsel %vm1486_vm8, %v3806_v55, %v3790_v61  ;;  %v7380_v33 = vpop.f32.mrb[45].mxu0  ;;  %v3740_v38 = vsel %vm1388_vm7, %v3710_v41, 0.0 }
 0x2b2   : > { %v3773_v11 = vmax.f32 %v3645_v14, %v3694_v52  ;;  %v3966_v59 = vsel %vm1617_vm10, %v3934_v5, %v3918_v10  ;;  %v7390_v44 = vpop.f32.mrb[46].mxu0  ;;  %v3869_v24 = vsel %vm1520_vm9, %v3838_v57, 0.0  ;;  %v3455_v62 = vmax.f32 %v3391_v15, %v6914_v16  ;;  %v1719_v15 = vld [vmem:[#allocation3 + $0x18] sm:$0xff]  ;;  %v7832_v57 = vld [vmem:[#allocation5_spill] sm:$0xff] }
 0x2b3   : > { %4910 = vmatmul.mubr.msk.bf16.gmra.mrb[72].mxu0 %vm226_vm3, %v4077_v28  ;;  %v3772_v35 = vmax.f32 %v3644_v22, %v3740_v38  ;;  %v7397_v51 = vmax.f32 %v3454_v26, %v7026_v7  ;;  %v7399_v54 = vpop.f32.mrb[47].mxu0  ;;  %v3822_v9 = vsel %vm1486_vm8, %v3790_v61, %v3806_v55  ;;  %v3997_v45 = vsel %vm1651_vm11, %v3966_v59, 0.0  ;;  %v7831_v22 = vld [vmem:[#allocation4_spill] sm:$0xff]  ;;  %v1722_v59 = vld [vmem:[#allocation3 + $0x30] sm:$0xff] }
 0x2b4   : > { %v3901_v13 = vmax.f32 %v3773_v11, %v3869_v24  ;;  %v7406_v39 = vmax.f32 %v3455_v62, %v7048_v2  ;;  %v3950_v50 = vsel %vm1617_vm10, %v3918_v10, %v3934_v5  ;;  %v1718_v10 = vld [vmem:[#allocation3 + $0x10] sm:$0xff]  ;;  %v1716_v5 = vld [vmem:[#allocation3] sm:$0xff]  ;;  %v1717_v11 = vld [vmem:[#allocation3 + $0x8] sm:$0xff] }
 0x2b5   : > { %v3900_v56 = vmax.f32 %v3772_v35, %v3822_v9  ;;  %v3535_v14 = vrot.slane %v7397_v51, 6  ;;  %v3663_v3 = vrot.slane %v7397_v51, 7  ;;  %v3791_v6 = vrot.slane %v7397_v51, 1  ;;  %v1720_v35 = vld [vmem:[#allocation3 + $0x20] sm:$0xff]  ;;  %v7833_v62 = vld [vmem:[#allocation6_spill] sm:$0xff]  ;;  %v7834_v9 = vld [vmem:[#allocation7_spill] sm:$0xff] }
 0x2b6   : > { %v4029_v12 = vmax.f32 %v3901_v13, %v3997_v45  ;;  %v3551_v47 = vrot.slane %v7406_v39, 6  ;;  %v3679_v21 = vrot.slane %v7406_v39, 7  ;;  %v3807_v43 = vrot.slane %v7406_v39, 1 }
 0x2b7   : > { %v4028_v25 = vmax.f32 %v3900_v56, %v3950_v50  ;;  %v3919_v60 = vrot.slane %v7397_v51, 2  ;;  %v3935_v49 = vrot.slane %v7406_v39, 2  ;;  %v1980_v52 = vadd.f32 %v7831_v22, %v1718_v10  ;;  %v7835_v56 = vld [vmem:[#allocation8_spill] sm:$0xff]  ;;  %v7848_v22 = vld [vmem:[#allocation21_spill] sm:$0xff] }
 0x2b8   : > { %v3567_v32 = vsel %vm1224_vm4, %v3535_v14, %v3551_v47  ;;  %v3583_v30 = vsel %vm1224_vm4, %v3551_v47, %v3535_v14  ;;  %v3695_v34 = vsel %vm1355_vm6, %v3663_v3, %v3679_v21  ;;  %v3711_v19 = vsel %vm1355_vm6, %v3679_v21, %v3663_v3  ;;  %v1721_v14 = vld [vmem:[#allocation3 + $0x28] sm:$0xff]  ;;  %v1727_v3 = vld [vmem:[#allocation3 + $0x58] sm:$0xff]  ;;  %v7839_v47 = vld [vmem:[#allocation12_spill] sm:$0xff] }
 0x2b9   : > { %v4078_v46 = vpack.c.bf16 %v4029_v12, %v4028_v25  ;;  %v3614_v23 = vsel %vm1257_vm5, %v3583_v30, 0.0  ;;  %v3647_v16 = vmax.f32 %v7406_v39, %v3567_v32  ;;  %v3742_v1 = vsel %vm1388_vm7, %v3711_v19, 0.0  ;;  %v1723_v39 = vld [vmem:[#allocation3 + $0x38] sm:$0xff]  ;;  %2012 = vst.msk [vmem:[#allocation3 + $0x10] sm:$0xff] %vm832_vm12, %v1980_v52  ;;  %v1724_v12 = vld [vmem:[#allocation3 + $0x40] sm:$0xff]  ;;  %v1730_v32 = vld [vmem:[#allocation3 + $0x70] sm:$0xff] }
 0x2ba   : > { %v7497_v48 = vpop.f32.mrb[60].mxu1  ;;  %v3646_v18 = vmax.f32 %v7397_v51, %v3614_v23  ;;  %v3823_v0 = vsel %vm1486_vm8, %v3791_v6, %v3807_v43  ;;  %v3839_v7 = vsel %vm1486_vm8, %v3807_v43, %v3791_v6  ;;  %v3951_v61 = vsel %vm1617_vm10, %v3919_v60, %v3935_v49  ;;  %v1725_v6 = vld [vmem:[#allocation3 + $0x48] sm:$0xff]  ;;  %v1728_v30 = vld [vmem:[#allocation3 + $0x60] sm:$0xff]  ;;  %v1731_v23 = vld [vmem:[#allocation3 + $0x78] sm:$0xff] }
 0x2bb   : > { %4913 = vmatprep.mubr.msk.bf16.mxu0 %vm226_vm3, %v4078_v46  ;;  %v7507_v2 = vpop.f32.mrb[61].mxu1  ;;  %v3775_v17 = vmax.f32 %v3647_v16, %v3695_v34  ;;  %v3871_v31 = vsel %vm1520_vm9, %v3839_v7, 0.0  ;;  %v3967_v55 = vsel %vm1617_vm10, %v3935_v49, %v3919_v60  ;;  %v1978_v38 = vadd.f32 %v7832_v57, %v1716_v5  ;;  %v7840_v43 = vld [vmem:[#allocation13_spill] sm:$0xff]  ;;  %v7841_v49 = vld [vmem:[#allocation14_spill] sm:$0xff]  ;;  %v7842_v34 = vld [vmem:[#allocation15_spill] sm:$0xff] }
 0x2bc   : > { %v7515_v26 = vpop.f32.mrb[62].mxu1  ;;  %v3774_v41 = vmax.f32 %v3646_v18, %v3742_v1  ;;  %v3999_v28 = vsel %vm1651_vm11, %v3967_v55, 0.0  ;;  %v1981_v51 = vadd.f32 %v7833_v62, %v1719_v15  ;;  %v1979_v13 = vadd.f32 %v7834_v9, %v1717_v11  ;;  %v7843_v18 = vld [vmem:[#allocation16_spill] sm:$0xff]  ;;  %v7846_v5 = vld [vmem:[#allocation19_spill] sm:$0xff]  ;;  %v1738_v11 = vld [vmem:[#allocation3 + $0xb0] sm:$0xff] }
 0x2bd   : > { %v7521_v24 = vpop.f32.mrb[63].mxu1  ;;  %v3903_v53 = vmax.f32 %v3775_v17, %v3871_v31  ;;  %v1984_v45 = vadd.f32 %v7835_v56, %v1722_v59  ;;  %2010 = vst.msk [vmem:[#allocation3] sm:$0xff] %vm832_vm12, %v1978_v38  ;;  %v1982_v40 = vadd.f32 %v7836_v27, %v1720_v35  ;;  %v1985_v37 = vadd.f32 %v7837_v58, %v1723_v39  ;;  %v1729_v17 = vld [vmem:[#allocation3 + $0x68] sm:$0xff]  ;;  %v1734_v31 = vld [vmem:[#allocation3 + $0x90] sm:$0xff]  ;;  %v1732_v55 = vld [vmem:[#allocation3 + $0x80] sm:$0xff] }
 0x2be   : > { %v3902_v4 = vmax.f32 %v3774_v41, %v3823_v0  ;;  %v1983_v50 = vadd.f32 %v7838_v42, %v1721_v14  ;;  %2013 = vst.msk [vmem:[#allocation3 + $0x18] sm:$0xff] %vm832_vm12, %v1981_v51  ;;  %2011 = vst.msk [vmem:[#allocation3 + $0x8] sm:$0xff] %vm832_vm12, %v1979_v13  ;;  %v1988_v21 = vadd.f32 %v7839_v47, %v1726_v8  ;;  %v7844_v0 = vld [vmem:[#allocation17_spill] sm:$0xff]  ;;  %v7847_v41 = vld [vmem:[#allocation20_spill] sm:$0xff] }
 0x2bf   : > { %v4031_v25 = vmax.f32 %v3903_v53, %v3999_v28  ;;  %2016 = vst.msk [vmem:[#allocation3 + $0x30] sm:$0xff] %vm832_vm12, %v1984_v45  ;;  %v1986_v60 = vadd.f32 %v7840_v43, %v1724_v12  ;;  %v1989_v46 = vadd.f32 %v7841_v49, %v1727_v3  ;;  %2014 = vst.msk [vmem:[#allocation3 + $0x20] sm:$0xff] %vm832_vm12, %v1982_v40  ;;  %v1735_v57 = vld [vmem:[#allocation3 + $0x98] sm:$0xff]  ;;  %v1733_v38 = vld [vmem:[#allocation3 + $0x88] sm:$0xff] }
 0x2c0   : > { %v4030_v16 = vmax.f32 %v3902_v4, %v3951_v61  ;;  %2017 = vst.msk [vmem:[#allocation3 + $0x38] sm:$0xff] %vm832_vm12, %v1985_v37  ;;  %2015 = vst.msk [vmem:[#allocation3 + $0x28] sm:$0xff] %vm832_vm12, %v1983_v50  ;;  %v1987_v19 = vadd.f32 %v7842_v34, %v1725_v6  ;;  %v1992_v1 = vadd.f32 %v7843_v18, %v1730_v32  ;;  %v7845_v61 = vld [vmem:[#allocation18_spill] sm:$0xff]  ;;  %v7850_v62 = vld [vmem:[#allocation23_spill] sm:$0xff] }
 0x2c1   : > { %v1990_v7 = vadd.f32 %v7844_v0, %v1728_v30  ;;  %2020 = vst.msk [vmem:[#allocation3 + $0x50] sm:$0xff] %vm832_vm12, %v1988_v21  ;;  %2018 = vst.msk [vmem:[#allocation3 + $0x40] sm:$0xff] %vm832_vm12, %v1986_v60  ;;  %v1993_v10 = vadd.f32 %v7845_v61, %v1731_v23  ;;  %v1991_v15 = vadd.f32 %v7846_v5, %v1729_v17  ;;  %v7849_v35 = vld [vmem:[#allocation22_spill] sm:$0xff]  ;;  %v7851_v9 = vld [vmem:[#allocation31_spill] sm:$0xff] }
 0x2c2   : > { %2021 = vst.msk [vmem:[#allocation3 + $0x58] sm:$0xff] %vm832_vm12, %v1989_v46  ;;  %v1996_v28 = vadd.f32 %v7847_v41, %v1734_v31  ;;  %v1994_v52 = vadd.f32 %v7848_v22, %v1732_v55  ;;  %v4079_v59 = vpack.c.bf16 %v4031_v25, %v4030_v16  ;;  %2019 = vst.msk [vmem:[#allocation3 + $0x48] sm:$0xff] %vm832_vm12, %v1987_v19  ;;  %v1736_v56 = vld [vmem:[#allocation3 + $0xa0] sm:$0xff]  ;;  %v1739_v45 = vld [vmem:[#allocation3 + $0xb8] sm:$0xff] }
 0x2c3   : > { %2024 = vst.msk [vmem:[#allocation3 + $0x70] sm:$0xff] %vm832_vm12, %v1992_v1  ;;  %2022 = vst.msk [vmem:[#allocation3 + $0x60] sm:$0xff] %vm832_vm12, %v1990_v7  ;;  %v1997_v53 = vadd.f32 %v7849_v35, %v1735_v57  ;;  %v1995_v51 = vadd.f32 %v7850_v62, %v1733_v38  ;;  %v2000_v13 = vadd.f32 %v7851_v9, %v1738_v11  ;;  %v1737_v39 = vld [vmem:[#allocation3 + $0xa8] sm:$0xff]  ;;  %v7853_v4 = vld [vmem:[#allocation35_spill] sm:$0xff] }
 0x2c4   : > { %2025 = vst.msk [vmem:[#allocation3 + $0x78] sm:$0xff] %vm832_vm12, %v1993_v10  ;;  %2023 = vst.msk [vmem:[#allocation3 + $0x68] sm:$0xff] %vm832_vm12, %v1991_v15  ;;  %v7852_v14 = vld [vmem:[#allocation33_spill] sm:$0xff]  ;;  %v2001_v27 = vadd.f32 %v7853_v4, %v1739_v45  ;;  %v1742_v37 = vld [vmem:[#allocation3 + $0xd0] sm:$0xff]  ;;  %4914 = vmatmul.mubr.msk.bf16.gmra.mrb[76].mxu0 %vm226_vm3, %v4079_v59 }
 0x2c5   : > { %2028 = vst.msk [vmem:[#allocation3 + $0x90] sm:$0xff] %vm832_vm12, %v1996_v28  ;;  %2026 = vst.msk [vmem:[#allocation3 + $0x80] sm:$0xff] %vm832_vm12, %v1994_v52  ;;  %v1998_v8 = vadd.f32 %v7852_v14, %v1736_v56  ;;  %v7854_v40 = vld [vmem:[#allocation37_spill] sm:$0xff]  ;;  %v1740_v42 = vld [vmem:[#allocation3 + $0xc0] sm:$0xff] }
 0x2c6   : > { %v1999_v58 = vadd.f32 %v7854_v40, %v1737_v39  ;;  %v1743_v50 = vld [vmem:[#allocation3 + $0xd8] sm:$0xff]  ;;  %2029 = vst.msk [vmem:[#allocation3 + $0x98] sm:$0xff] %vm832_vm12, %v1997_v53  ;;  %2027 = vst.msk [vmem:[#allocation3 + $0x88] sm:$0xff] %vm832_vm12, %v1995_v51  ;;  %v7855_v12 = vld [vmem:[#allocation42_spill] sm:$0xff] }
 0x2c7   : > { %2032 = vst.msk [vmem:[#allocation3 + $0xb0] sm:$0xff] %vm832_vm12, %v2000_v13  ;;  %v2004_v3 = vadd.f32 %v7855_v12, %v1742_v37  ;;  %v7856_v6 = vld [vmem:[#allocation43_spill] sm:$0xff]  ;;  %v7857_v47 = vld [vmem:[#allocation44_spill] sm:$0xff]  ;;  %v1741_v43 = vld [vmem:[#allocation3 + $0xc8] sm:$0xff] }
 0x2c8   : > { %v2002_v25 = vadd.f32 %v7856_v6, %v1740_v42  ;;  %v2005_v21 = vadd.f32 %v7857_v47, %v1743_v50  ;;  %v1746_v60 = vld [vmem:[#allocation3 + $0xf0] sm:$0xff]  ;;  %v1744_v49 = vld [vmem:[#allocation3 + $0xe0] sm:$0xff]  ;;  %2030 = vst.msk [vmem:[#allocation3 + $0xa0] sm:$0xff] %vm832_vm12, %v1998_v8  ;;  %2033 = vst.msk [vmem:[#allocation3 + $0xb8] sm:$0xff] %vm832_vm12, %v2001_v27  ;;  %v2003_v30 = vadd.f32 %v7236_v63, %v1741_v43 }
 0x2c9   : > { %v2876_v46 = vld [vmem:[#allocation3 + $0x10] sm:$0xff]  ;;  %v2874_v32 = vld [vmem:[#allocation3] sm:$0xff]  ;;  %2031 = vst.msk [vmem:[#allocation3 + $0xa8] sm:$0xff] %vm832_vm12, %v1999_v58  ;;  %v2008_v23 = vadd.f32 %v7373_v36, %v1746_v60  ;;  %v2006_v16 = vadd.f32 %v7380_v33, %v1744_v49  ;;  %v1747_v34 = vld [vmem:[#allocation3 + $0xf8] sm:$0xff] }
 0x2ca   : > { %v7858_v19 = vld [vmem:[#allocation30_spill] sm:$0xff]  ;;  %v7859_v1 = vld [vmem:[#allocation32_spill] sm:$0xff]  ;;  %v2877_v7 = vld [vmem:[#allocation3 + $0x18] sm:$0xff]  ;;  %2036 = vst.msk [vmem:[#allocation3 + $0xd0] sm:$0xff] %vm832_vm12, %v2004_v3  ;;  %v2009_v63 = vadd.f32 %v7390_v44, %v1747_v34 }
 0x2cb   : > { %v3138_v18 = vadd.f32 %v7858_v19, %v2876_v46  ;;  %v3136_v0 = vadd.f32 %v7859_v1, %v2874_v32  ;;  %v2875_v17 = vld [vmem:[#allocation3 + $0x8] sm:$0xff]  ;;  %v2880_v31 = vld [vmem:[#allocation3 + $0x30] sm:$0xff]  ;;  %2034 = vst.msk [vmem:[#allocation3 + $0xc0] sm:$0xff] %vm832_vm12, %v2002_v25  ;;  %2037 = vst.msk [vmem:[#allocation3 + $0xd8] sm:$0xff] %vm832_vm12, %v2005_v21 }
 0x2cc   : > { %v7860_v55 = vld [vmem:[#allocation34_spill] sm:$0xff]  ;;  %v7861_v61 = vld [vmem:[#allocation36_spill] sm:$0xff]  ;;  %v2881_v41 = vld [vmem:[#allocation3 + $0x38] sm:$0xff]  ;;  %2035 = vst.msk [vmem:[#allocation3 + $0xc8] sm:$0xff] %vm832_vm12, %v2003_v30 }
 0x2cd   : > { %v3139_v36 = vadd.f32 %v7860_v55, %v2877_v7  ;;  %v3137_v33 = vadd.f32 %v7861_v61, %v2875_v17  ;;  %v7862_v10 = vld [vmem:[#allocation38_spill] sm:$0xff]  ;;  %v2878_v15 = vld [vmem:[#allocation3 + $0x20] sm:$0xff]  ;;  %v2879_v28 = vld [vmem:[#allocation3 + $0x28] sm:$0xff]  ;;  %2040 = vst.msk [vmem:[#allocation3 + $0xf0] sm:$0xff] %vm832_vm12, %v2008_v23 }
 0x2ce   : > { %v3142_v5 = vadd.f32 %v7862_v10, %v2880_v31  ;;  %2038 = vst.msk [vmem:[#allocation3 + $0xe0] sm:$0xff] %vm832_vm12, %v2006_v16  ;;  %3170 = vst.msk [vmem:[#allocation3 + $0x10] sm:$0xff] %vm832_vm12, %v3138_v18  ;;  %v7863_v44 = vld [vmem:[#allocation39_spill] sm:$0xff]  ;;  %v7864_v52 = vld [vmem:[#allocation40_spill] sm:$0xff] }
 0x2cf   : > { %3168 = vst.msk [vmem:[#allocation3] sm:$0xff] %vm832_vm12, %v3136_v0  ;;  %v3140_v22 = vadd.f32 %v7863_v44, %v2878_v15  ;;  %v3143_v57 = vadd.f32 %v7864_v52, %v2881_v41  ;;  %v7865_v38 = vld [vmem:[#allocation41_spill] sm:$0xff]  ;;  %v2884_v59 = vld [vmem:[#allocation3 + $0x50] sm:$0xff]  ;;  %v2882_v35 = vld [vmem:[#allocation3 + $0x40] sm:$0xff] }
 0x2d0   : > { %v3141_v11 = vadd.f32 %v7865_v38, %v2879_v28  ;;  %v2885_v53 = vld [vmem:[#allocation3 + $0x58] sm:$0xff]  ;;  %2041 = vst.msk [vmem:[#allocation3 + $0xf8] sm:$0xff] %vm832_vm12, %v2009_v63  ;;  %3171 = vst.msk [vmem:[#allocation3 + $0x18] sm:$0xff] %vm832_vm12, %v3139_v36  ;;  %v3146_v62 = vadd.f32 %v7292_v29, %v2884_v59  ;;  %v3144_v51 = vadd.f32 %v7301_v20, %v2882_v35  ;;  %v7866_v9 = vld [vmem:[#allocation45_spill] sm:$0xff] }
 0x2d1   : > { %3169 = vst.msk [vmem:[#allocation3 + $0x8] sm:$0xff] %vm832_vm12, %v3137_v33  ;;  %3174 = vst.msk [vmem:[#allocation3 + $0x30] sm:$0xff] %vm832_vm12, %v3142_v5  ;;  %v3147_v13 = vadd.f32 %v7866_v9, %v2885_v53  ;;  %v2883_v56 = vld [vmem:[#allocation3 + $0x48] sm:$0xff]  ;;  %v2888_v45 = vld [vmem:[#allocation3 + $0x70] sm:$0xff] }
 0x2d2   : > { %v2886_v39 = vld [vmem:[#allocation3 + $0x60] sm:$0xff]  ;;  %3172 = vst.msk [vmem:[#allocation3 + $0x20] sm:$0xff] %vm832_vm12, %v3140_v22  ;;  %3175 = vst.msk [vmem:[#allocation3 + $0x38] sm:$0xff] %vm832_vm12, %v3143_v57  ;;  %v7867_v14 = vld [vmem:[#allocation46_spill] sm:$0xff]  ;;  %v3150_v4 = vadd.f32 %v7497_v48, %v2888_v45 }
 0x2d3   : > { %3173 = vst.msk [vmem:[#allocation3 + $0x28] sm:$0xff] %vm832_vm12, %v3141_v11  ;;  %v3145_v8 = vadd.f32 %v7867_v14, %v2883_v56  ;;  %v3148_v27 = vadd.f32 %v7507_v2, %v2886_v39  ;;  %v1745_v29 = vld [vmem:[#allocation3 + $0xe8] sm:$0xff]  ;;  %v2889_v40 = vld [vmem:[#allocation3 + $0x78] sm:$0xff]  ;;  %3178 = vst.msk [vmem:[#allocation3 + $0x50] sm:$0xff] %vm832_vm12, %v3146_v62 }
 0x2d4   : > { %v2887_v20 = vld [vmem:[#allocation3 + $0x68] sm:$0xff]  ;;  %3176 = vst.msk [vmem:[#allocation3 + $0x40] sm:$0xff] %vm832_vm12, %v3144_v51  ;;  %3179 = vst.msk [vmem:[#allocation3 + $0x58] sm:$0xff] %vm832_vm12, %v3147_v13  ;;  %v2007_v58 = vadd.f32 %v7399_v54, %v1745_v29  ;;  %v3151_v37 = vadd.f32 %v7515_v26, %v2889_v40  ;;  %v7625_v43 = vld [vmem:[%s7780_s4] ss:$0 sm:$0xff] }
 0x2d5   : > { %v3149_v42 = vadd.f32 %v7521_v24, %v2887_v20  ;;  %3177 = vst.msk [vmem:[#allocation3 + $0x48] sm:$0xff] %vm832_vm12, %v3145_v8  ;;  %3182 = vst.msk [vmem:[#allocation3 + $0x70] sm:$0xff] %vm832_vm12, %v3150_v4  ;;  %v4034_v48 = vld [vmem:[#allocation3 + $0x10] sm:$0xff]  ;;  %v2890_v32 = vld [vmem:[#allocation3 + $0x80] sm:$0xff] }
 0x2d6   : > { %3180 = vst.msk [vmem:[#allocation3 + $0x60] sm:$0xff] %vm832_vm12, %v3148_v27  ;;  %2039 = vst.msk [vmem:[#allocation3 + $0xe8] sm:$0xff] %vm832_vm12, %v2007_v58  ;;  %v4887_v2 = vpop.f32.mrb[48].mxu0  ;;  %v4032_v54 = vld [vmem:[#allocation3] sm:$0xff]  ;;  %v2892_v60 = vld [vmem:[#allocation3 + $0x90] sm:$0xff] }
 0x2d7   : > { %3183 = vst.msk [vmem:[#allocation3 + $0x78] sm:$0xff] %vm832_vm12, %v3151_v37  ;;  %3181 = vst.msk [vmem:[#allocation3 + $0x68] sm:$0xff] %vm832_vm12, %v3149_v42  ;;  %v4296_v50 = vadd.f32 %v4887_v2, %v4034_v48  ;;  %v4167_v26 = vpop.f32.mrb[49].mxu0  ;;  %v4035_v24 = vld [vmem:[#allocation3 + $0x18] sm:$0xff]  ;;  %v2891_v7 = vld [vmem:[#allocation3 + $0x88] sm:$0xff] }
 0x2d8   : > { %v4294_v12 = vadd.f32 %v4167_v26, %v4032_v54  ;;  %v4888_v3 = vpop.f32.mrb[50].mxu0  ;;  %v4033_v25 = vld [vmem:[#allocation3 + $0x8] sm:$0xff]  ;;  %v2893_v34 = vld [vmem:[#allocation3 + $0x98] sm:$0xff]  ;;  %v4038_v28 = vld [vmem:[#allocation3 + $0x30] sm:$0xff] }
 0x2d9   : > { %4328 = vst.msk [vmem:[#allocation3 + $0x10] sm:$0xff] %vm832_vm12, %v4296_v50  ;;  %v4297_v6 = vadd.f32 %v4888_v3, %v4035_v24  ;;  %v4170_v47 = vpop.f32.mrb[51].mxu0  ;;  %v4036_v52 = vld [vmem:[#allocation3 + $0x20] sm:$0xff]  ;;  %v4039_v11 = vld [vmem:[#allocation3 + $0x38] sm:$0xff]  ;;  %v2896_v13 = vld [vmem:[#allocation3 + $0xb0] sm:$0xff] }
 0x2da   : > { %4326 = vst.msk [vmem:[#allocation3] sm:$0xff] %vm832_vm12, %v4294_v12  ;;  %v4295_v21 = vadd.f32 %v4170_v47, %v4033_v25  ;;  %v4037_v53 = vld [vmem:[#allocation3 + $0x28] sm:$0xff]  ;;  %v2894_v8 = vld [vmem:[#allocation3 + $0xa0] sm:$0xff]  ;;  %v2897_v20 = vld [vmem:[#allocation3 + $0xb8] sm:$0xff] }
 0x2db   : > { %4329 = vst.msk [vmem:[#allocation3 + $0x18] sm:$0xff] %vm832_vm12, %v4297_v6  ;;  %v2895_v50 = vld [vmem:[#allocation3 + $0xa8] sm:$0xff]  ;;  %v4042_v25 = vld [vmem:[#allocation3 + $0x50] sm:$0xff] }
 0x2dc   : > { %4327 = vst.msk [vmem:[#allocation3 + $0x8] sm:$0xff] %vm832_vm12, %v4295_v21 }
 0x2de   : > { %v4869_v49 = vpop.f32.mrb[64].mxu1 }
 0x2df   : > { %v3154_v46 = vadd.f32 %v4869_v49, %v2892_v60  ;;  %v3073_v30 = vpop.f32.mrb[65].mxu1  ;;  %v4040_v60 = vld [vmem:[#allocation3 + $0x40] sm:$0xff] }
 0x2e0   : > { %v4360_v23 = vld [vmem:[#allocation3 + $0x10] sm:$0xff]  ;;  %v3152_v16 = vadd.f32 %v3073_v30, %v2890_v32  ;;  %v4870_v19 = vpop.f32.mrb[66].mxu1  ;;  %v4043_v32 = vld [vmem:[#allocation3 + $0x58] sm:$0xff] }
 0x2e1   : > { %v4399_v18 = vadd.f32 %v7625_v43, %v4360_v23  ;;  %3186 = vst.msk [vmem:[#allocation3 + $0x90] sm:$0xff] %vm832_vm12, %v3154_v46  ;;  %v4358_v1 = vld [vmem:[#allocation3] sm:$0xff]  ;;  %v3155_v0 = vadd.f32 %v4870_v19, %v2893_v34  ;;  %v3076_v17 = vpop.f32.mrb[67].mxu1 }
 0x2e2   : > { %v4397_v31 = vadd.f32 %v7625_v43, %v4358_v1  ;;  %3184 = vst.msk [vmem:[#allocation3 + $0x80] sm:$0xff] %vm832_vm12, %v3152_v16  ;;  %v4361_v63 = vld [vmem:[#allocation3 + $0x18] sm:$0xff]  ;;  %v3153_v55 = vadd.f32 %v3076_v17, %v2891_v7  ;;  %v4041_v16 = vld [vmem:[#allocation3 + $0x48] sm:$0xff]  ;;  %v2898_v7 = vld [vmem:[#allocation3 + $0xc0] sm:$0xff] }
 0x2e3   : > { %v4431_v36 = vmax.f32 %v4399_v18, 0.0  ;;  %v4400_v61 = vadd.f32 %v7625_v43, %v4361_v63  ;;  %3187 = vst.msk [vmem:[#allocation3 + $0x98] sm:$0xff] %vm832_vm12, %v3155_v0  ;;  %v4359_v33 = vld [vmem:[#allocation3 + $0x8] sm:$0xff]  ;;  %v2900_v18 = vld [vmem:[#allocation3 + $0xd0] sm:$0xff] }
 0x2e4   : > { %v4429_v10 = vmax.f32 %v4397_v31, 0.0  ;;  %v4398_v5 = vadd.f32 %v7625_v43, %v4359_v33  ;;  %3185 = vst.msk [vmem:[#allocation3 + $0x88] sm:$0xff] %vm832_vm12, %v3153_v55  ;;  %v2901_v55 = vld [vmem:[#allocation3 + $0xd8] sm:$0xff] }
 0x2e5   : > { %4463 = vst.msk [vmem:[%s7633_s16 + $0x10] sm:$0xff] %vm832_vm12, %v4431_v36  ;;  %v4432_v15 = vmax.f32 %v4400_v61, 0.0 }
 0x2e6   : > { %4461 = vst.msk [vmem:[%s7633_s16] sm:$0xff] %vm832_vm12, %v4429_v10  ;;  %v4430_v41 = vmax.f32 %v4398_v5, 0.0  ;;  %v2899_v5 = vld [vmem:[#allocation3 + $0xc8] sm:$0xff] }
 0x2e7   : > { %4464 = vst.msk [vmem:[%s7633_s16 + $0x18] sm:$0xff] %vm832_vm12, %v4432_v15 }
 0x2e8   : > { %4462 = vst.msk [vmem:[%s7633_s16 + $0x8] sm:$0xff] %vm832_vm12, %v4430_v41 }
 0x2fa   : > { %v4891_v44 = vpop.f32.mrb[52].mxu0 }
 0x2fb   : > { %v4300_v22 = vadd.f32 %v4891_v44, %v4038_v28  ;;  %v4183_v57 = vpop.f32.mrb[53].mxu0 }
 0x2fc   : > { %v4298_v38 = vadd.f32 %v4183_v57, %v4036_v52  ;;  %v4892_v59 = vpop.f32.mrb[54].mxu0 }
 0x2fd   : > { %4332 = vst.msk [vmem:[#allocation3 + $0x30] sm:$0xff] %vm832_vm12, %v4300_v22  ;;  %v4301_v35 = vadd.f32 %v4892_v59, %v4039_v11  ;;  %v4186_v62 = vpop.f32.mrb[55].mxu0 }
 0x2fe   : > { %4330 = vst.msk [vmem:[#allocation3 + $0x20] sm:$0xff] %vm832_vm12, %v4298_v38  ;;  %v4299_v51 = vadd.f32 %v4186_v62, %v4037_v53  ;;  %v4046_v53 = vld [vmem:[#allocation3 + $0x70] sm:$0xff] }
 0x2ff   : > { %4333 = vst.msk [vmem:[#allocation3 + $0x38] sm:$0xff] %vm832_vm12, %v4301_v35 }
 0x300   : > { %4331 = vst.msk [vmem:[#allocation3 + $0x28] sm:$0xff] %vm832_vm12, %v4299_v51 }
 0x304   : > { %v4364_v9 = vld [vmem:[#allocation3 + $0x30] sm:$0xff]  ;;  %v4873_v56 = vpop.f32.mrb[68].mxu1 }
 0x305   : > { %v4403_v45 = vadd.f32 %v7625_v43, %v4364_v9  ;;  %v3158_v39 = vadd.f32 %v4873_v56, %v2896_v13  ;;  %v4362_v14 = vld [vmem:[#allocation3 + $0x20] sm:$0xff]  ;;  %v3089_v4 = vpop.f32.mrb[69].mxu1 }
 0x306   : > { %v4401_v27 = vadd.f32 %v7625_v43, %v4362_v14  ;;  %v3156_v29 = vadd.f32 %v3089_v4, %v2894_v8  ;;  %v4365_v40 = vld [vmem:[#allocation3 + $0x38] sm:$0xff]  ;;  %v4874_v58 = vpop.f32.mrb[70].mxu1  ;;  %v4044_v9 = vld [vmem:[#allocation3 + $0x60] sm:$0xff]  ;;  %v4045_v8 = vld [vmem:[#allocation3 + $0x68] sm:$0xff] }
 0x307   : > { %v4435_v37 = vmax.f32 %v4403_v45, 0.0  ;;  %3190 = vst.msk [vmem:[#allocation3 + $0xb0] sm:$0xff] %vm832_vm12, %v3158_v39  ;;  %v4404_v42 = vadd.f32 %v7625_v43, %v4365_v40  ;;  %v3159_v48 = vadd.f32 %v4874_v58, %v2897_v20  ;;  %v4363_v2 = vld [vmem:[#allocation3 + $0x28] sm:$0xff]  ;;  %v3092_v54 = vpop.f32.mrb[71].mxu1  ;;  %v4047_v45 = vld [vmem:[#allocation3 + $0x78] sm:$0xff]  ;;  %v2904_v40 = vld [vmem:[#allocation3 + $0xf0] sm:$0xff] }
 0x308   : > { %v4433_v26 = vmax.f32 %v4401_v27, 0.0  ;;  %3188 = vst.msk [vmem:[#allocation3 + $0xa0] sm:$0xff] %vm832_vm12, %v3156_v29  ;;  %v4402_v12 = vadd.f32 %v7625_v43, %v4363_v2  ;;  %v3157_v24 = vadd.f32 %v3092_v54, %v2895_v50 }
 0x309   : > { %4467 = vst.msk [vmem:[%s7633_s16 + $0x30] sm:$0xff] %vm832_vm12, %v4435_v37  ;;  %v4436_v3 = vmax.f32 %v4404_v42, 0.0  ;;  %3191 = vst.msk [vmem:[#allocation3 + $0xb8] sm:$0xff] %vm832_vm12, %v3159_v48  ;;  %v2902_v48 = vld [vmem:[#allocation3 + $0xe0] sm:$0xff] }
 0x30a   : > { %4465 = vst.msk [vmem:[%s7633_s16 + $0x20] sm:$0xff] %vm832_vm12, %v4433_v26  ;;  %v4434_v6 = vmax.f32 %v4402_v12, 0.0  ;;  %3189 = vst.msk [vmem:[#allocation3 + $0xa8] sm:$0xff] %vm832_vm12, %v3157_v24  ;;  %v2905_v12 = vld [vmem:[#allocation3 + $0xf8] sm:$0xff] }
 0x30b   : > { %4468 = vst.msk [vmem:[%s7633_s16 + $0x38] sm:$0xff] %vm832_vm12, %v4436_v3 }
 0x30c   : > { %4466 = vst.msk [vmem:[%s7633_s16 + $0x28] sm:$0xff] %vm832_vm12, %v4434_v6 }
 0x320   : > { %v4895_v47 = vpop.f32.mrb[56].mxu0 }
 0x321   : > { %v4304_v21 = vadd.f32 %v4895_v47, %v4042_v25  ;;  %v4199_v49 = vpop.f32.mrb[57].mxu0 }
 0x322   : > { %v4302_v46 = vadd.f32 %v4199_v49, %v4040_v60  ;;  %v4896_v30 = vpop.f32.mrb[58].mxu0 }
 0x323   : > { %4336 = vst.msk [vmem:[#allocation3 + $0x50] sm:$0xff] %vm832_vm12, %v4304_v21  ;;  %v4305_v23 = vadd.f32 %v4896_v30, %v4043_v32  ;;  %v4202_v34 = vpop.f32.mrb[59].mxu0  ;;  %v2903_v21 = vld [vmem:[#allocation3 + $0xe8] sm:$0xff] }
 0x324   : > { %4334 = vst.msk [vmem:[#allocation3 + $0x40] sm:$0xff] %vm832_vm12, %v4302_v46  ;;  %v4303_v19 = vadd.f32 %v4202_v34, %v4041_v16  ;;  %v4050_v16 = vld [vmem:[#allocation3 + $0x90] sm:$0xff] }
 0x325   : > { %4337 = vst.msk [vmem:[#allocation3 + $0x58] sm:$0xff] %vm832_vm12, %v4305_v23 }
 0x326   : > { %4335 = vst.msk [vmem:[#allocation3 + $0x48] sm:$0xff] %vm832_vm12, %v4303_v19 }
 0x328   : > { %v4877_v1 = vpop.f32.mrb[72].mxu1 }
 0x329   : > { %v3162_v0 = vadd.f32 %v4877_v1, %v2900_v18  ;;  %v3105_v17 = vpop.f32.mrb[73].mxu1  ;;  %v4048_v18 = vld [vmem:[#allocation3 + $0x80] sm:$0xff] }
 0x32a   : > { %v4368_v31 = vld [vmem:[#allocation3 + $0x50] sm:$0xff]  ;;  %v3160_v63 = vadd.f32 %v3105_v17, %v2898_v7  ;;  %v4878_v36 = vpop.f32.mrb[74].mxu1  ;;  %v4051_v7 = vld [vmem:[#allocation3 + $0x98] sm:$0xff] }
 0x32b   : > { %v4407_v61 = vadd.f32 %v7625_v43, %v4368_v31  ;;  %3194 = vst.msk [vmem:[#allocation3 + $0xd0] sm:$0xff] %vm832_vm12, %v3162_v0  ;;  %v4366_v33 = vld [vmem:[#allocation3 + $0x40] sm:$0xff]  ;;  %v3163_v10 = vadd.f32 %v4878_v36, %v2901_v55  ;;  %v3108_v15 = vpop.f32.mrb[75].mxu1 }
 0x32c   : > { %v4405_v41 = vadd.f32 %v7625_v43, %v4366_v33  ;;  %3192 = vst.msk [vmem:[#allocation3 + $0xc0] sm:$0xff] %vm832_vm12, %v3160_v63  ;;  %v4369_v28 = vld [vmem:[#allocation3 + $0x58] sm:$0xff]  ;;  %v3161_v44 = vadd.f32 %v3108_v15, %v2899_v5  ;;  %v4049_v63 = vld [vmem:[#allocation3 + $0x88] sm:$0xff] }
 0x32d   : > { %v4439_v22 = vmax.f32 %v4407_v61, 0.0  ;;  %v4408_v52 = vadd.f32 %v7625_v43, %v4369_v28  ;;  %3195 = vst.msk [vmem:[#allocation3 + $0xd8] sm:$0xff] %vm832_vm12, %v3163_v10  ;;  %v4367_v57 = vld [vmem:[#allocation3 + $0x48] sm:$0xff] }
 0x32e   : > { %v4437_v38 = vmax.f32 %v4405_v41, 0.0  ;;  %v4406_v11 = vadd.f32 %v7625_v43, %v4367_v57  ;;  %3193 = vst.msk [vmem:[#allocation3 + $0xc8] sm:$0xff] %vm832_vm12, %v3161_v44 }
 0x32f   : > { %4471 = vst.msk [vmem:[%s7633_s16 + $0x50] sm:$0xff] %vm832_vm12, %v4439_v22  ;;  %v4440_v59 = vmax.f32 %v4408_v52, 0.0 }
 0x330   : > { %4469 = vst.msk [vmem:[%s7633_s16 + $0x40] sm:$0xff] %vm832_vm12, %v4437_v38  ;;  %v4438_v35 = vmax.f32 %v4406_v11, 0.0  ;;  %v4054_v11 = vld [vmem:[#allocation3 + $0xb0] sm:$0xff] }
 0x331   : > { %4472 = vst.msk [vmem:[%s7633_s16 + $0x58] sm:$0xff] %vm832_vm12, %v4440_v59 }
 0x332   : > { %4470 = vst.msk [vmem:[%s7633_s16 + $0x48] sm:$0xff] %vm832_vm12, %v4438_v35 }
 0x344   : > { %v4899_v62 = vpop.f32.mrb[60].mxu0 }
 0x345   : > { %v4308_v51 = vadd.f32 %v4899_v62, %v4046_v53  ;;  %v4215_v13 = vpop.f32.mrb[61].mxu0  ;;  %v4052_v53 = vld [vmem:[#allocation3 + $0xa0] sm:$0xff] }
 0x346   : > { %v4306_v56 = vadd.f32 %v4215_v13, %v4044_v9  ;;  %v4900_v39 = vpop.f32.mrb[62].mxu0  ;;  %v4055_v9 = vld [vmem:[#allocation3 + $0xb8] sm:$0xff] }
 0x347   : > { %4340 = vst.msk [vmem:[#allocation3 + $0x70] sm:$0xff] %vm832_vm12, %v4308_v51  ;;  %v4309_v14 = vadd.f32 %v4900_v39, %v4047_v45  ;;  %v4218_v4 = vpop.f32.mrb[63].mxu0  ;;  %v4053_v45 = vld [vmem:[#allocation3 + $0xa8] sm:$0xff] }
 0x348   : > { %4338 = vst.msk [vmem:[#allocation3 + $0x60] sm:$0xff] %vm832_vm12, %v4306_v56  ;;  %v4307_v27 = vadd.f32 %v4218_v4, %v4045_v8 }
 0x349   : > { %4341 = vst.msk [vmem:[#allocation3 + $0x78] sm:$0xff] %vm832_vm12, %v4309_v14 }
 0x34a   : > { %4339 = vst.msk [vmem:[#allocation3 + $0x68] sm:$0xff] %vm832_vm12, %v4307_v27 }
 0x34e   : > { %v4372_v29 = vld [vmem:[#allocation3 + $0x70] sm:$0xff]  ;;  %v4881_v20 = vpop.f32.mrb[76].mxu1 }
 0x34f   : > { %v4411_v58 = vadd.f32 %v7625_v43, %v4372_v29  ;;  %v3166_v37 = vadd.f32 %v4881_v20, %v2904_v40  ;;  %v4370_v42 = vld [vmem:[#allocation3 + $0x60] sm:$0xff]  ;;  %v3121_v2 = vpop.f32.mrb[77].mxu1 }
 0x350   : > { %v4409_v50 = vadd.f32 %v7625_v43, %v4370_v42  ;;  %v3164_v54 = vadd.f32 %v3121_v2, %v2902_v48  ;;  %v4373_v26 = vld [vmem:[#allocation3 + $0x78] sm:$0xff]  ;;  %v4882_v24 = vpop.f32.mrb[78].mxu1 }
 0x351   : > { %v4443_v3 = vmax.f32 %v4411_v58, 0.0  ;;  %3198 = vst.msk [vmem:[#allocation3 + $0xf0] sm:$0xff] %vm832_vm12, %v3166_v37  ;;  %v4412_v6 = vadd.f32 %v7625_v43, %v4373_v26  ;;  %v3167_v25 = vadd.f32 %v4882_v24, %v2905_v12  ;;  %v4371_v47 = vld [vmem:[#allocation3 + $0x68] sm:$0xff]  ;;  %v3124_v60 = vpop.f32.mrb[79].mxu1  ;;  %v4056_v24 = vld [vmem:[#allocation3 + $0xc0] sm:$0xff] }
 0x352   : > { %v4441_v49 = vmax.f32 %v4409_v50, 0.0  ;;  %3196 = vst.msk [vmem:[#allocation3 + $0xe0] sm:$0xff] %vm832_vm12, %v3164_v54  ;;  %v4410_v46 = vadd.f32 %v7625_v43, %v4371_v47  ;;  %v3165_v32 = vadd.f32 %v3124_v60, %v2903_v21  ;;  %v4058_v54 = vld [vmem:[#allocation3 + $0xd0] sm:$0xff]  ;;  %v4057_v60 = vld [vmem:[#allocation3 + $0xc8] sm:$0xff] }
 0x353   : > { %4475 = vst.msk [vmem:[%s7633_s16 + $0x70] sm:$0xff] %vm832_vm12, %v4443_v3  ;;  %v4444_v30 = vmax.f32 %v4412_v6, 0.0  ;;  %3199 = vst.msk [vmem:[#allocation3 + $0xf8] sm:$0xff] %vm832_vm12, %v3167_v25  ;;  %v4059_v25 = vld [vmem:[#allocation3 + $0xd8] sm:$0xff] }
 0x354   : > { %4473 = vst.msk [vmem:[%s7633_s16 + $0x60] sm:$0xff] %vm832_vm12, %v4441_v49  ;;  %v4442_v23 = vmax.f32 %v4410_v46, 0.0  ;;  %3197 = vst.msk [vmem:[#allocation3 + $0xe8] sm:$0xff] %vm832_vm12, %v3165_v32 }
 0x355   : > { %4476 = vst.msk [vmem:[%s7633_s16 + $0x78] sm:$0xff] %vm832_vm12, %v4444_v30 }
 0x356   : > { %4474 = vst.msk [vmem:[%s7633_s16 + $0x68] sm:$0xff] %vm832_vm12, %v4442_v23 }
 0x360   : > { %v4903_v34 = vpop.f32.mrb[64].mxu0 }
 0x361   : > { %v4312_v19 = vadd.f32 %v4903_v34, %v4050_v16  ;;  %v4231_v1 = vpop.f32.mrb[65].mxu0 }
 0x362   : > { %v4310_v0 = vadd.f32 %v4231_v1, %v4048_v18  ;;  %v4904_v17 = vpop.f32.mrb[66].mxu0 }
 0x363   : > { %4344 = vst.msk [vmem:[#allocation3 + $0x90] sm:$0xff] %vm832_vm12, %v4312_v19  ;;  %v4313_v31 = vadd.f32 %v4904_v17, %v4051_v7  ;;  %v4234_v55 = vpop.f32.mrb[67].mxu0 }
 0x364   : > { %4342 = vst.msk [vmem:[#allocation3 + $0x80] sm:$0xff] %vm832_vm12, %v4310_v0  ;;  %v4311_v36 = vadd.f32 %v4234_v55, %v4049_v63  ;;  %v4062_v63 = vld [vmem:[#allocation3 + $0xf0] sm:$0xff] }
 0x365   : > { %4345 = vst.msk [vmem:[#allocation3 + $0x98] sm:$0xff] %vm832_vm12, %v4313_v31 }
 0x366   : > { %4343 = vst.msk [vmem:[#allocation3 + $0x88] sm:$0xff] %vm832_vm12, %v4311_v36 }
 0x36a   : > { %v4376_v61 = vld [vmem:[#allocation3 + $0x90] sm:$0xff] }
 0x36b   : > { %v4415_v33 = vadd.f32 %v7625_v43, %v4376_v61  ;;  %v4374_v10 = vld [vmem:[#allocation3 + $0x80] sm:$0xff] }
 0x36c   : > { %v4413_v5 = vadd.f32 %v7625_v43, %v4374_v10  ;;  %v4377_v15 = vld [vmem:[#allocation3 + $0x98] sm:$0xff]  ;;  %v4060_v61 = vld [vmem:[#allocation3 + $0xe0] sm:$0xff] }
 0x36d   : > { %v4447_v41 = vmax.f32 %v4415_v33, 0.0  ;;  %v4416_v28 = vadd.f32 %v7625_v43, %v4377_v15  ;;  %v4375_v44 = vld [vmem:[#allocation3 + $0x88] sm:$0xff] }
 0x36e   : > { %v4445_v22 = vmax.f32 %v4413_v5, 0.0  ;;  %v4414_v52 = vadd.f32 %v7625_v43, %v4375_v44  ;;  %v4063_v5 = vld [vmem:[#allocation3 + $0xf8] sm:$0xff] }
 0x36f   : > { %4479 = vst.msk [vmem:[%s7633_s16 + $0x90] sm:$0xff] %vm832_vm12, %v4447_v41  ;;  %v4448_v57 = vmax.f32 %v4416_v28, 0.0  ;;  %v4061_v28 = vld [vmem:[#allocation3 + $0xe8] sm:$0xff] }
 0x370   : > { %4477 = vst.msk [vmem:[%s7633_s16 + $0x80] sm:$0xff] %vm832_vm12, %v4445_v22  ;;  %v4446_v38 = vmax.f32 %v4414_v52, 0.0 }
 0x371   : > { %4480 = vst.msk [vmem:[%s7633_s16 + $0x98] sm:$0xff] %vm832_vm12, %v4448_v57 }
 0x372   : > { %4478 = vst.msk [vmem:[%s7633_s16 + $0x88] sm:$0xff] %vm832_vm12, %v4446_v38  ;;  %v4907_v59 = vpop.f32.mrb[68].mxu0 }
 0x373   : > { %v4316_v35 = vadd.f32 %v4907_v59, %v4054_v11  ;;  %v4247_v62 = vpop.f32.mrb[69].mxu0 }
 0x374   : > { %v4314_v51 = vadd.f32 %v4247_v62, %v4052_v53  ;;  %v4908_v13 = vpop.f32.mrb[70].mxu0 }
 0x375   : > { %4348 = vst.msk [vmem:[#allocation3 + $0xb0] sm:$0xff] %vm832_vm12, %v4316_v35  ;;  %v4317_v56 = vadd.f32 %v4908_v13, %v4055_v9  ;;  %v4250_v39 = vpop.f32.mrb[71].mxu0 }
 0x376   : > { %4346 = vst.msk [vmem:[#allocation3 + $0xa0] sm:$0xff] %vm832_vm12, %v4314_v51  ;;  %v4315_v14 = vadd.f32 %v4250_v39, %v4053_v45 }
 0x377   : > { %4349 = vst.msk [vmem:[#allocation3 + $0xb8] sm:$0xff] %vm832_vm12, %v4317_v56 }
 0x378   : > { %4347 = vst.msk [vmem:[#allocation3 + $0xa8] sm:$0xff] %vm832_vm12, %v4315_v14 }
 0x37c   : > { %v4380_v8 = vld [vmem:[#allocation3 + $0xb0] sm:$0xff] }
 0x37d   : > { %v4419_v4 = vadd.f32 %v7625_v43, %v4380_v8  ;;  %v4378_v27 = vld [vmem:[#allocation3 + $0xa0] sm:$0xff] }
 0x37e   : > { %v4417_v29 = vadd.f32 %v7625_v43, %v4378_v27  ;;  %v4381_v40 = vld [vmem:[#allocation3 + $0xb8] sm:$0xff] }
 0x37f   : > { %v4451_v20 = vmax.f32 %v4419_v4, 0.0  ;;  %v4420_v58 = vadd.f32 %v7625_v43, %v4381_v40  ;;  %v4379_v37 = vld [vmem:[#allocation3 + $0xa8] sm:$0xff] }
 0x380   : > { %v4449_v42 = vmax.f32 %v4417_v29, 0.0  ;;  %v4418_v48 = vadd.f32 %v7625_v43, %v4379_v37 }
 0x381   : > { %4483 = vst.msk [vmem:[%s7633_s16 + $0xb0] sm:$0xff] %vm832_vm12, %v4451_v20  ;;  %v4452_v2 = vmax.f32 %v4420_v58, 0.0 }
 0x382   : > { %4481 = vst.msk [vmem:[%s7633_s16 + $0xa0] sm:$0xff] %vm832_vm12, %v4449_v42  ;;  %v4450_v50 = vmax.f32 %v4418_v48, 0.0 }
 0x383   : > { %4484 = vst.msk [vmem:[%s7633_s16 + $0xb8] sm:$0xff] %vm832_vm12, %v4452_v2 }
 0x384   : > { %4482 = vst.msk [vmem:[%s7633_s16 + $0xa8] sm:$0xff] %vm832_vm12, %v4450_v50 }
 0x386   : > { %v4911_v26 = vpop.f32.mrb[72].mxu0 }
 0x387   : > { %v4320_v12 = vadd.f32 %v4911_v26, %v4058_v54  ;;  %v4263_v3 = vpop.f32.mrb[73].mxu0 }
 0x388   : > { %v4318_v6 = vadd.f32 %v4263_v3, %v4056_v24  ;;  %v4912_v47 = vpop.f32.mrb[74].mxu0 }
 0x389   : > { %4352 = vst.msk [vmem:[#allocation3 + $0xd0] sm:$0xff] %vm832_vm12, %v4320_v12  ;;  %v4321_v21 = vadd.f32 %v4912_v47, %v4059_v25  ;;  %v4266_v49 = vpop.f32.mrb[75].mxu0 }
 0x38a   : > { %4350 = vst.msk [vmem:[#allocation3 + $0xc0] sm:$0xff] %vm832_vm12, %v4318_v6  ;;  %v4319_v46 = vadd.f32 %v4266_v49, %v4057_v60 }
 0x38b   : > { %4353 = vst.msk [vmem:[#allocation3 + $0xd8] sm:$0xff] %vm832_vm12, %v4321_v21 }
 0x38c   : > { %4351 = vst.msk [vmem:[#allocation3 + $0xc8] sm:$0xff] %vm832_vm12, %v4319_v46 }
 0x390   : > { %v4384_v32 = vld [vmem:[#allocation3 + $0xd0] sm:$0xff] }
 0x391   : > { %v4423_v30 = vadd.f32 %v7625_v43, %v4384_v32  ;;  %v4382_v23 = vld [vmem:[#allocation3 + $0xc0] sm:$0xff] }
 0x392   : > { %v4421_v16 = vadd.f32 %v7625_v43, %v4382_v23  ;;  %v4385_v34 = vld [vmem:[#allocation3 + $0xd8] sm:$0xff] }
 0x393   : > { %v4455_v19 = vmax.f32 %v4423_v30, 0.0  ;;  %v4424_v18 = vadd.f32 %v7625_v43, %v4385_v34  ;;  %v4383_v1 = vld [vmem:[#allocation3 + $0xc8] sm:$0xff] }
 0x394   : > { %v4453_v0 = vmax.f32 %v4421_v16, 0.0  ;;  %v4422_v7 = vadd.f32 %v7625_v43, %v4383_v1 }
 0x395   : > { %4487 = vst.msk [vmem:[%s7633_s16 + $0xd0] sm:$0xff] %vm832_vm12, %v4455_v19  ;;  %v4456_v17 = vmax.f32 %v4424_v18, 0.0 }
 0x396   : > { %4485 = vst.msk [vmem:[%s7633_s16 + $0xc0] sm:$0xff] %vm832_vm12, %v4453_v0  ;;  %v4454_v31 = vmax.f32 %v4422_v7, 0.0 }
 0x397   : > { %4488 = vst.msk [vmem:[%s7633_s16 + $0xd8] sm:$0xff] %vm832_vm12, %v4456_v17  ;;  %v4915_v55 = vpop.f32.mrb[76].mxu0 }
 0x398   : > { %4486 = vst.msk [vmem:[%s7633_s16 + $0xc8] sm:$0xff] %vm832_vm12, %v4454_v31  ;;  %v4324_v36 = vadd.f32 %v4915_v55, %v4062_v63  ;;  %v4279_v33 = vpop.f32.mrb[77].mxu0 }
 0x399   : > { %v4322_v10 = vadd.f32 %v4279_v33, %v4060_v61  ;;  %v4916_v15 = vpop.f32.mrb[78].mxu0 }
 0x39a   : > { %4356 = vst.msk [vmem:[#allocation3 + $0xf0] sm:$0xff] %vm832_vm12, %v4324_v36  ;;  %v4325_v41 = vadd.f32 %v4916_v15, %v4063_v5  ;;  %v4282_v44 = vpop.f32.mrb[79].mxu0 }
 0x39b   : > { %4354 = vst.msk [vmem:[#allocation3 + $0xe0] sm:$0xff] %vm832_vm12, %v4322_v10  ;;  %v4323_v22 = vadd.f32 %v4282_v44, %v4061_v28 }
 0x39c   : > { %4357 = vst.msk [vmem:[#allocation3 + $0xf8] sm:$0xff] %vm832_vm12, %v4325_v41 }
 0x39d   : > { %4355 = vst.msk [vmem:[#allocation3 + $0xe8] sm:$0xff] %vm832_vm12, %v4323_v22 }
 0x3a1   : > { %v4388_v52 = vld [vmem:[#allocation3 + $0xf0] sm:$0xff] }
 0x3a2   : > { %v4427_v57 = vadd.f32 %v7625_v43, %v4388_v52  ;;  %v4386_v38 = vld [vmem:[#allocation3 + $0xe0] sm:$0xff] }
 0x3a3   : > { %v4425_v11 = vadd.f32 %v7625_v43, %v4386_v38  ;;  %v4389_v59 = vld [vmem:[#allocation3 + $0xf8] sm:$0xff] }
 0x3a4   : > { %v4459_v35 = vmax.f32 %v4427_v57, 0.0  ;;  %v4428_v53 = vadd.f32 %v7625_v43, %v4389_v59  ;;  %v4387_v62 = vld [vmem:[#allocation3 + $0xe8] sm:$0xff] }
 0x3a5   : > { %v4457_v51 = vmax.f32 %v4425_v11, 0.0  ;;  %v4426_v9 = vadd.f32 %v7625_v43, %v4387_v62 }
 0x3a6   : > { %4491 = vst.msk [vmem:[%s7633_s16 + $0xf0] sm:$0xff] %vm832_vm12, %v4459_v35  ;;  %v4460_v13 = vmax.f32 %v4428_v53, 0.0 }
 0x3a7   : > { %4489 = vst.msk [vmem:[%s7633_s16 + $0xe0] sm:$0xff] %vm832_vm12, %v4457_v51  ;;  %v4458_v56 = vmax.f32 %v4426_v9, 0.0 }
 0x3a8   : > { %4492 = vst.msk [vmem:[%s7633_s16 + $0xf8] sm:$0xff] %vm832_vm12, %v4460_v13 }
 0x3a9   : > { %4490 = vst.msk [vmem:[%s7633_s16 + $0xe8] sm:$0xff] %vm832_vm12, %v4458_v56 }
 0x3aa PF: > { %s15_s18 = sadd.s32 1, %s4956_s18  }
 0x3ab   : > { %p12_p4 = scmp.ge.s32.totalorder %s15_s18, 4  }
 0x3ad   :  { %14 = sbr.rel (!%p12_p4) target bundleno = 1 (0x1), region = 78 }

</bundles_post_ra>
